<compile_context>
chip_gen: v7x
topology: tpu7x:2x2x1
jax: 0.10.0
libtpu: 0.0.40
codegen_flags: <defaults>
</compile_context>

<pallas_src>
import functools

import numpy as np
import jax
import jax.numpy as jnp
from jax import lax
from jax.experimental import pallas as pl
from jax.experimental.pallas import tpu as pltpu
from jax.scipy.linalg import block_diag


CLASS_NUMBER = 4
INPUT_SHAPE = (32, 32)
IN_CH = 3
MID_CH = 16
FEAT_DOWN = 4  # stand-in backbone output stride -> raw_result at 8x8


# ----------------------------------------------------------------------------
# Fused Pallas kernel: the entire AuxNet forward for one image per grid step.
# ----------------------------------------------------------------------------
def _auxnet_kernel(x_ref, pool_ref, upkT_ref,
                   w0_ref, b0_ref, w1_ref, b1_ref,
                   r0_ref, rb0_ref, r1_ref, rb1_ref, r2_ref, rb2_ref,
                   aux_ref, seg_ref,
                   pad1_ref, pad3_ref, *, Hf, Wf, dil):
    """One image:  pool -> base 3x3 + 1x1 -> aux upsample
                      -> softmax -> refine (3x3 dil, 1x1, 1x1) -> seg upsample.

    x_ref    : (1, Hin, Win, 3)  NHWC input
    pool_ref : (Hf*Wf, Hin*Win)  4x4 average-pool matrix (entries 1/16)
    upkT_ref : (Hf*Wf, Hin*Win)  kron(rh, rw).T bilinear (align_corners) matrix
    w0_ref   : (9, 3, 16)        base 3x3 taps;  b0: (1, 16)
    w1_ref   : (16, C)           base 1x1;       b1: (1, C)
    r0_ref   : (9, C, 16C)       refine 3x3 taps, block-diag per group
    r1_ref   : (16C, 64C)        refine 1x1, block-diag
    r2_ref   : (64C, C)          refine 1x1, block-diag
    aux_ref / seg_ref : (1, C, Hin*Win)  lane-dense, NCHW-flattened outputs
    pad1_ref : VMEM (Hf+2, Wf+2, 3)      halo buffer, base 3x3 (pad 1)
    pad3_ref : VMEM (Hf+2*dil, Wf+2*dil, C)  halo buffer, refine 3x3 (pad dil)
    """
    HW = Hf * Wf
    cin = x_ref.shape[-1]

    # ---- 4x4 average pool as one matmul on the flattened image -------------
    xf = x_ref[0].reshape(x_ref.shape[1] * x_ref.shape[2], cin)           # (1024, 3)
    xd = jnp.dot(pool_ref[...], xf, preferred_element_type=jnp.float32)   # (64, 3)

    # ---- base 3x3 conv (pad 1) + ReLU : 3 -> 16 -----------------------------
    pad1_ref[...] = jnp.zeros(pad1_ref.shape, pad1_ref.dtype)
    pad1_ref[1:1 + Hf, 1:1 + Wf, :] = xd.reshape(Hf, Wf, cin)
    acc = jnp.zeros((HW, b0_ref.shape[-1]), jnp.float32)
    for t in range(9):
        kh, kw = t // 3, t % 3
        xs = pad1_ref[kh:kh + Hf, kw:kw + Wf, :].reshape(HW, cin)
        acc = acc + jnp.dot(xs, w0_ref[t], preferred_element_type=jnp.float32)
    feat = jnp.maximum(acc + b0_ref[...], 0.0)                            # (64, 16)

    # ---- base 1x1 conv -> raw class logits (no ReLU) ------------------------
    raw = jnp.dot(feat, w1_ref[...],
                  preferred_element_type=jnp.float32) + b1_ref[...]        # (64, C)

    # ---- decoder bilinear upsample (align_corners=True) -> aux, lane-dense --
    aux_ref[0] = jnp.dot(raw.T, upkT_ref[...],
                         preferred_element_type=jnp.float32)               # (C, 1024)

    # ---- channel softmax -----------------------------------------------------
    m = jnp.max(raw, axis=-1, keepdims=True)
    e = jnp.exp(raw - m)
    p = e / jnp.sum(e, axis=-1, keepdims=True)                             # (64, C)

    # ---- refine conv 0: 3x3, dilation=dil, grouped (block-diag), ReLU -------
    nc = p.shape[-1]
    pad3_ref[...] = jnp.zeros(pad3_ref.shape, pad3_ref.dtype)
    pad3_ref[dil:dil + Hf, dil:dil + Wf, :] = p.reshape(Hf, Wf, nc)
    acc0 = jnp.zeros((HW, rb0_ref.shape[-1]), jnp.float32)
    for t in range(9):
        kh, kw = t // 3, t % 3
        xs = pad3_ref[kh * dil:kh * dil + Hf,
                      kw * dil:kw * dil + Wf, :].reshape(HW, nc)
        acc0 = acc0 + jnp.dot(xs, r0_ref[t], preferred_element_type=jnp.float32)
    r0 = jnp.maximum(acc0 + rb0_ref[...], 0.0)                             # (64, 16C)

    # ---- refine conv 1 / conv 2: 1x1 grouped (block-diag), ReLU --------------
    r1 = jnp.maximum(
        jnp.dot(r0, r1_ref[...], preferred_element_type=jnp.float32) + rb1_ref[...],
        0.0)                                                               # (64, 64C)
    r2 = jnp.maximum(
        jnp.dot(r1, r2_ref[...], preferred_element_type=jnp.float32) + rb2_ref[...],
        0.0)                                                               # (64, C)

    # ---- refine bilinear upsample -> seg, lane-dense -------------------------
    seg_ref[0] = jnp.dot(r2.T, upkT_ref[...],
                         preferred_element_type=jnp.float32)               # (C, 1024)


# ----------------------------------------------------------------------------
# Host-side constants: bilinear (align_corners=True) and pooling matrices
# ----------------------------------------------------------------------------
def _bilinear_matrix(m_out, m_in):
    """Row-interp matrix for F.interpolate(bilinear, align_corners=True)."""
    r = np.zeros((m_out, m_in), np.float32)
    if m_out == 1:
        r[0, 0] = 1.0
        return r
    scale = (m_in - 1) / (m_out - 1)
    for i in range(m_out):
        src = i * scale
        i0 = min(max(int(np.floor(src)), 0), m_in - 1)
        i1 = min(i0 + 1, m_in - 1)
        f = src - i0
        r[i, i0] += 1.0 - f
        r[i, i1] += f
    return r


def make_constants():
    H, W = INPUT_SHAPE
    hf, wf = H // FEAT_DOWN, W // FEAT_DOWN
    rh = _bilinear_matrix(H, hf)                              # (32, 8)
    rw = _bilinear_matrix(W, wf)                              # (32, 8)
    # K[ho*W+wo, h*wf+w] = rh[ho,h]*rw[wo,w];  pass K.T so out = feat.T @ K.T
    upkT = np.ascontiguousarray(np.kron(rh, rw).T).astype(np.float32)   # (64, 1024)
    # 4x4 mean-pool matrix on the flattened (H*W, C) image.
    pool = np.zeros((hf * wf, H * W), np.float32)
    inv = 1.0 / (FEAT_DOWN * FEAT_DOWN)
    for hh in range(hf):
        for ww in range(wf):
            for i in range(FEAT_DOWN):
                for j in range(FEAT_DOWN):
                    pool[hh * wf + ww,
                         (FEAT_DOWN * hh + i) * W + (FEAT_DOWN * ww + j)] = inv
    return jnp.asarray(pool), jnp.asarray(upkT)


# ----------------------------------------------------------------------------
# Parameters (deterministic, synthetic) + kernel-layout preparation
# ----------------------------------------------------------------------------
def init_params(key):
    C = CLASS_NUMBER

    def conv_init(k, K, cin_g, cout):
        kw, kb = jax.random.split(k)
        fan_in = K * K * cin_g
        w = jax.random.normal(kw, (K, K, cin_g, cout), jnp.float32) * np.sqrt(2.0 / fan_in)
        b = jax.random.normal(kb, (1, 1, cout), jnp.float32) * 0.01
        return w, b

    ks = jax.random.split(key, 5)
    p = {}
    # stand-in base (backbone+midnet+decoder conv producing raw class logits)
    p["base_w0"], p["base_b0"] = conv_init(ks[0], 3, IN_CH, MID_CH)
    p["base_w1"], p["base_b1"] = conv_init(ks[1], 1, MID_CH, C)
    # refine head: conv_nxn(C, 16C, k=3, groups=C, dil=3) -> (16C, 64C, k=1, groups=C)
    #              -> (64C, C, k=1, groups=C)
    p["ref_w0"], p["ref_b0"] = conv_init(ks[2], 3, 1, 16 * C)
    p["ref_w1"], p["ref_b1"] = conv_init(ks[3], 1, 16, 64 * C)
    p["ref_w2"], p["ref_b2"] = conv_init(ks[4], 1, 64, C)
    return p


def prepare_kernel_params(params):
    """Convert HWIO (grouped) weights to the dense/block-diag layouts the
    fused kernel consumes.  Done once on the host."""
    C = CLASS_NUMBER
    kp = {}
    kp["w0"] = params["base_w0"].reshape(9, IN_CH, MID_CH)        # (9, 3, 16)
    kp["b0"] = params["base_b0"].reshape(1, MID_CH)
    kp["w1"] = params["base_w1"][0, 0]                             # (16, C)
    kp["b1"] = params["base_b1"].reshape(1, C)

    # refine 3x3 grouped (cin_g=1): per-tap block-diag (C, 16C)
    w = params["ref_w0"]                                           # (3, 3, 1, 16C)
    taps = []
    for kh in range(3):
        for kw in range(3):
            blocks = [w[kh, kw, 0, g * 16:(g + 1) * 16].reshape(1, 16)
                      for g in range(C)]
            taps.append(block_diag(*blocks))
    kp["r0"] = jnp.stack(taps, axis=0)                             # (9, C, 16C)
    kp["rb0"] = params["ref_b0"].reshape(1, 16 * C)

    # refine 1x1 grouped 16C -> 64C: block-diag (16C, 64C)
    w = params["ref_w1"][0, 0]                                     # (16, 64C)
    kp["r1"] = block_diag(*[w[:, g * 64:(g + 1) * 64] for g in range(C)])
    kp["rb1"] = params["ref_b1"].reshape(1, 64 * C)

    # refine 1x1 grouped 64C -> C: block-diag (64C, C)
    w = params["ref_w2"][0, 0]                                     # (64, C)
    kp["r2"] = block_diag(*[w[:, g:g + 1] for g in range(C)])
    kp["rb2"] = params["ref_b2"].reshape(1, C)
    return kp


# ----------------------------------------------------------------------------
# Forward pass (single fused pallas_call)
# ----------------------------------------------------------------------------
def aux_net_forward(kparams, consts, x_nchw, refine=True):
    """AuxNet.forward. x_nchw: (N, 3, H, W) float32 -> NCHW outputs."""
    N, _, H, W = x_nchw.shape
    C = CLASS_NUMBER
    Hf, Wf = H // FEAT_DOWN, W // FEAT_DOWN
    pool, upkT = consts
    kp = kparams

    x = jnp.transpose(x_nchw, (0, 2, 3, 1))            # NHWC (single tiny XLA op)

    kernel = functools.partial(_auxnet_kernel, Hf=Hf, Wf=Wf, dil=3)

    def const_spec(a):
        return pl.BlockSpec(a.shape, lambda n, _nd=a.ndim: (0,) * _nd)

    aux_flat, seg_flat = pl.pallas_call(
        kernel,
        out_shape=(jax.ShapeDtypeStruct((N, C, H * W), jnp.float32),
                   jax.ShapeDtypeStruct((N, C, H * W), jnp.float32)),
        grid=(N,),
        in_specs=[
            pl.BlockSpec((1, H, W, IN_CH), lambda n: (n, 0, 0, 0)),
            const_spec(pool), const_spec(upkT),
            const_spec(kp["w0"]), const_spec(kp["b0"]),
            const_spec(kp["w1"]), const_spec(kp["b1"]),
            const_spec(kp["r0"]), const_spec(kp["rb0"]),
            const_spec(kp["r1"]), const_spec(kp["rb1"]),
            const_spec(kp["r2"]), const_spec(kp["rb2"]),
        ],
        out_specs=(pl.BlockSpec((1, C, H * W), lambda n: (n, 0, 0)),
                   pl.BlockSpec((1, C, H * W), lambda n: (n, 0, 0))),
        scratch_shapes=[
            pltpu.VMEM((Hf + 2, Wf + 2, IN_CH), jnp.float32),      # base 3x3 halo
            pltpu.VMEM((Hf + 6, Wf + 6, C), jnp.float32),          # refine 3x3 (dil=3)
        ],
        compiler_params=pltpu.CompilerParams(dimension_semantics=("parallel",)),
    )(x, pool, upkT, kp["w0"], kp["b0"], kp["w1"], kp["b1"],
      kp["r0"], kp["rb0"], kp["r1"], kp["rb1"], kp["r2"], kp["rb2"])

    aux = aux_flat.reshape(N, C, H, W)                 # NCHW (layout-only reshape)
    if not refine:
        return aux
    return {"aux": aux, "seg": seg_flat.reshape(N, C, H, W)}


# ----------------------------------------------------------------------------
# Pure-JAX reference (for correctness check of the fused kernel)
# ----------------------------------------------------------------------------
def _conv_ref(x, w, b, dil, groups, relu):
    K = w.shape[0]
    pad = dil * (K - 1) // 2
    y = lax.conv_general_dilated(
        x, w, window_strides=(1, 1), padding=[(pad, pad), (pad, pad)],
        rhs_dilation=(dil, dil), dimension_numbers=("NHWC", "HWIO", "NHWC"),
        feature_group_count=groups, precision=lax.Precision.HIGHEST)
    y = y + b.reshape(1, 1, 1, -1)
    return jnp.maximum(y, 0.0) if relu else y


def reference_forward(params, x_nchw):
    x = jnp.transpose(x_nchw, (0, 2, 3, 1))
    N, H, W, _ = x.shape
    d = FEAT_DOWN
    xd = x.reshape(N, H // d, d, W // d, d, x.shape[-1]).mean(axis=(2, 4))
    f = _conv_ref(xd, params["base_w0"], params["base_b0"], 1, 1, True)
    raw = _conv_ref(f, params["base_w1"], params["base_b1"], 1, 1, False)

    def up(z_nchw):
        rh = _bilinear_matrix(H, z_nchw.shape[2])
        rw = _bilinear_matrix(W, z_nchw.shape[3])
        t = jnp.einsum("ph,nchw->ncpw", rh, z_nchw)
        return jnp.einsum("qw,ncpw->ncpq", rw, t)

    aux = up(jnp.transpose(raw, (0, 3, 1, 2)))
    p = jax.nn.softmax(raw, axis=-1)
    r = _conv_ref(p, params["ref_w0"], params["ref_b0"], 3, CLASS_NUMBER, True)
    r = _conv_ref(r, params["ref_w1"], params["ref_b1"], 1, CLASS_NUMBER, True)
    r = _conv_ref(r, params["ref_w2"], params["ref_b2"], 1, CLASS_NUMBER, True)
    seg = up(jnp.transpose(r, (0, 3, 1, 2)))
    return {"aux": aux, "seg": seg}


# ----------------------------------------------------------------------------
if __name__ == "__main__":
    key = jax.random.PRNGKey(0)
    kx, kparam = jax.random.split(key)
    x = jax.random.normal(kx, (2, IN_CH, *INPUT_SHAPE), jnp.float32)

    params = init_params(kparam)
    kparams = prepare_kernel_params(params)
    consts = make_constants()

    fwd = jax.jit(functools.partial(aux_net_forward, refine=True))
    out = fwd(kparams, consts, x)
    out = jax.tree_util.tree_map(jax.block_until_ready, out)

    assert out["aux"].shape == (2, CLASS_NUMBER, *INPUT_SHAPE)
    assert out["seg"].shape == (2, CLASS_NUMBER, *INPUT_SHAPE)

    ref = reference_forward(params, x)
    for name in ("aux", "seg"):
        err = float(jnp.max(jnp.abs(out[name] - ref[name])))
        assert err < 2e-3, f"{name} mismatch vs reference: {err}"

    print("KERNEL_OK")
</pallas_src>

<mosaic_0001>
module attributes {stable_mosaic.version = 11 : i64} {
  func.func @_auxnet_kernel(%arg0: i32, %arg1: memref<1x32x32x3xf32, #tpu.memory_space<vmem>>, %arg2: memref<64x1024xf32, #tpu.memory_space<vmem>>, %arg3: memref<64x1024xf32, #tpu.memory_space<vmem>>, %arg4: memref<9x3x16xf32, #tpu.memory_space<vmem>>, %arg5: memref<1x16xf32, #tpu.memory_space<vmem>>, %arg6: memref<16x4xf32, #tpu.memory_space<vmem>>, %arg7: memref<1x4xf32, #tpu.memory_space<vmem>>, %arg8: memref<9x4x64xf32, #tpu.memory_space<vmem>>, %arg9: memref<1x64xf32, #tpu.memory_space<vmem>>, %arg10: memref<64x256xf32, #tpu.memory_space<vmem>>, %arg11: memref<1x256xf32, #tpu.memory_space<vmem>>, %arg12: memref<256x4xf32, #tpu.memory_space<vmem>>, %arg13: memref<1x4xf32, #tpu.memory_space<vmem>>, %arg14: memref<1x4x1024xf32, #tpu.memory_space<vmem>>, %arg15: memref<1x4x1024xf32, #tpu.memory_space<vmem>>, %arg16: memref<10x10x3xf32, #tpu.memory_space<vmem>>, %arg17: memref<14x14x4xf32, #tpu.memory_space<vmem>>) attributes {dimension_semantics = [#tpu.dimension_semantics<parallel>], iteration_bounds = array<i64: 2>, scalar_prefetch = 0 : i64, scratch_operands = 2 : i64, tpu.core_type = #tpu.core_type<tc>, window_params = [{transform_indices = @transform_0, window_bounds = array<i64: 1, 32, 32, 3>}, {pipeline_mode = #tpu.pipeline_mode<synchronous>, transform_indices = @transform_1, window_bounds = array<i64: 64, 1024>}, {pipeline_mode = #tpu.pipeline_mode<synchronous>, transform_indices = @transform_2, window_bounds = array<i64: 64, 1024>}, {pipeline_mode = #tpu.pipeline_mode<synchronous>, transform_indices = @transform_3, window_bounds = array<i64: 9, 3, 16>}, {pipeline_mode = #tpu.pipeline_mode<synchronous>, transform_indices = @transform_4, window_bounds = array<i64: 1, 16>}, {pipeline_mode = #tpu.pipeline_mode<synchronous>, transform_indices = @transform_5, window_bounds = array<i64: 16, 4>}, {pipeline_mode = #tpu.pipeline_mode<synchronous>, transform_indices = @transform_6, window_bounds = array<i64: 1, 4>}, {pipeline_mode = #tpu.pipeline_mode<synchronous>, transform_indices = @transform_7, window_bounds = array<i64: 9, 4, 64>}, {pipeline_mode = #tpu.pipeline_mode<synchronous>, transform_indices = @transform_8, window_bounds = array<i64: 1, 64>}, {pipeline_mode = #tpu.pipeline_mode<synchronous>, transform_indices = @transform_9, window_bounds = array<i64: 64, 256>}, {pipeline_mode = #tpu.pipeline_mode<synchronous>, transform_indices = @transform_10, window_bounds = array<i64: 1, 256>}, {pipeline_mode = #tpu.pipeline_mode<synchronous>, transform_indices = @transform_11, window_bounds = array<i64: 256, 4>}, {pipeline_mode = #tpu.pipeline_mode<synchronous>, transform_indices = @transform_12, window_bounds = array<i64: 1, 4>}, {transform_indices = @transform_13, window_bounds = array<i64: 1, 4, 1024>}, {transform_indices = @transform_14, window_bounds = array<i64: 1, 4, 1024>}]} {
    %c0 = arith.constant 0 : index
    %c0_0 = arith.constant 0 : index
    %c0_1 = arith.constant 0 : index
    %c0_2 = arith.constant 0 : index
    %0 = vector.load %arg1[%c0, %c0_0, %c0_1, %c0_2] : memref<1x32x32x3xf32, #tpu.memory_space<vmem>>, vector<1x32x32x3xf32>
    %1 = vector.shape_cast %0 : vector<1x32x32x3xf32> to vector<32x32x3xf32>
    %2 = vector.shape_cast %1 : vector<32x32x3xf32> to vector<1024x3xf32>
    %c0_3 = arith.constant 0 : index
    %c0_4 = arith.constant 0 : index
    %3 = vector.load %arg2[%c0_3, %c0_4] : memref<64x1024xf32, #tpu.memory_space<vmem>>, vector<64x1024xf32>
    %cst = arith.constant dense<0.000000e+00> : vector<64x3xf32>
    %4 = tpu.matmul %3, %2, %cst {dimension_numbers = #tpu.dot_dimension_numbers<[1], [0], [0], [1], [0, 0, 1, 1], [], []>} : vector<64x1024xf32>, vector<1024x3xf32>, vector<64x3xf32> -> vector<64x3xf32>
    %cst_5 = arith.constant 0.000000e+00 : f32
    %5 = vector.broadcast %cst_5 : f32 to vector<10x10x3xf32>
    %c0_6 = arith.constant 0 : index
    %c0_7 = arith.constant 0 : index
    %c0_8 = arith.constant 0 : index
    %6 = vector.load %arg16[%c0_6, %c0_7, %c0_8] : memref<10x10x3xf32, #tpu.memory_space<vmem>>, vector<10x10x3xf32>
    tpu.vector_store %arg16[%c0_6, %c0_7, %c0_8], %5 {strides = array<i32>} : memref<10x10x3xf32, #tpu.memory_space<vmem>>, vector<10x10x3xf32>,
    %7 = vector.shape_cast %4 : vector<64x3xf32> to vector<8x8x3xf32>
    %c1 = arith.constant 1 : index
    %c1_9 = arith.constant 1 : index
    %c0_10 = arith.constant 0 : index
    %8 = vector.load %arg16[%c1, %c1_9, %c0_10] : memref<10x10x3xf32, #tpu.memory_space<vmem>>, vector<8x8x3xf32>
    tpu.vector_store %arg16[%c1, %c1_9, %c0_10], %7 {strides = array<i32>} : memref<10x10x3xf32, #tpu.memory_space<vmem>>, vector<8x8x3xf32>,
    %cst_11 = arith.constant 0.000000e+00 : f32
    %9 = vector.broadcast %cst_11 : f32 to vector<64x16xf32>
    %c0_12 = arith.constant 0 : index
    %c0_13 = arith.constant 0 : index
    %c0_14 = arith.constant 0 : index
    %10 = vector.load %arg16[%c0_12, %c0_13, %c0_14] : memref<10x10x3xf32, #tpu.memory_space<vmem>>, vector<8x8x3xf32>
    %11 = vector.shape_cast %10 : vector<8x8x3xf32> to vector<64x3xf32>
    %c0_15 = arith.constant 0 : index
    %c0_16 = arith.constant 0 : index
    %c0_17 = arith.constant 0 : index
    %12 = vector.load %arg4[%c0_15, %c0_16, %c0_17] : memref<9x3x16xf32, #tpu.memory_space<vmem>>, vector<1x3x16xf32>
    %13 = vector.shape_cast %12 : vector<1x3x16xf32> to vector<3x16xf32>
    %cst_18 = arith.constant dense<0.000000e+00> : vector<64x16xf32>
    %14 = tpu.matmul %11, %13, %cst_18 {dimension_numbers = #tpu.dot_dimension_numbers<[1], [0], [0], [1], [0, 0, 1, 1], [], []>} : vector<64x3xf32>, vector<3x16xf32>, vector<64x16xf32> -> vector<64x16xf32>
    %15 = arith.addf %9, %14 : vector<64x16xf32>
    %c0_19 = arith.constant 0 : index
    %c1_20 = arith.constant 1 : index
    %c0_21 = arith.constant 0 : index
    %16 = vector.load %arg16[%c0_19, %c1_20, %c0_21] : memref<10x10x3xf32, #tpu.memory_space<vmem>>, vector<8x8x3xf32>
    %17 = vector.shape_cast %16 : vector<8x8x3xf32> to vector<64x3xf32>
    %c1_22 = arith.constant 1 : index
    %c0_23 = arith.constant 0 : index
    %c0_24 = arith.constant 0 : index
    %18 = vector.load %arg4[%c1_22, %c0_23, %c0_24] : memref<9x3x16xf32, #tpu.memory_space<vmem>>, vector<1x3x16xf32>
    %19 = vector.shape_cast %18 : vector<1x3x16xf32> to vector<3x16xf32>
    %cst_25 = arith.constant dense<0.000000e+00> : vector<64x16xf32>
    %20 = tpu.matmul %17, %19, %cst_25 {dimension_numbers = #tpu.dot_dimension_numbers<[1], [0], [0], [1], [0, 0, 1, 1], [], []>} : vector<64x3xf32>, vector<3x16xf32>, vector<64x16xf32> -> vector<64x16xf32>
    %21 = arith.addf %15, %20 : vector<64x16xf32>
    %c0_26 = arith.constant 0 : index
    %c2 = arith.constant 2 : index
    %c0_27 = arith.constant 0 : index
    %22 = vector.load %arg16[%c0_26, %c2, %c0_27] : memref<10x10x3xf32, #tpu.memory_space<vmem>>, vector<8x8x3xf32>
    %23 = vector.shape_cast %22 : vector<8x8x3xf32> to vector<64x3xf32>
    %c2_28 = arith.constant 2 : index
    %c0_29 = arith.constant 0 : index
    %c0_30 = arith.constant 0 : index
    %24 = vector.load %arg4[%c2_28, %c0_29, %c0_30] : memref<9x3x16xf32, #tpu.memory_space<vmem>>, vector<1x3x16xf32>
    %25 = vector.shape_cast %24 : vector<1x3x16xf32> to vector<3x16xf32>
    %cst_31 = arith.constant dense<0.000000e+00> : vector<64x16xf32>
    %26 = tpu.matmul %23, %25, %cst_31 {dimension_numbers = #tpu.dot_dimension_numbers<[1], [0], [0], [1], [0, 0, 1, 1], [], []>} : vector<64x3xf32>, vector<3x16xf32>, vector<64x16xf32> -> vector<64x16xf32>
    %27 = arith.addf %21, %26 : vector<64x16xf32>
    %c1_32 = arith.constant 1 : index
    %c0_33 = arith.constant 0 : index
    %c0_34 = arith.constant 0 : index
    %28 = vector.load %arg16[%c1_32, %c0_33, %c0_34] : memref<10x10x3xf32, #tpu.memory_space<vmem>>, vector<8x8x3xf32>
    %29 = vector.shape_cast %28 : vector<8x8x3xf32> to vector<64x3xf32>
    %c3 = arith.constant 3 : index
    %c0_35 = arith.constant 0 : index
    %c0_36 = arith.constant 0 : index
    %30 = vector.load %arg4[%c3, %c0_35, %c0_36] : memref<9x3x16xf32, #tpu.memory_space<vmem>>, vector<1x3x16xf32>
    %31 = vector.shape_cast %30 : vector<1x3x16xf32> to vector<3x16xf32>
    %cst_37 = arith.constant dense<0.000000e+00> : vector<64x16xf32>
    %32 = tpu.matmul %29, %31, %cst_37 {dimension_numbers = #tpu.dot_dimension_numbers<[1], [0], [0], [1], [0, 0, 1, 1], [], []>} : vector<64x3xf32>, vector<3x16xf32>, vector<64x16xf32> -> vector<64x16xf32>
    %33 = arith.addf %27, %32 : vector<64x16xf32>
    %c1_38 = arith.constant 1 : index
    %c1_39 = arith.constant 1 : index
    %c0_40 = arith.constant 0 : index
    %34 = vector.load %arg16[%c1_38, %c1_39, %c0_40] : memref<10x10x3xf32, #tpu.memory_space<vmem>>, vector<8x8x3xf32>
    %35 = vector.shape_cast %34 : vector<8x8x3xf32> to vector<64x3xf32>
    %c4 = arith.constant 4 : index
    %c0_41 = arith.constant 0 : index
    %c0_42 = arith.constant 0 : index
    %36 = vector.load %arg4[%c4, %c0_41, %c0_42] : memref<9x3x16xf32, #tpu.memory_space<vmem>>, vector<1x3x16xf32>
    %37 = vector.shape_cast %36 : vector<1x3x16xf32> to vector<3x16xf32>
    %cst_43 = arith.constant dense<0.000000e+00> : vector<64x16xf32>
    %38 = tpu.matmul %35, %37, %cst_43 {dimension_numbers = #tpu.dot_dimension_numbers<[1], [0], [0], [1], [0, 0, 1, 1], [], []>} : vector<64x3xf32>, vector<3x16xf32>, vector<64x16xf32> -> vector<64x16xf32>
    %39 = arith.addf %33, %38 : vector<64x16xf32>
    %c1_44 = arith.constant 1 : index
    %c2_45 = arith.constant 2 : index
    %c0_46 = arith.constant 0 : index
    %40 = vector.load %arg16[%c1_44, %c2_45, %c0_46] : memref<10x10x3xf32, #tpu.memory_space<vmem>>, vector<8x8x3xf32>
    %41 = vector.shape_cast %40 : vector<8x8x3xf32> to vector<64x3xf32>
    %c5 = arith.constant 5 : index
    %c0_47 = arith.constant 0 : index
    %c0_48 = arith.constant 0 : index
    %42 = vector.load %arg4[%c5, %c0_47, %c0_48] : memref<9x3x16xf32, #tpu.memory_space<vmem>>, vector<1x3x16xf32>
    %43 = vector.shape_cast %42 : vector<1x3x16xf32> to vector<3x16xf32>
    %cst_49 = arith.constant dense<0.000000e+00> : vector<64x16xf32>
    %44 = tpu.matmul %41, %43, %cst_49 {dimension_numbers = #tpu.dot_dimension_numbers<[1], [0], [0], [1], [0, 0, 1, 1], [], []>} : vector<64x3xf32>, vector<3x16xf32>, vector<64x16xf32> -> vector<64x16xf32>
    %45 = arith.addf %39, %44 : vector<64x16xf32>
    %c2_50 = arith.constant 2 : index
    %c0_51 = arith.constant 0 : index
    %c0_52 = arith.constant 0 : index
    %46 = vector.load %arg16[%c2_50, %c0_51, %c0_52] : memref<10x10x3xf32, #tpu.memory_space<vmem>>, vector<8x8x3xf32>
    %47 = vector.shape_cast %46 : vector<8x8x3xf32> to vector<64x3xf32>
    %c6 = arith.constant 6 : index
    %c0_53 = arith.constant 0 : index
    %c0_54 = arith.constant 0 : index
    %48 = vector.load %arg4[%c6, %c0_53, %c0_54] : memref<9x3x16xf32, #tpu.memory_space<vmem>>, vector<1x3x16xf32>
    %49 = vector.shape_cast %48 : vector<1x3x16xf32> to vector<3x16xf32>
    %cst_55 = arith.constant dense<0.000000e+00> : vector<64x16xf32>
    %50 = tpu.matmul %47, %49, %cst_55 {dimension_numbers = #tpu.dot_dimension_numbers<[1], [0], [0], [1], [0, 0, 1, 1], [], []>} : vector<64x3xf32>, vector<3x16xf32>, vector<64x16xf32> -> vector<64x16xf32>
    %51 = arith.addf %45, %50 : vector<64x16xf32>
    %c2_56 = arith.constant 2 : index
    %c1_57 = arith.constant 1 : index
    %c0_58 = arith.constant 0 : index
    %52 = vector.load %arg16[%c2_56, %c1_57, %c0_58] : memref<10x10x3xf32, #tpu.memory_space<vmem>>, vector<8x8x3xf32>
    %53 = vector.shape_cast %52 : vector<8x8x3xf32> to vector<64x3xf32>
    %c7 = arith.constant 7 : index
    %c0_59 = arith.constant 0 : index
    %c0_60 = arith.constant 0 : index
    %54 = vector.load %arg4[%c7, %c0_59, %c0_60] : memref<9x3x16xf32, #tpu.memory_space<vmem>>, vector<1x3x16xf32>
    %55 = vector.shape_cast %54 : vector<1x3x16xf32> to vector<3x16xf32>
    %cst_61 = arith.constant dense<0.000000e+00> : vector<64x16xf32>
    %56 = tpu.matmul %53, %55, %cst_61 {dimension_numbers = #tpu.dot_dimension_numbers<[1], [0], [0], [1], [0, 0, 1, 1], [], []>} : vector<64x3xf32>, vector<3x16xf32>, vector<64x16xf32> -> vector<64x16xf32>
    %57 = arith.addf %51, %56 : vector<64x16xf32>
    %c2_62 = arith.constant 2 : index
    %c2_63 = arith.constant 2 : index
    %c0_64 = arith.constant 0 : index
    %58 = vector.load %arg16[%c2_62, %c2_63, %c0_64] : memref<10x10x3xf32, #tpu.memory_space<vmem>>, vector<8x8x3xf32>
    %59 = vector.shape_cast %58 : vector<8x8x3xf32> to vector<64x3xf32>
    %c8 = arith.constant 8 : index
    %c0_65 = arith.constant 0 : index
    %c0_66 = arith.constant 0 : index
    %60 = vector.load %arg4[%c8, %c0_65, %c0_66] : memref<9x3x16xf32, #tpu.memory_space<vmem>>, vector<1x3x16xf32>
    %61 = vector.shape_cast %60 : vector<1x3x16xf32> to vector<3x16xf32>
    %cst_67 = arith.constant dense<0.000000e+00> : vector<64x16xf32>
    %62 = tpu.matmul %59, %61, %cst_67 {dimension_numbers = #tpu.dot_dimension_numbers<[1], [0], [0], [1], [0, 0, 1, 1], [], []>} : vector<64x3xf32>, vector<3x16xf32>, vector<64x16xf32> -> vector<64x16xf32>
    %63 = arith.addf %57, %62 : vector<64x16xf32>
    %c0_68 = arith.constant 0 : index
    %c0_69 = arith.constant 0 : index
    %64 = vector.load %arg5[%c0_68, %c0_69] : memref<1x16xf32, #tpu.memory_space<vmem>>, vector<1x16xf32>
    %65 = vector.broadcast %64 : vector<1x16xf32> to vector<64x16xf32>
    %66 = arith.addf %63, %65 : vector<64x16xf32>
    %cst_70 = arith.constant 0.000000e+00 : f32
    %67 = vector.broadcast %cst_70 : f32 to vector<64x16xf32>
    %68 = arith.maximumf %66, %67 : vector<64x16xf32>
    %c0_71 = arith.constant 0 : index
    %c0_72 = arith.constant 0 : index
    %69 = vector.load %arg6[%c0_71, %c0_72] : memref<16x4xf32, #tpu.memory_space<vmem>>, vector<16x4xf32>
    %cst_73 = arith.constant dense<0.000000e+00> : vector<64x4xf32>
    %70 = tpu.matmul %68, %69, %cst_73 {dimension_numbers = #tpu.dot_dimension_numbers<[1], [0], [0], [1], [0, 0, 1, 1], [], []>} : vector<64x16xf32>, vector<16x4xf32>, vector<64x4xf32> -> vector<64x4xf32>
    %c0_74 = arith.constant 0 : index
    %c0_75 = arith.constant 0 : index
    %71 = vector.load %arg7[%c0_74, %c0_75] : memref<1x4xf32, #tpu.memory_space<vmem>>, vector<1x4xf32>
    %72 = vector.broadcast %71 : vector<1x4xf32> to vector<64x4xf32>
    %73 = arith.addf %70, %72 : vector<64x4xf32>
    %74 = tpu.transpose %73, [1, 0] : vector<64x4xf32> -> vector<4x64xf32>
    %c0_76 = arith.constant 0 : index
    %c0_77 = arith.constant 0 : index
    %75 = vector.load %arg3[%c0_76, %c0_77] : memref<64x1024xf32, #tpu.memory_space<vmem>>, vector<64x1024xf32>
    %cst_78 = arith.constant dense<0.000000e+00> : vector<4x1024xf32>
    %76 = tpu.matmul %74, %75, %cst_78 {dimension_numbers = #tpu.dot_dimension_numbers<[1], [0], [0], [1], [0, 0, 1, 1], [], []>} : vector<4x64xf32>, vector<64x1024xf32>, vector<4x1024xf32> -> vector<4x1024xf32>
    %c0_79 = arith.constant 0 : index
    %c0_80 = arith.constant 0 : index
    %c0_81 = arith.constant 0 : index
    %77 = vector.load %arg14[%c0_79, %c0_80, %c0_81] : memref<1x4x1024xf32, #tpu.memory_space<vmem>>, vector<1x4x1024xf32>
    %78 = vector.shape_cast %77 : vector<1x4x1024xf32> to vector<4x1024xf32>
    %79 = vector.shape_cast %76 : vector<4x1024xf32> to vector<1x4x1024xf32>
    tpu.vector_store %arg14[%c0_79, %c0_80, %c0_81], %79 {strides = array<i32>} : memref<1x4x1024xf32, #tpu.memory_space<vmem>>, vector<1x4x1024xf32>,
    %cst_82 = arith.constant dense<0xFF800000> : vector<64xf32>
    %80 = vector.multi_reduction <maximumf>, %73, %cst_82 [1] : vector<64x4xf32> to vector<64xf32>
    %81 = vector.shape_cast %80 : vector<64xf32> to vector<64x1xf32>
    %82 = vector.broadcast %81 : vector<64x1xf32> to vector<64x4xf32>
    %83 = arith.subf %73, %82 : vector<64x4xf32>
    %84 = math.exp %83 : vector<64x4xf32>
    %cst_83 = arith.constant dense<0.000000e+00> : vector<64xf32>
    %85 = vector.multi_reduction <add>, %84, %cst_83 [1] : vector<64x4xf32> to vector<64xf32>
    %86 = vector.shape_cast %85 : vector<64xf32> to vector<64x1xf32>
    %87 = vector.broadcast %86 : vector<64x1xf32> to vector<64x4xf32>
    %88 = arith.divf %84, %87 : vector<64x4xf32>
    %cst_84 = arith.constant 0.000000e+00 : f32
    %89 = vector.broadcast %cst_84 : f32 to vector<14x14x4xf32>
    %c0_85 = arith.constant 0 : index
    %c0_86 = arith.constant 0 : index
    %c0_87 = arith.constant 0 : index
    %90 = vector.load %arg17[%c0_85, %c0_86, %c0_87] : memref<14x14x4xf32, #tpu.memory_space<vmem>>, vector<14x14x4xf32>
    tpu.vector_store %arg17[%c0_85, %c0_86, %c0_87], %89 {strides = array<i32>} : memref<14x14x4xf32, #tpu.memory_space<vmem>>, vector<14x14x4xf32>,
    %91 = vector.shape_cast %88 : vector<64x4xf32> to vector<8x8x4xf32>
    %c3_88 = arith.constant 3 : index
    %c3_89 = arith.constant 3 : index
    %c0_90 = arith.constant 0 : index
    %92 = vector.load %arg17[%c3_88, %c3_89, %c0_90] : memref<14x14x4xf32, #tpu.memory_space<vmem>>, vector<8x8x4xf32>
    tpu.vector_store %arg17[%c3_88, %c3_89, %c0_90], %91 {strides = array<i32>} : memref<14x14x4xf32, #tpu.memory_space<vmem>>, vector<8x8x4xf32>,
    %cst_91 = arith.constant 0.000000e+00 : f32
    %93 = vector.broadcast %cst_91 : f32 to vector<64x64xf32>
    %c0_92 = arith.constant 0 : index
    %c0_93 = arith.constant 0 : index
    %c0_94 = arith.constant 0 : index
    %94 = vector.load %arg17[%c0_92, %c0_93, %c0_94] : memref<14x14x4xf32, #tpu.memory_space<vmem>>, vector<8x8x4xf32>
    %95 = vector.shape_cast %94 : vector<8x8x4xf32> to vector<64x4xf32>
    %c0_95 = arith.constant 0 : index
    %c0_96 = arith.constant 0 : index
    %c0_97 = arith.constant 0 : index
    %96 = vector.load %arg8[%c0_95, %c0_96, %c0_97] : memref<9x4x64xf32, #tpu.memory_space<vmem>>, vector<1x4x64xf32>
    %97 = vector.shape_cast %96 : vector<1x4x64xf32> to vector<4x64xf32>
    %cst_98 = arith.constant dense<0.000000e+00> : vector<64x64xf32>
    %98 = tpu.matmul %95, %97, %cst_98 {dimension_numbers = #tpu.dot_dimension_numbers<[1], [0], [0], [1], [0, 0, 1, 1], [], []>} : vector<64x4xf32>, vector<4x64xf32>, vector<64x64xf32> -> vector<64x64xf32>
    %99 = arith.addf %93, %98 : vector<64x64xf32>
    %c0_99 = arith.constant 0 : index
    %c3_100 = arith.constant 3 : index
    %c0_101 = arith.constant 0 : index
    %100 = vector.load %arg17[%c0_99, %c3_100, %c0_101] : memref<14x14x4xf32, #tpu.memory_space<vmem>>, vector<8x8x4xf32>
    %101 = vector.shape_cast %100 : vector<8x8x4xf32> to vector<64x4xf32>
    %c1_102 = arith.constant 1 : index
    %c0_103 = arith.constant 0 : index
    %c0_104 = arith.constant 0 : index
    %102 = vector.load %arg8[%c1_102, %c0_103, %c0_104] : memref<9x4x64xf32, #tpu.memory_space<vmem>>, vector<1x4x64xf32>
    %103 = vector.shape_cast %102 : vector<1x4x64xf32> to vector<4x64xf32>
    %cst_105 = arith.constant dense<0.000000e+00> : vector<64x64xf32>
    %104 = tpu.matmul %101, %103, %cst_105 {dimension_numbers = #tpu.dot_dimension_numbers<[1], [0], [0], [1], [0, 0, 1, 1], [], []>} : vector<64x4xf32>, vector<4x64xf32>, vector<64x64xf32> -> vector<64x64xf32>
    %105 = arith.addf %99, %104 : vector<64x64xf32>
    %c0_106 = arith.constant 0 : index
    %c6_107 = arith.constant 6 : index
    %c0_108 = arith.constant 0 : index
    %106 = vector.load %arg17[%c0_106, %c6_107, %c0_108] : memref<14x14x4xf32, #tpu.memory_space<vmem>>, vector<8x8x4xf32>
    %107 = vector.shape_cast %106 : vector<8x8x4xf32> to vector<64x4xf32>
    %c2_109 = arith.constant 2 : index
    %c0_110 = arith.constant 0 : index
    %c0_111 = arith.constant 0 : index
    %108 = vector.load %arg8[%c2_109, %c0_110, %c0_111] : memref<9x4x64xf32, #tpu.memory_space<vmem>>, vector<1x4x64xf32>
    %109 = vector.shape_cast %108 : vector<1x4x64xf32> to vector<4x64xf32>
    %cst_112 = arith.constant dense<0.000000e+00> : vector<64x64xf32>
    %110 = tpu.matmul %107, %109, %cst_112 {dimension_numbers = #tpu.dot_dimension_numbers<[1], [0], [0], [1], [0, 0, 1, 1], [], []>} : vector<64x4xf32>, vector<4x64xf32>, vector<64x64xf32> -> vector<64x64xf32>
    %111 = arith.addf %105, %110 : vector<64x64xf32>
    %c3_113 = arith.constant 3 : index
    %c0_114 = arith.constant 0 : index
    %c0_115 = arith.constant 0 : index
    %112 = vector.load %arg17[%c3_113, %c0_114, %c0_115] : memref<14x14x4xf32, #tpu.memory_space<vmem>>, vector<8x8x4xf32>
    %113 = vector.shape_cast %112 : vector<8x8x4xf32> to vector<64x4xf32>
    %c3_116 = arith.constant 3 : index
    %c0_117 = arith.constant 0 : index
    %c0_118 = arith.constant 0 : index
    %114 = vector.load %arg8[%c3_116, %c0_117, %c0_118] : memref<9x4x64xf32, #tpu.memory_space<vmem>>, vector<1x4x64xf32>
    %115 = vector.shape_cast %114 : vector<1x4x64xf32> to vector<4x64xf32>
    %cst_119 = arith.constant dense<0.000000e+00> : vector<64x64xf32>
    %116 = tpu.matmul %113, %115, %cst_119 {dimension_numbers = #tpu.dot_dimension_numbers<[1], [0], [0], [1], [0, 0, 1, 1], [], []>} : vector<64x4xf32>, vector<4x64xf32>, vector<64x64xf32> -> vector<64x64xf32>
    %117 = arith.addf %111, %116 : vector<64x64xf32>
    %c3_120 = arith.constant 3 : index
    %c3_121 = arith.constant 3 : index
    %c0_122 = arith.constant 0 : index
    %118 = vector.load %arg17[%c3_120, %c3_121, %c0_122] : memref<14x14x4xf32, #tpu.memory_space<vmem>>, vector<8x8x4xf32>
    %119 = vector.shape_cast %118 : vector<8x8x4xf32> to vector<64x4xf32>
    %c4_123 = arith.constant 4 : index
    %c0_124 = arith.constant 0 : index
    %c0_125 = arith.constant 0 : index
    %120 = vector.load %arg8[%c4_123, %c0_124, %c0_125] : memref<9x4x64xf32, #tpu.memory_space<vmem>>, vector<1x4x64xf32>
    %121 = vector.shape_cast %120 : vector<1x4x64xf32> to vector<4x64xf32>
    %cst_126 = arith.constant dense<0.000000e+00> : vector<64x64xf32>
    %122 = tpu.matmul %119, %121, %cst_126 {dimension_numbers = #tpu.dot_dimension_numbers<[1], [0], [0], [1], [0, 0, 1, 1], [], []>} : vector<64x4xf32>, vector<4x64xf32>, vector<64x64xf32> -> vector<64x64xf32>
    %123 = arith.addf %117, %122 : vector<64x64xf32>
    %c3_127 = arith.constant 3 : index
    %c6_128 = arith.constant 6 : index
    %c0_129 = arith.constant 0 : index
    %124 = vector.load %arg17[%c3_127, %c6_128, %c0_129] : memref<14x14x4xf32, #tpu.memory_space<vmem>>, vector<8x8x4xf32>
    %125 = vector.shape_cast %124 : vector<8x8x4xf32> to vector<64x4xf32>
    %c5_130 = arith.constant 5 : index
    %c0_131 = arith.constant 0 : index
    %c0_132 = arith.constant 0 : index
    %126 = vector.load %arg8[%c5_130, %c0_131, %c0_132] : memref<9x4x64xf32, #tpu.memory_space<vmem>>, vector<1x4x64xf32>
    %127 = vector.shape_cast %126 : vector<1x4x64xf32> to vector<4x64xf32>
    %cst_133 = arith.constant dense<0.000000e+00> : vector<64x64xf32>
    %128 = tpu.matmul %125, %127, %cst_133 {dimension_numbers = #tpu.dot_dimension_numbers<[1], [0], [0], [1], [0, 0, 1, 1], [], []>} : vector<64x4xf32>, vector<4x64xf32>, vector<64x64xf32> -> vector<64x64xf32>
    %129 = arith.addf %123, %128 : vector<64x64xf32>
    %c6_134 = arith.constant 6 : index
    %c0_135 = arith.constant 0 : index
    %c0_136 = arith.constant 0 : index
    %130 = vector.load %arg17[%c6_134, %c0_135, %c0_136] : memref<14x14x4xf32, #tpu.memory_space<vmem>>, vector<8x8x4xf32>
    %131 = vector.shape_cast %130 : vector<8x8x4xf32> to vector<64x4xf32>
    %c6_137 = arith.constant 6 : index
    %c0_138 = arith.constant 0 : index
    %c0_139 = arith.constant 0 : index
    %132 = vector.load %arg8[%c6_137, %c0_138, %c0_139] : memref<9x4x64xf32, #tpu.memory_space<vmem>>, vector<1x4x64xf32>
    %133 = vector.shape_cast %132 : vector<1x4x64xf32> to vector<4x64xf32>
    %cst_140 = arith.constant dense<0.000000e+00> : vector<64x64xf32>
    %134 = tpu.matmul %131, %133, %cst_140 {dimension_numbers = #tpu.dot_dimension_numbers<[1], [0], [0], [1], [0, 0, 1, 1], [], []>} : vector<64x4xf32>, vector<4x64xf32>, vector<64x64xf32> -> vector<64x64xf32>
    %135 = arith.addf %129, %134 : vector<64x64xf32>
    %c6_141 = arith.constant 6 : index
    %c3_142 = arith.constant 3 : index
    %c0_143 = arith.constant 0 : index
    %136 = vector.load %arg17[%c6_141, %c3_142, %c0_143] : memref<14x14x4xf32, #tpu.memory_space<vmem>>, vector<8x8x4xf32>
    %137 = vector.shape_cast %136 : vector<8x8x4xf32> to vector<64x4xf32>
    %c7_144 = arith.constant 7 : index
    %c0_145 = arith.constant 0 : index
    %c0_146 = arith.constant 0 : index
    %138 = vector.load %arg8[%c7_144, %c0_145, %c0_146] : memref<9x4x64xf32, #tpu.memory_space<vmem>>, vector<1x4x64xf32>
    %139 = vector.shape_cast %138 : vector<1x4x64xf32> to vector<4x64xf32>
    %cst_147 = arith.constant dense<0.000000e+00> : vector<64x64xf32>
    %140 = tpu.matmul %137, %139, %cst_147 {dimension_numbers = #tpu.dot_dimension_numbers<[1], [0], [0], [1], [0, 0, 1, 1], [], []>} : vector<64x4xf32>, vector<4x64xf32>, vector<64x64xf32> -> vector<64x64xf32>
    %141 = arith.addf %135, %140 : vector<64x64xf32>
    %c6_148 = arith.constant 6 : index
    %c6_149 = arith.constant 6 : index
    %c0_150 = arith.constant 0 : index
    %142 = vector.load %arg17[%c6_148, %c6_149, %c0_150] : memref<14x14x4xf32, #tpu.memory_space<vmem>>, vector<8x8x4xf32>
    %143 = vector.shape_cast %142 : vector<8x8x4xf32> to vector<64x4xf32>
    %c8_151 = arith.constant 8 : index
    %c0_152 = arith.constant 0 : index
    %c0_153 = arith.constant 0 : index
    %144 = vector.load %arg8[%c8_151, %c0_152, %c0_153] : memref<9x4x64xf32, #tpu.memory_space<vmem>>, vector<1x4x64xf32>
    %145 = vector.shape_cast %144 : vector<1x4x64xf32> to vector<4x64xf32>
    %cst_154 = arith.constant dense<0.000000e+00> : vector<64x64xf32>
    %146 = tpu.matmul %143, %145, %cst_154 {dimension_numbers = #tpu.dot_dimension_numbers<[1], [0], [0], [1], [0, 0, 1, 1], [], []>} : vector<64x4xf32>, vector<4x64xf32>, vector<64x64xf32> -> vector<64x64xf32>
    %147 = arith.addf %141, %146 : vector<64x64xf32>
    %c0_155 = arith.constant 0 : index
    %c0_156 = arith.constant 0 : index
    %148 = vector.load %arg9[%c0_155, %c0_156] : memref<1x64xf32, #tpu.memory_space<vmem>>, vector<1x64xf32>
    %149 = vector.broadcast %148 : vector<1x64xf32> to vector<64x64xf32>
    %150 = arith.addf %147, %149 : vector<64x64xf32>
    %cst_157 = arith.constant 0.000000e+00 : f32
    %151 = vector.broadcast %cst_157 : f32 to vector<64x64xf32>
    %152 = arith.maximumf %150, %151 : vector<64x64xf32>
    %c0_158 = arith.constant 0 : index
    %c0_159 = arith.constant 0 : index
    %153 = vector.load %arg10[%c0_158, %c0_159] : memref<64x256xf32, #tpu.memory_space<vmem>>, vector<64x256xf32>
    %cst_160 = arith.constant dense<0.000000e+00> : vector<64x256xf32>
    %154 = tpu.matmul %152, %153, %cst_160 {dimension_numbers = #tpu.dot_dimension_numbers<[1], [0], [0], [1], [0, 0, 1, 1], [], []>} : vector<64x64xf32>, vector<64x256xf32>, vector<64x256xf32> -> vector<64x256xf32>
    %c0_161 = arith.constant 0 : index
    %c0_162 = arith.constant 0 : index
    %155 = vector.load %arg11[%c0_161, %c0_162] : memref<1x256xf32, #tpu.memory_space<vmem>>, vector<1x256xf32>
    %156 = vector.broadcast %155 : vector<1x256xf32> to vector<64x256xf32>
    %157 = arith.addf %154, %156 : vector<64x256xf32>
    %cst_163 = arith.constant 0.000000e+00 : f32
    %158 = vector.broadcast %cst_163 : f32 to vector<64x256xf32>
    %159 = arith.maximumf %157, %158 : vector<64x256xf32>
    %c0_164 = arith.constant 0 : index
    %c0_165 = arith.constant 0 : index
    %160 = vector.load %arg12[%c0_164, %c0_165] : memref<256x4xf32, #tpu.memory_space<vmem>>, vector<256x4xf32>
    %cst_166 = arith.constant dense<0.000000e+00> : vector<64x4xf32>
    %161 = tpu.matmul %159, %160, %cst_166 {dimension_numbers = #tpu.dot_dimension_numbers<[1], [0], [0], [1], [0, 0, 1, 1], [], []>} : vector<64x256xf32>, vector<256x4xf32>, vector<64x4xf32> -> vector<64x4xf32>
    %c0_167 = arith.constant 0 : index
    %c0_168 = arith.constant 0 : index
    %162 = vector.load %arg13[%c0_167, %c0_168] : memref<1x4xf32, #tpu.memory_space<vmem>>, vector<1x4xf32>
    %163 = vector.broadcast %162 : vector<1x4xf32> to vector<64x4xf32>
    %164 = arith.addf %161, %163 : vector<64x4xf32>
    %cst_169 = arith.constant 0.000000e+00 : f32
    %165 = vector.broadcast %cst_169 : f32 to vector<64x4xf32>
    %166 = arith.maximumf %164, %165 : vector<64x4xf32>
    %167 = tpu.transpose %166, [1, 0] : vector<64x4xf32> -> vector<4x64xf32>
    %c0_170 = arith.constant 0 : index
    %c0_171 = arith.constant 0 : index
    %168 = vector.load %arg3[%c0_170, %c0_171] : memref<64x1024xf32, #tpu.memory_space<vmem>>, vector<64x1024xf32>
    %cst_172 = arith.constant dense<0.000000e+00> : vector<4x1024xf32>
    %169 = tpu.matmul %167, %168, %cst_172 {dimension_numbers = #tpu.dot_dimension_numbers<[1], [0], [0], [1], [0, 0, 1, 1], [], []>} : vector<4x64xf32>, vector<64x1024xf32>, vector<4x1024xf32> -> vector<4x1024xf32>
    %c0_173 = arith.constant 0 : index
    %c0_174 = arith.constant 0 : index
    %c0_175 = arith.constant 0 : index
    %170 = vector.load %arg15[%c0_173, %c0_174, %c0_175] : memref<1x4x1024xf32, #tpu.memory_space<vmem>>, vector<1x4x1024xf32>
    %171 = vector.shape_cast %170 : vector<1x4x1024xf32> to vector<4x1024xf32>
    %172 = vector.shape_cast %169 : vector<4x1024xf32> to vector<1x4x1024xf32>
    tpu.vector_store %arg15[%c0_173, %c0_174, %c0_175], %172 {strides = array<i32>} : memref<1x4x1024xf32, #tpu.memory_space<vmem>>, vector<1x4x1024xf32>,
    return
  }
  func.func @transform_0(%arg0: i32) -> (i32, i32, i32, i32) {
    %c0_i32 = arith.constant 0 : i32
    %c0_i32_0 = arith.constant 0 : i32
    %c0_i32_1 = arith.constant 0 : i32
    %c0_i32_2 = arith.constant 0 : i32
    return %arg0, %c0_i32, %c0_i32_0, %c0_i32_1 : i32, i32, i32, i32
  }
  func.func @transform_1(%arg0: i32) -> (i32, i32) {
    %c0_i32 = arith.constant 0 : i32
    %c0_i32_0 = arith.constant 0 : i32
    %c0_i32_1 = arith.constant 0 : i32
    return %c0_i32, %c0_i32_0 : i32, i32
  }
  func.func @transform_2(%arg0: i32) -> (i32, i32) {
    %c0_i32 = arith.constant 0 : i32
    %c0_i32_0 = arith.constant 0 : i32
    %c0_i32_1 = arith.constant 0 : i32
    return %c0_i32, %c0_i32_0 : i32, i32
  }
  func.func @transform_3(%arg0: i32) -> (i32, i32, i32) {
    %c0_i32 = arith.constant 0 : i32
    %c0_i32_0 = arith.constant 0 : i32
    %c0_i32_1 = arith.constant 0 : i32
    %c0_i32_2 = arith.constant 0 : i32
    return %c0_i32, %c0_i32_0, %c0_i32_1 : i32, i32, i32
  }
  func.func @transform_4(%arg0: i32) -> (i32, i32) {
    %c0_i32 = arith.constant 0 : i32
    %c0_i32_0 = arith.constant 0 : i32
    %c0_i32_1 = arith.constant 0 : i32
    return %c0_i32, %c0_i32_0 : i32, i32
  }
  func.func @transform_5(%arg0: i32) -> (i32, i32) {
    %c0_i32 = arith.constant 0 : i32
    %c0_i32_0 = arith.constant 0 : i32
    %c0_i32_1 = arith.constant 0 : i32
    return %c0_i32, %c0_i32_0 : i32, i32
  }
  func.func @transform_6(%arg0: i32) -> (i32, i32) {
    %c0_i32 = arith.constant 0 : i32
    %c0_i32_0 = arith.constant 0 : i32
    %c0_i32_1 = arith.constant 0 : i32
    return %c0_i32, %c0_i32_0 : i32, i32
  }
  func.func @transform_7(%arg0: i32) -> (i32, i32, i32) {
    %c0_i32 = arith.constant 0 : i32
    %c0_i32_0 = arith.constant 0 : i32
    %c0_i32_1 = arith.constant 0 : i32
    %c0_i32_2 = arith.constant 0 : i32
    return %c0_i32, %c0_i32_0, %c0_i32_1 : i32, i32, i32
  }
  func.func @transform_8(%arg0: i32) -> (i32, i32) {
    %c0_i32 = arith.constant 0 : i32
    %c0_i32_0 = arith.constant 0 : i32
    %c0_i32_1 = arith.constant 0 : i32
    return %c0_i32, %c0_i32_0 : i32, i32
  }
  func.func @transform_9(%arg0: i32) -> (i32, i32) {
    %c0_i32 = arith.constant 0 : i32
    %c0_i32_0 = arith.constant 0 : i32
    %c0_i32_1 = arith.constant 0 : i32
    return %c0_i32, %c0_i32_0 : i32, i32
  }
  func.func @transform_10(%arg0: i32) -> (i32, i32) {
    %c0_i32 = arith.constant 0 : i32
    %c0_i32_0 = arith.constant 0 : i32
    %c0_i32_1 = arith.constant 0 : i32
    return %c0_i32, %c0_i32_0 : i32, i32
  }
  func.func @transform_11(%arg0: i32) -> (i32, i32) {
    %c0_i32 = arith.constant 0 : i32
    %c0_i32_0 = arith.constant 0 : i32
    %c0_i32_1 = arith.constant 0 : i32
    return %c0_i32, %c0_i32_0 : i32, i32
  }
  func.func @transform_12(%arg0: i32) -> (i32, i32) {
    %c0_i32 = arith.constant 0 : i32
    %c0_i32_0 = arith.constant 0 : i32
    %c0_i32_1 = arith.constant 0 : i32
    return %c0_i32, %c0_i32_0 : i32, i32
  }
  func.func @transform_13(%arg0: i32) -> (i32, i32, i32) {
    %c0_i32 = arith.constant 0 : i32
    %c0_i32_0 = arith.constant 0 : i32
    %c0_i32_1 = arith.constant 0 : i32
    return %arg0, %c0_i32, %c0_i32_0 : i32, i32, i32
  }
  func.func @transform_14(%arg0: i32) -> (i32, i32, i32) {
    %c0_i32 = arith.constant 0 : i32
    %c0_i32_0 = arith.constant 0 : i32
    %c0_i32_1 = arith.constant 0 : i32
    return %arg0, %c0_i32, %c0_i32_0 : i32, i32, i32
  }
}

</mosaic_0001>

<bundles_post_ra>
// kernel: aux_net_forward.1
= control target key start
LH: loop header
LB: loop body
LE: loop exit
PB: predicated region body
PF: predicated region fallthrough
CT: control target
= control target key end

     0   :  { %s6837_s29 = smov 0   ;;  %s8378_s0 = inlined_call_operand.vmem [shape: f32[2,32,32,3], index: 0, kind: input, shape index: {}]   ;;  %s8379_s1 = inlined_call_operand.vmem [shape: f32[64,1024], index: 1, kind: input, shape index: {}]   ;;  %s8380_s2 = inlined_call_operand.vmem [shape: f32[64,1024], index: 2, kind: input, shape index: {}]   ;;  %s8381_s3 = inlined_call_operand.vmem [shape: f32[9,3,16], index: 3, kind: input, shape index: {}]   ;;  %s8382_s4 = inlined_call_operand.vmem [shape: f32[1,16], index: 4, kind: input, shape index: {}]   ;;  %s8383_s5 = inlined_call_operand.vmem [shape: f32[16,4], index: 5, kind: input, shape index: {}]   ;;  %s8384_s6 = inlined_call_operand.vmem [shape: f32[1,4], index: 6, kind: input, shape index: {}]   ;;  %s8385_s7 = inlined_call_operand.vmem [shape: f32[9,4,64], index: 7, kind: input, shape index: {}]   ;;  %s8386_s8 = inlined_call_operand.vmem [shape: f32[1,64], index: 8, kind: input, shape index: {}]   ;;  %s8387_s9 = inlined_call_operand.vmem [shape: f32[64,256], index: 9, kind: input, shape index: {}]   ;;  %s8388_s10 = inlined_call_operand.vmem [shape: f32[1,256], index: 10, kind: input, shape index: {}]   ;;  %s8389_s11 = inlined_call_operand.vmem [shape: f32[256,4], index: 11, kind: input, shape index: {}]   ;;  %s8390_s12 = inlined_call_operand.vmem [shape: f32[1,4], index: 12, kind: input, shape index: {}]   ;;  %s8391_s13 = inlined_call_operand.vmem [shape: f32[2,4,1024], index: 13, kind: output, shape index: {0}]   ;;  %s8392_s14 = inlined_call_operand.vmem [shape: f32[2,4,1024], index: 14, kind: output, shape index: {1}]  }
   0x1 LB: > { %s5334_s30 = sadd.s32 4294967295, %s6759_s29   ;;  %p5338_p0 = scmp.ge.s32.totalorder %s6759_s29, 1  ;;  %s6759_s29 = sphi %s6837_s29, %s25_s29  }
   0x2   : > { %p415_p1 = scmp.lt.s32.totalorder %s6759_s29, 3 }
   0x4   : > { %p416_p2 = pnand %p5338_p0, %p415_p1 }
   0x5   : > { %p466_p3 = scmp.lt.s32.totalorder (!%p416_p2), %s5334_s30, 1  ;;  %v610_v0 = vld [vmem:[%s8379_s1 + $0x8] sm:$0xff] (!%p416_p2)  ;;  %v612_v1 = vld [vmem:[%s8379_s1 + $0x18] sm:$0xff] (!%p416_p2)  ;;  %vm1167_vm0 = vcmask (!%p416_p2), 1042432   ;;  %vm1093_vm1 = vcmask (!%p416_p2), 23552   ;;  %vm1095_vm2 = vcmask (!%p416_p2), 17408  }
   0x6   : > { %419 = sbr.rel (%p416_p2) target bundleno = 2357 (0x935), region = 72  ;;  %737 = vmatprep.mubr.f32.mxu0 (!%p416_p2), %v610_v0  ;;  %842 = vmatprep.mubr.f32.mxu1 (!%p416_p2), %v612_v1  ;;  %vm2491_vm3 = vcmask (!%p416_p2), 130048   ;;  %vm3025_vm4 = vcmask (!%p416_p2), 31744   ;;  %vm3115_vm5 = vcmask (!%p416_p2), 29696   ;;  %vm2717_vm6 = vcmask (!%p416_p2), 523264  }
   0x7   : > { %vm3195_vm7 = vcmask (!%p416_p2), 1043456  }
   0xd   : > { %s8394_s30 = smov (!%p466_p3, %s5334_s30), 1 }
   0xe   : > { %s5553_s19 = sshll.u32 %s8394_s30, 10  ;;  %s5554_s20 = sshll.u32 %s8394_s30, 5 }
   0xf   : > { %s6857_s22 = scalar_lea.vmem %s8378_s0, %s5553_s19  ;;  %s7972_s24 = scalar_lea.vmem %s8391_s13, %s5554_s20 }
  0x10   : > { %v497_v2 = vld [vmem:[%s6857_s22 + $0x80] sm:$0xff]  ;;  %v498_v3 = vld [vmem:[%s6857_s22 + $0x88] sm:$0xff]  ;;  %v499_v13 = vld [vmem:[%s6857_s22 + $0x90] sm:$0xff]  ;;  %s480_s15 = scalar_lea.vmem %s8392_s14, %s5554_s20 }
  0x11   : > { %v529_v4 = vld [vmem:[%s6857_s22 + $0x180] sm:$0xff]  ;;  %v6276_v5 = vpack.c.bf16 %v498_v3, %v497_v2  ;;  %v530_v6 = vld [vmem:[%s6857_s22 + $0x188] sm:$0xff]  ;;  %v500_v15 = vld [vmem:[%s6857_s22 + $0x98] sm:$0xff] }
  0x12   : > { %v481_v7 = vld [vmem:[%s6857_s22] sm:$0xff]  ;;  %v482_v8 = vld [vmem:[%s6857_s22 + $0x8] sm:$0xff]  ;;  %v6308_v9 = vpack.c.bf16 %v530_v6, %v529_v4  ;;  %v531_v16 = vld [vmem:[%s6857_s22 + $0x190] sm:$0xff]  ;;  %v6280_v18 = vpack.c.bf16 %v500_v15, %v499_v13 }
  0x13   : > { %v6278_v10 = vpack.c.bf16 %v482_v8, %v481_v7  ;;  %v513_v11 = vld [vmem:[%s6857_s22 + $0x100] sm:$0xff]  ;;  %v514_v12 = vld [vmem:[%s6857_s22 + $0x108] sm:$0xff]  ;;  %6277 = vmatprep.subr.bf16.mxu0 %v6276_v5  ;;  %v532_v17 = vld [vmem:[%s6857_s22 + $0x198] sm:$0xff] }
  0x14   : > { %v6310_v14 = vpack.c.bf16 %v514_v12, %v513_v11  ;;  %6309 = vmatprep.subr.bf16.mxu1 %v6308_v9  ;;  %v6312_v19 = vpack.c.bf16 %v532_v17, %v531_v16  ;;  %v483_v20 = vld [vmem:[%s6857_s22 + $0x10] sm:$0xff]  ;;  %v484_v21 = vld [vmem:[%s6857_s22 + $0x18] sm:$0xff]  ;;  %v501_v25 = vld [vmem:[%s6857_s22 + $0xa0] sm:$0xff] }
  0x15   : > { %6279 = vmatpush3.bf16.msra.mxu0 %v6278_v10  ;;  %v515_v22 = vld [vmem:[%s6857_s22 + $0x110] sm:$0xff]  ;;  %v6282_v23 = vpack.c.bf16 %v484_v21, %v483_v20  ;;  %v516_v24 = vld [vmem:[%s6857_s22 + $0x118] sm:$0xff]  ;;  %v502_v26 = vld [vmem:[%s6857_s22 + $0xa8] sm:$0xff] }
  0x16   : > { %6311 = vmatpush3.bf16.msra.mxu1 %v6310_v14  ;;  %6281 = vmatprep.subr.bf16.mxu0 %v6280_v18  ;;  %v6314_v27 = vpack.c.bf16 %v516_v24, %v515_v22  ;;  %v6284_v28 = vpack.c.bf16 %v502_v26, %v501_v25  ;;  %v533_v29 = vld [vmem:[%s6857_s22 + $0x1a0] sm:$0xff]  ;;  %v534_v30 = vld [vmem:[%s6857_s22 + $0x1a8] sm:$0xff]  ;;  %v503_v37 = vld [vmem:[%s6857_s22 + $0xb0] sm:$0xff] }
  0x17   : > { %6313 = vmatprep.subr.bf16.mxu1 %v6312_v19  ;;  %v485_v31 = vld [vmem:[%s6857_s22 + $0x20] sm:$0xff]  ;;  %v6316_v32 = vpack.c.bf16 %v534_v30, %v533_v29  ;;  %v486_v33 = vld [vmem:[%s6857_s22 + $0x28] sm:$0xff]  ;;  %v504_v38 = vld [vmem:[%s6857_s22 + $0xb8] sm:$0xff] }
  0x18   : > { %v517_v34 = vld [vmem:[%s6857_s22 + $0x120] sm:$0xff]  ;;  %v518_v35 = vld [vmem:[%s6857_s22 + $0x128] sm:$0xff]  ;;  %v6286_v36 = vpack.c.bf16 %v486_v33, %v485_v31  ;;  %v535_v39 = vld [vmem:[%s6857_s22 + $0x1b0] sm:$0xff]  ;;  %v6288_v41 = vpack.c.bf16 %v504_v38, %v503_v37 }
  0x19   : > { %6283 = vmatpush3.bf16.msra.mxu0 %v6282_v23  ;;  %v6318_v40 = vpack.c.bf16 %v518_v35, %v517_v34  ;;  %v536_v42 = vld [vmem:[%s6857_s22 + $0x1b8] sm:$0xff]  ;;  %v487_v43 = vld [vmem:[%s6857_s22 + $0x30] sm:$0xff]  ;;  %v505_v48 = vld [vmem:[%s6857_s22 + $0xc0] sm:$0xff] }
  0x1a   : > { %6315 = vmatpush3.bf16.msra.mxu1 %v6314_v27  ;;  %6285 = vmatprep.subr.bf16.mxu0 %v6284_v28  ;;  %v488_v44 = vld [vmem:[%s6857_s22 + $0x38] sm:$0xff]  ;;  %v6320_v45 = vpack.c.bf16 %v536_v42, %v535_v39  ;;  %v519_v46 = vld [vmem:[%s6857_s22 + $0x130] sm:$0xff]  ;;  %v506_v49 = vld [vmem:[%s6857_s22 + $0xc8] sm:$0xff] }
  0x1b   : > { %6317 = vmatprep.subr.bf16.mxu1 %v6316_v32  ;;  %v520_v47 = vld [vmem:[%s6857_s22 + $0x138] sm:$0xff]  ;;  %v537_v50 = vld [vmem:[%s6857_s22 + $0x1c0] sm:$0xff]  ;;  %v538_v51 = vld [vmem:[%s6857_s22 + $0x1c8] sm:$0xff]  ;;  %v6290_v52 = vpack.c.bf16 %v488_v44, %v487_v43  ;;  %v6292_v54 = vpack.c.bf16 %v506_v49, %v505_v48 }
  0x1c   : > { %v6322_v53 = vpack.c.bf16 %v520_v47, %v519_v46  ;;  %v489_v55 = vld [vmem:[%s6857_s22 + $0x40] sm:$0xff]  ;;  %v490_v56 = vld [vmem:[%s6857_s22 + $0x48] sm:$0xff]  ;;  %v6324_v58 = vpack.c.bf16 %v538_v51, %v537_v50  ;;  %v507_v60 = vld [vmem:[%s6857_s22 + $0xd0] sm:$0xff] }
  0x1d   : > { %6287 = vmatpush3.bf16.msra.mxu0 %v6286_v36  ;;  %v521_v57 = vld [vmem:[%s6857_s22 + $0x140] sm:$0xff]  ;;  %v522_v59 = vld [vmem:[%s6857_s22 + $0x148] sm:$0xff]  ;;  %v508_v61 = vld [vmem:[%s6857_s22 + $0xd8] sm:$0xff]  ;;  %v6294_v0 = vpack.c.bf16 %v490_v56, %v489_v55 }
  0x1e   : > { %6319 = vmatpush3.bf16.msra.mxu1 %v6318_v40  ;;  %6289 = vmatprep.subr.bf16.mxu0 %v6288_v41  ;;  %v539_v62 = vld [vmem:[%s6857_s22 + $0x1d0] sm:$0xff]  ;;  %v540_v63 = vld [vmem:[%s6857_s22 + $0x1d8] sm:$0xff]  ;;  %v6326_v1 = vpack.c.bf16 %v522_v59, %v521_v57  ;;  %v6296_v2 = vpack.c.bf16 %v508_v61, %v507_v60  ;;  %v509_v8 = vld [vmem:[%s6857_s22 + $0xe0] sm:$0xff] }
  0x1f   : > { %6321 = vmatprep.subr.bf16.mxu1 %v6320_v45  ;;  %v491_v3 = vld [vmem:[%s6857_s22 + $0x50] sm:$0xff]  ;;  %v492_v4 = vld [vmem:[%s6857_s22 + $0x58] sm:$0xff]  ;;  %v6328_v6 = vpack.c.bf16 %v540_v63, %v539_v62  ;;  %v510_v9 = vld [vmem:[%s6857_s22 + $0xe8] sm:$0xff] }
  0x20   : > { %v523_v5 = vld [vmem:[%s6857_s22 + $0x150] sm:$0xff]  ;;  %v524_v7 = vld [vmem:[%s6857_s22 + $0x158] sm:$0xff]  ;;  %v541_v10 = vld [vmem:[%s6857_s22 + $0x1e0] sm:$0xff]  ;;  %v6298_v12 = vpack.c.bf16 %v492_v4, %v491_v3  ;;  %v6300_v14 = vpack.c.bf16 %v510_v9, %v509_v8 }
  0x21   : > { %6291 = vmatpush3.bf16.msra.mxu0 %v6290_v52  ;;  %v542_v11 = vld [vmem:[%s6857_s22 + $0x1e8] sm:$0xff]  ;;  %v6330_v13 = vpack.c.bf16 %v524_v7, %v523_v5  ;;  %v493_v15 = vld [vmem:[%s6857_s22 + $0x60] sm:$0xff]  ;;  %v511_v20 = vld [vmem:[%s6857_s22 + $0xf0] sm:$0xff] }
  0x22   : > { %6323 = vmatpush3.bf16.msra.mxu1 %v6322_v53  ;;  %6293 = vmatprep.subr.bf16.mxu0 %v6292_v54  ;;  %v494_v16 = vld [vmem:[%s6857_s22 + $0x68] sm:$0xff]  ;;  %v525_v17 = vld [vmem:[%s6857_s22 + $0x160] sm:$0xff]  ;;  %v6332_v18 = vpack.c.bf16 %v542_v11, %v541_v10  ;;  %v512_v21 = vld [vmem:[%s6857_s22 + $0xf8] sm:$0xff] }
  0x23   : > { %6325 = vmatprep.subr.bf16.mxu1 %v6324_v58  ;;  %v526_v19 = vld [vmem:[%s6857_s22 + $0x168] sm:$0xff]  ;;  %v543_v22 = vld [vmem:[%s6857_s22 + $0x1f0] sm:$0xff]  ;;  %v544_v23 = vld [vmem:[%s6857_s22 + $0x1f8] sm:$0xff]  ;;  %v6302_v24 = vpack.c.bf16 %v494_v16, %v493_v15  ;;  %v6304_v26 = vpack.c.bf16 %v512_v21, %v511_v20 }
  0x24   : > { %v6334_v25 = vpack.c.bf16 %v526_v19, %v525_v17  ;;  %v495_v27 = vld [vmem:[%s6857_s22 + $0x70] sm:$0xff]  ;;  %v496_v28 = vld [vmem:[%s6857_s22 + $0x78] sm:$0xff]  ;;  %v6336_v30 = vpack.c.bf16 %v544_v23, %v543_v22  ;;  %v561_v32 = vld [vmem:[%s6857_s22 + $0x280] sm:$0xff] }
  0x25   : > { %6295 = vmatpush3.bf16.msra.mxu0 %v6294_v0  ;;  %v527_v29 = vld [vmem:[%s6857_s22 + $0x170] sm:$0xff]  ;;  %v528_v31 = vld [vmem:[%s6857_s22 + $0x178] sm:$0xff]  ;;  %v562_v33 = vld [vmem:[%s6857_s22 + $0x288] sm:$0xff]  ;;  %v6306_v36 = vpack.c.bf16 %v496_v28, %v495_v27 }
  0x26   : > { %6327 = vmatpush3.bf16.msra.mxu1 %v6326_v1  ;;  %6297 = vmatprep.subr.bf16.mxu0 %v6296_v2  ;;  %v593_v34 = vld [vmem:[%s6857_s22 + $0x380] sm:$0xff]  ;;  %v594_v35 = vld [vmem:[%s6857_s22 + $0x388] sm:$0xff]  ;;  %v6338_v37 = vpack.c.bf16 %v528_v31, %v527_v29  ;;  %v6340_v38 = vpack.c.bf16 %v562_v33, %v561_v32  ;;  %v563_v44 = vld [vmem:[%s6857_s22 + $0x290] sm:$0xff] }
  0x27   : > { %6329 = vmatprep.subr.bf16.mxu1 %v6328_v6  ;;  %v545_v39 = vld [vmem:[%s6857_s22 + $0x200] sm:$0xff]  ;;  %v546_v40 = vld [vmem:[%s6857_s22 + $0x208] sm:$0xff]  ;;  %v6372_v41 = vpack.c.bf16 %v594_v35, %v593_v34  ;;  %v564_v45 = vld [vmem:[%s6857_s22 + $0x298] sm:$0xff] }
  0x28   : > { %v577_v42 = vld [vmem:[%s6857_s22 + $0x300] sm:$0xff]  ;;  %v578_v43 = vld [vmem:[%s6857_s22 + $0x308] sm:$0xff]  ;;  %v6342_v47 = vpack.c.bf16 %v546_v40, %v545_v39  ;;  %v595_v48 = vld [vmem:[%s6857_s22 + $0x390] sm:$0xff]  ;;  %v6344_v56 = vpack.c.bf16 %v564_v45, %v563_v44 }
  0x29   : > { %6299 = vmatpush3.bf16.msra.mxu0 %v6298_v12  ;;  %v609_v46 = vld [vmem:[%s8379_s1] sm:$0xff]  ;;  %v596_v49 = vld [vmem:[%s6857_s22 + $0x398] sm:$0xff]  ;;  %v611_v50 = vld [vmem:[%s8379_s1 + $0x10] sm:$0xff]  ;;  %v6374_v55 = vpack.c.bf16 %v578_v43, %v577_v42 }
  0x2a   : > { %6331 = vmatpush3.bf16.msra.mxu1 %v6330_v13  ;;  %6301 = vmatprep.subr.bf16.mxu0 %v6300_v14  ;;  %v547_v51 = vld [vmem:[%s6857_s22 + $0x210] sm:$0xff]  ;;  %v548_v52 = vld [vmem:[%s6857_s22 + $0x218] sm:$0xff]  ;;  %v618_v53 = vld [vmem:[%s8379_s1 + $0x48] sm:$0xff]  ;;  %v6376_v58 = vpack.c.bf16 %v596_v49, %v595_v48 }
  0x2b   : > { %6333 = vmatprep.subr.bf16.mxu1 %v6332_v18  ;;  %v620_v54 = vld [vmem:[%s8379_s1 + $0x58] sm:$0xff]  ;;  %v579_v57 = vld [vmem:[%s6857_s22 + $0x310] sm:$0xff]  ;;  %v565_v60 = vld [vmem:[%s6857_s22 + $0x2a0] sm:$0xff]  ;;  %v6346_v63 = vpack.c.bf16 %v548_v52, %v547_v51 }
  0x2c   : > { %v580_v59 = vld [vmem:[%s6857_s22 + $0x318] sm:$0xff]  ;;  %v566_v61 = vld [vmem:[%s6857_s22 + $0x2a8] sm:$0xff]  ;;  %v617_v62 = vld [vmem:[%s8379_s1 + $0x40] sm:$0xff] }
  0x2d   : > { %6303 = vmatpush3.bf16.msra.mxu0 %v6302_v24  ;;  %v597_v0 = vld [vmem:[%s6857_s22 + $0x3a0] sm:$0xff]  ;;  %v598_v1 = vld [vmem:[%s6857_s22 + $0x3a8] sm:$0xff]  ;;  %v619_v2 = vld [vmem:[%s8379_s1 + $0x50] sm:$0xff]  ;;  %v6378_v7 = vpack.c.bf16 %v580_v59, %v579_v57  ;;  %v6348_v8 = vpack.c.bf16 %v566_v61, %v565_v60 }
  0x2e   : > { %6335 = vmatpush3.bf16.msra.mxu1 %v6334_v25  ;;  %6305 = vmatprep.subr.bf16.mxu0 %v6304_v26  ;;  %v549_v3 = vld [vmem:[%s6857_s22 + $0x220] sm:$0xff]  ;;  %v550_v4 = vld [vmem:[%s6857_s22 + $0x228] sm:$0xff]  ;;  %v628_v6 = vld [vmem:[%s8379_s1 + $0x98] sm:$0xff]  ;;  %v6380_v10 = vpack.c.bf16 %v598_v1, %v597_v0 }
  0x2f   : > { %6337 = vmatprep.subr.bf16.mxu1 %v6336_v30  ;;  %v626_v5 = vld [vmem:[%s8379_s1 + $0x88] sm:$0xff]  ;;  %v581_v9 = vld [vmem:[%s6857_s22 + $0x320] sm:$0xff]  ;;  %v567_v12 = vld [vmem:[%s6857_s22 + $0x2b0] sm:$0xff]  ;;  %v6350_v15 = vpack.c.bf16 %v550_v4, %v549_v3 }
  0x30   : > { %v582_v11 = vld [vmem:[%s6857_s22 + $0x328] sm:$0xff]  ;;  %v568_v13 = vld [vmem:[%s6857_s22 + $0x2b8] sm:$0xff]  ;;  %v625_v14 = vld [vmem:[%s8379_s1 + $0x80] sm:$0xff] }
  0x31   : > { %6307 = vmatpush3.bf16.msra.mxu0 %v6306_v36  ;;  %v599_v16 = vld [vmem:[%s6857_s22 + $0x3b0] sm:$0xff]  ;;  %v600_v17 = vld [vmem:[%s6857_s22 + $0x3b8] sm:$0xff]  ;;  %v634_v21 = vld [vmem:[%s8379_s1 + $0xc8] sm:$0xff]  ;;  %v6382_v23 = vpack.c.bf16 %v582_v11, %v581_v9  ;;  %v6352_v24 = vpack.c.bf16 %v568_v13, %v567_v12 }
  0x32   : > { %6339 = vmatpush3.bf16.msra.mxu1 %v6338_v37  ;;  %6341 = vmatprep.subr.bf16.mxu0 %v6340_v38  ;;  %v627_v18 = vld [vmem:[%s8379_s1 + $0x90] sm:$0xff]  ;;  %v552_v20 = vld [vmem:[%s6857_s22 + $0x238] sm:$0xff]  ;;  %v6384_v26 = vpack.c.bf16 %v600_v17, %v599_v16  ;;  %v569_v28 = vld [vmem:[%s6857_s22 + $0x2c0] sm:$0xff] }
  0x33   : > { %6373 = vmatprep.subr.bf16.mxu1 %v6372_v41  ;;  %v551_v19 = vld [vmem:[%s6857_s22 + $0x230] sm:$0xff]  ;;  %v636_v22 = vld [vmem:[%s8379_s1 + $0xd8] sm:$0xff]  ;;  %v570_v29 = vld [vmem:[%s6857_s22 + $0x2c8] sm:$0xff] }
  0x34   : > { %738 = vmatmul.mubr.f32.vlgmr.msra.gmra.mrb[0].mxu0 %v609_v46  ;;  %v583_v25 = vld [vmem:[%s6857_s22 + $0x330] sm:$0xff]  ;;  %v584_v27 = vld [vmem:[%s6857_s22 + $0x338] sm:$0xff]  ;;  %v633_v30 = vld [vmem:[%s8379_s1 + $0xc0] sm:$0xff]  ;;  %v6354_v31 = vpack.c.bf16 %v552_v20, %v551_v19  ;;  %v6356_v40 = vpack.c.bf16 %v570_v29, %v569_v28 }
  0x35   : > { %843 = vmatmul.mubr.f32.vlgmr.msra.gmra.mrb[0].mxu1 %v611_v50  ;;  %6343 = vmatpush3.bf16.msra.mxu0 %v6342_v47  ;;  %v601_v32 = vld [vmem:[%s6857_s22 + $0x3c0] sm:$0xff]  ;;  %v602_v33 = vld [vmem:[%s6857_s22 + $0x3c8] sm:$0xff]  ;;  %v635_v34 = vld [vmem:[%s8379_s1 + $0xd0] sm:$0xff]  ;;  %v6386_v39 = vpack.c.bf16 %v584_v27, %v583_v25 }
  0x36   : > { %742 = vmatprep.mubr.f32.mxu0 %v618_v53  ;;  %847 = vmatprep.mubr.f32.mxu1 %v620_v54  ;;  %v553_v35 = vld [vmem:[%s6857_s22 + $0x240] sm:$0xff]  ;;  %v554_v36 = vld [vmem:[%s6857_s22 + $0x248] sm:$0xff]  ;;  %v644_v38 = vld [vmem:[%s8379_s1 + $0x118] sm:$0xff]  ;;  %v6388_v42 = vpack.c.bf16 %v602_v33, %v601_v32 }
  0x37   : > { %6375 = vmatpush3.bf16.msra.mxu1 %v6374_v55  ;;  %6345 = vmatprep.subr.bf16.mxu0 %v6344_v56  ;;  %v642_v37 = vld [vmem:[%s8379_s1 + $0x108] sm:$0xff]  ;;  %v585_v41 = vld [vmem:[%s6857_s22 + $0x340] sm:$0xff]  ;;  %v571_v44 = vld [vmem:[%s6857_s22 + $0x2d0] sm:$0xff]  ;;  %v6358_v47 = vpack.c.bf16 %v554_v36, %v553_v35 }
  0x38   : > { %743 = vmatmul.mubr.f32.gmra.mrb[2].mxu0 %v617_v62  ;;  %6377 = vmatprep.subr.bf16.mxu1 %v6376_v58  ;;  %v586_v43 = vld [vmem:[%s6857_s22 + $0x348] sm:$0xff]  ;;  %v572_v45 = vld [vmem:[%s6857_s22 + $0x2d8] sm:$0xff]  ;;  %v641_v46 = vld [vmem:[%s8379_s1 + $0x100] sm:$0xff] }
  0x39   : > { %848 = vmatmul.mubr.f32.gmra.mrb[2].mxu1 %v619_v2  ;;  %6347 = vmatpush3.bf16.msra.mxu0 %v6346_v63  ;;  %v603_v48 = vld [vmem:[%s6857_s22 + $0x3d0] sm:$0xff]  ;;  %v604_v49 = vld [vmem:[%s6857_s22 + $0x3d8] sm:$0xff]  ;;  %v650_v53 = vld [vmem:[%s8379_s1 + $0x148] sm:$0xff]  ;;  %v6390_v55 = vpack.c.bf16 %v586_v43, %v585_v41  ;;  %v6360_v56 = vpack.c.bf16 %v572_v45, %v571_v44 }
  0x3a   : > { %747 = vmatprep.mubr.f32.mxu0 %v626_v5  ;;  %852 = vmatprep.mubr.f32.mxu1 %v628_v6  ;;  %v643_v50 = vld [vmem:[%s8379_s1 + $0x110] sm:$0xff]  ;;  %v556_v52 = vld [vmem:[%s6857_s22 + $0x258] sm:$0xff]  ;;  %v6392_v58 = vpack.c.bf16 %v604_v49, %v603_v48  ;;  %v573_v60 = vld [vmem:[%s6857_s22 + $0x2e0] sm:$0xff] }
  0x3b   : > { %6379 = vmatpush3.bf16.msra.mxu1 %v6378_v7  ;;  %6349 = vmatprep.subr.bf16.mxu0 %v6348_v8  ;;  %v555_v51 = vld [vmem:[%s6857_s22 + $0x250] sm:$0xff]  ;;  %v652_v54 = vld [vmem:[%s8379_s1 + $0x158] sm:$0xff]  ;;  %v574_v61 = vld [vmem:[%s6857_s22 + $0x2e8] sm:$0xff] }
  0x3c   : > { %748 = vmatmul.mubr.f32.gmra.mrb[4].mxu0 %v625_v14  ;;  %6381 = vmatprep.subr.bf16.mxu1 %v6380_v10  ;;  %v587_v57 = vld [vmem:[%s6857_s22 + $0x350] sm:$0xff]  ;;  %v588_v59 = vld [vmem:[%s6857_s22 + $0x358] sm:$0xff]  ;;  %v649_v62 = vld [vmem:[%s8379_s1 + $0x140] sm:$0xff]  ;;  %v6362_v63 = vpack.c.bf16 %v556_v52, %v555_v51  ;;  %v6364_v8 = vpack.c.bf16 %v574_v61, %v573_v60 }
  0x3d   : > { %853 = vmatmul.mubr.f32.gmra.mrb[4].mxu1 %v627_v18  ;;  %6351 = vmatpush3.bf16.msra.mxu0 %v6350_v15  ;;  %v605_v0 = vld [vmem:[%s6857_s22 + $0x3e0] sm:$0xff]  ;;  %v606_v1 = vld [vmem:[%s6857_s22 + $0x3e8] sm:$0xff]  ;;  %v651_v2 = vld [vmem:[%s8379_s1 + $0x150] sm:$0xff]  ;;  %v6394_v7 = vpack.c.bf16 %v588_v59, %v587_v57 }
  0x3e   : > { %752 = vmatprep.mubr.f32.mxu0 %v634_v21  ;;  %857 = vmatprep.mubr.f32.mxu1 %v636_v22  ;;  %v557_v3 = vld [vmem:[%s6857_s22 + $0x260] sm:$0xff]  ;;  %v558_v4 = vld [vmem:[%s6857_s22 + $0x268] sm:$0xff]  ;;  %v660_v6 = vld [vmem:[%s8379_s1 + $0x198] sm:$0xff]  ;;  %v6396_v10 = vpack.c.bf16 %v606_v1, %v605_v0  ;;  %v6761_v1 = vmov 0.0  }
  0x3f   : > { %6383 = vmatpush3.bf16.msra.mxu1 %v6382_v23  ;;  %6353 = vmatprep.subr.bf16.mxu0 %v6352_v24  ;;  %v658_v5 = vld [vmem:[%s8379_s1 + $0x188] sm:$0xff]  ;;  %v589_v9 = vld [vmem:[%s6857_s22 + $0x360] sm:$0xff]  ;;  %v575_v12 = vld [vmem:[%s6857_s22 + $0x2f0] sm:$0xff]  ;;  %v6366_v15 = vpack.c.bf16 %v558_v4, %v557_v3  ;;  %1097 = vst.msk [vmem:[#allocation2 + $0x10] sm:$0xff] %vm1093_vm1, %v6761_v1 }
  0x40   : > { %753 = vmatmul.mubr.f32.gmra.mrb[6].mxu0 %v633_v30  ;;  %6385 = vmatprep.subr.bf16.mxu1 %v6384_v26  ;;  %v590_v11 = vld [vmem:[%s6857_s22 + $0x368] sm:$0xff]  ;;  %v576_v13 = vld [vmem:[%s6857_s22 + $0x2f8] sm:$0xff]  ;;  %v657_v14 = vld [vmem:[%s8379_s1 + $0x180] sm:$0xff]  ;;  %1098 = vst.msk [vmem:[#allocation2 + $0x18] sm:$0x3] %vm1095_vm2, %v6761_v1 }
  0x41   : > { %858 = vmatmul.mubr.f32.gmra.mrb[6].mxu1 %v635_v34  ;;  %6355 = vmatpush3.bf16.msra.mxu0 %v6354_v31  ;;  %v607_v16 = vld [vmem:[%s6857_s22 + $0x3f0] sm:$0xff]  ;;  %v608_v17 = vld [vmem:[%s6857_s22 + $0x3f8] sm:$0xff]  ;;  %v666_v21 = vld [vmem:[%s8379_s1 + $0x1c8] sm:$0xff]  ;;  %v6398_v23 = vpack.c.bf16 %v590_v11, %v589_v9  ;;  %v6368_v24 = vpack.c.bf16 %v576_v13, %v575_v12  ;;  %1094 = vst.msk [vmem:[#allocation2] sm:$0xff] %vm1093_vm1, %v6761_v1 }
  0x42   : > { %757 = vmatprep.mubr.f32.mxu0 %v642_v37  ;;  %862 = vmatprep.mubr.f32.mxu1 %v644_v38  ;;  %v659_v18 = vld [vmem:[%s8379_s1 + $0x190] sm:$0xff]  ;;  %v560_v20 = vld [vmem:[%s6857_s22 + $0x278] sm:$0xff]  ;;  %v6400_v25 = vpack.c.bf16 %v608_v17, %v607_v16  ;;  %v665_v28 = vld [vmem:[%s8379_s1 + $0x1c0] sm:$0xff]  ;;  %1096 = vst.msk [vmem:[#allocation2 + $0x8] sm:$0x3] %vm1095_vm2, %v6761_v1 }
  0x43   : > { %6387 = vmatpush3.bf16.msra.mxu1 %v6386_v39  ;;  %6357 = vmatprep.subr.bf16.mxu0 %v6356_v40  ;;  %v559_v19 = vld [vmem:[%s6857_s22 + $0x270] sm:$0xff]  ;;  %v668_v22 = vld [vmem:[%s8379_s1 + $0x1d8] sm:$0xff]  ;;  %v614_v31 = vld [vmem:[%s8379_s1 + $0x28] sm:$0xff]  ;;  %1099 = vst.msk [vmem:[#allocation2 + $0x20] sm:$0xff] %vm1093_vm1, %v6761_v1 }
  0x44   : > { %758 = vmatmul.mubr.f32.gmra.mrb[8].mxu0 %v641_v46  ;;  %6389 = vmatprep.subr.bf16.mxu1 %v6388_v42  ;;  %v591_v26 = vld [vmem:[%s6857_s22 + $0x370] sm:$0xff]  ;;  %v592_v27 = vld [vmem:[%s6857_s22 + $0x378] sm:$0xff]  ;;  %v6370_v29 = vpack.c.bf16 %v560_v20, %v559_v19  ;;  %v613_v34 = vld [vmem:[%s8379_s1 + $0x20] sm:$0xff]  ;;  %1100 = vst.msk [vmem:[#allocation2 + $0x28] sm:$0x3] %vm1095_vm2, %v6761_v1 }
  0x45   : > { %863 = vmatmul.mubr.f32.gmra.mrb[8].mxu1 %v643_v50  ;;  %6359 = vmatpush3.bf16.msra.mxu0 %v6358_v47  ;;  %v667_v30 = vld [vmem:[%s8379_s1 + $0x1d0] sm:$0xff]  ;;  %v6402_v32 = vpack.c.bf16 %v592_v27, %v591_v26  ;;  %v616_v33 = vld [vmem:[%s8379_s1 + $0x38] sm:$0xff]  ;;  %v622_v35 = vld [vmem:[%s8379_s1 + $0x68] sm:$0xff]  ;;  %1101 = vst.msk [vmem:[#allocation2 + $0x30] sm:$0xff] %vm1093_vm1, %v6761_v1 }
  0x46   : > { %762 = vmatprep.mubr.f32.mxu0 %v650_v53  ;;  %867 = vmatprep.mubr.f32.mxu1 %v652_v54  ;;  %v615_v36 = vld [vmem:[%s8379_s1 + $0x30] sm:$0xff]  ;;  %v624_v37 = vld [vmem:[%s8379_s1 + $0x78] sm:$0xff]  ;;  %v621_v38 = vld [vmem:[%s8379_s1 + $0x60] sm:$0xff]  ;;  %1102 = vst.msk [vmem:[#allocation2 + $0x38] sm:$0x3] %vm1095_vm2, %v6761_v1 }
  0x47   : > { %6391 = vmatpush3.bf16.msra.mxu1 %v6390_v55  ;;  %6361 = vmatprep.subr.bf16.mxu0 %v6360_v56  ;;  %v630_v39 = vld [vmem:[%s8379_s1 + $0xa8] sm:$0xff]  ;;  %v623_v40 = vld [vmem:[%s8379_s1 + $0x70] sm:$0xff]  ;;  %v632_v41 = vld [vmem:[%s8379_s1 + $0xb8] sm:$0xff]  ;;  %1103 = vst.msk [vmem:[#allocation2 + $0x40] sm:$0xff] %vm1093_vm1, %v6761_v1 }
  0x48   : > { %763 = vmatmul.mubr.f32.gmra.mrb[10].mxu0 %v649_v62  ;;  %6393 = vmatprep.subr.bf16.mxu1 %v6392_v58  ;;  %v629_v42 = vld [vmem:[%s8379_s1 + $0xa0] sm:$0xff]  ;;  %v638_v43 = vld [vmem:[%s8379_s1 + $0xe8] sm:$0xff]  ;;  %v631_v44 = vld [vmem:[%s8379_s1 + $0xb0] sm:$0xff]  ;;  %1104 = vst.msk [vmem:[#allocation2 + $0x48] sm:$0x3] %vm1095_vm2, %v6761_v1 }
  0x49   : > { %868 = vmatmul.mubr.f32.gmra.mrb[10].mxu1 %v651_v2  ;;  %6363 = vmatpush3.bf16.msra.mxu0 %v6362_v63  ;;  %v640_v45 = vld [vmem:[%s8379_s1 + $0xf8] sm:$0xff]  ;;  %v637_v46 = vld [vmem:[%s8379_s1 + $0xe0] sm:$0xff]  ;;  %v646_v47 = vld [vmem:[%s8379_s1 + $0x128] sm:$0xff]  ;;  %1105 = vst.msk [vmem:[#allocation2 + $0x50] sm:$0xff] %vm1093_vm1, %v6761_v1 }
  0x4a   : > { %767 = vmatprep.mubr.f32.mxu0 %v658_v5  ;;  %872 = vmatprep.mubr.f32.mxu1 %v660_v6  ;;  %v639_v48 = vld [vmem:[%s8379_s1 + $0xf0] sm:$0xff]  ;;  %v648_v49 = vld [vmem:[%s8379_s1 + $0x138] sm:$0xff]  ;;  %v645_v50 = vld [vmem:[%s8379_s1 + $0x120] sm:$0xff]  ;;  %1106 = vst.msk [vmem:[#allocation2 + $0x58] sm:$0x3] %vm1095_vm2, %v6761_v1 }
  0x4b   : > { %6395 = vmatpush3.bf16.msra.mxu1 %v6394_v7  ;;  %6365 = vmatprep.subr.bf16.mxu0 %v6364_v8  ;;  %v654_v51 = vld [vmem:[%s8379_s1 + $0x168] sm:$0xff]  ;;  %v647_v52 = vld [vmem:[%s8379_s1 + $0x130] sm:$0xff]  ;;  %v656_v53 = vld [vmem:[%s8379_s1 + $0x178] sm:$0xff]  ;;  %1107 = vst.msk [vmem:[#allocation2 + $0x60] sm:$0xff] %vm1093_vm1, %v6761_v1 }
  0x4c   : > { %768 = vmatmul.mubr.f32.gmra.mrb[12].mxu0 %v657_v14  ;;  %6397 = vmatprep.subr.bf16.mxu1 %v6396_v10  ;;  %v653_v54 = vld [vmem:[%s8379_s1 + $0x160] sm:$0xff]  ;;  %v662_v55 = vld [vmem:[%s8379_s1 + $0x1a8] sm:$0xff]  ;;  %v655_v56 = vld [vmem:[%s8379_s1 + $0x170] sm:$0xff]  ;;  %1108 = vst.msk [vmem:[#allocation2 + $0x68] sm:$0x3] %vm1095_vm2, %v6761_v1 }
  0x4d   : > { %873 = vmatmul.mubr.f32.gmra.mrb[12].mxu1 %v659_v18  ;;  %6367 = vmatpush3.bf16.msra.mxu0 %v6366_v15  ;;  %v664_v57 = vld [vmem:[%s8379_s1 + $0x1b8] sm:$0xff]  ;;  %v661_v58 = vld [vmem:[%s8379_s1 + $0x1a0] sm:$0xff]  ;;  %v670_v59 = vld [vmem:[%s8379_s1 + $0x1e8] sm:$0xff]  ;;  %1109 = vst.msk [vmem:[#allocation2 + $0x70] sm:$0xff] %vm1093_vm1, %v6761_v1 }
  0x4e   : > { %772 = vmatprep.mubr.f32.mxu0 %v666_v21  ;;  %877 = vmatprep.mubr.f32.mxu1 %v668_v22  ;;  %v663_v60 = vld [vmem:[%s8379_s1 + $0x1b0] sm:$0xff]  ;;  %v672_v61 = vld [vmem:[%s8379_s1 + $0x1f8] sm:$0xff]  ;;  %v669_v62 = vld [vmem:[%s8379_s1 + $0x1e0] sm:$0xff]  ;;  %1110 = vst.msk [vmem:[#allocation2 + $0x78] sm:$0x3] %vm1095_vm2, %v6761_v1 }
  0x4f   : > { %6399 = vmatpush3.bf16.msra.mxu1 %v6398_v23  ;;  %6369 = vmatprep.subr.bf16.mxu0 %v6368_v24  ;;  %v671_v63 = vld [vmem:[%s8379_s1 + $0x1f0] sm:$0xff]  ;;  %v5345_v0 = vld [vmem:[%s8381_s3 + $0x4] sm:$0x7]  ;;  %1111 = vst.msk [vmem:[#allocation2 + $0x80] sm:$0xff] %vm1093_vm1, %v6761_v1  ;;  %1113 = vst.msk [vmem:[#allocation2 + $0x90] sm:$0xff] %vm1093_vm1, %v6761_v1 }
  0x50   : > { %773 = vmatmul.mubr.f32.gmra.mrb[14].mxu0 %v665_v28  ;;  %6401 = vmatprep.subr.bf16.mxu1 %v6400_v25  ;;  %1112 = vst.msk [vmem:[#allocation2 + $0x88] sm:$0x3] %vm1095_vm2, %v6761_v1  ;;  %1114 = vst.msk [vmem:[#allocation2 + $0x98] sm:$0x3] %vm1095_vm2, %v6761_v1  ;;  %v1133_v2 = vld [vmem:[#allocation2 + $0x1] sm:$0xff] }
  0x51   : > { %878 = vmatmul.mubr.f32.gmra.mrb[14].mxu1 %v667_v30  ;;  %6371 = vmatpush3.bf16.msra.mxu0 %v6370_v29  ;;  %v7222_v3 = vld [vmem:[%s8381_s3] sm:$0x7]  ;;  %3114 = vst.msk [vmem:[#allocation3] sm:$0xff] %vm3025_vm4, %v6761_v1  ;;  %3117 = vst.msk [vmem:[#allocation3 + $0x10] sm:$0xff] %vm3025_vm4, %v6761_v1 }
  0x52   : > { %947 = vmatprep.mubr.f32.mxu0 %v614_v31  ;;  %1052 = vmatprep.mubr.f32.mxu1 %v616_v33  ;;  %3119 = vst.msk [vmem:[#allocation3 + $0x20] sm:$0xff] %vm3025_vm4, %v6761_v1  ;;  %3121 = vst.msk [vmem:[#allocation3 + $0x30] sm:$0xff] %vm3025_vm4, %v6761_v1 }
  0x53   : > { %6403 = vmatpush3.bf16.msra.mxu1 %v6402_v32  ;;  %6008 = vmatprep.subr.msk.mxu0 %vm1167_vm0, %v5345_v0  ;;  %3123 = vst.msk [vmem:[#allocation3 + $0x40] sm:$0xff] %vm3025_vm4, %v6761_v1  ;;  %3125 = vst.msk [vmem:[#allocation3 + $0x50] sm:$0xff] %vm3025_vm4, %v6761_v1 }
  0x54   : > { %948 = vmatmul.mubr.f32.vlgmr.msra.gmra.mrb[16].mxu0 %v613_v34  ;;  %3127 = vst.msk [vmem:[#allocation3 + $0x60] sm:$0xff] %vm3025_vm4, %v6761_v1  ;;  %3129 = vst.msk [vmem:[#allocation3 + $0x70] sm:$0xff] %vm3025_vm4, %v6761_v1 }
  0x55   : > { %952 = vmatprep.mubr.f32.mxu0 %v622_v35  ;;  %6009 = vmatpush3.msk.msra.mxu0 %vm1167_vm0, %v5345_v0  ;;  %3131 = vst.msk [vmem:[#allocation3 + $0x80] sm:$0xff] %vm3025_vm4, %v6761_v1  ;;  %3133 = vst.msk [vmem:[#allocation3 + $0x90] sm:$0xff] %vm3025_vm4, %v6761_v1 }
  0x56   : > { %1053 = vmatmul.mubr.f32.vlgmr.msra.gmra.mrb[16].mxu1 %v615_v36  ;;  %6022 = vmatprep.subr.msk.mxu0 %vm1167_vm0, %v7222_v3  ;;  %3135 = vst.msk [vmem:[#allocation3 + $0xa0] sm:$0xff] %vm3025_vm4, %v6761_v1  ;;  %3137 = vst.msk [vmem:[#allocation3 + $0xb0] sm:$0xff] %vm3025_vm4, %v6761_v1 }
  0x57   : > { %1057 = vmatprep.mubr.f32.mxu1 %v624_v37  ;;  %3139 = vst.msk [vmem:[#allocation3 + $0xc0] sm:$0xff] %vm3025_vm4, %v6761_v1  ;;  %3141 = vst.msk [vmem:[#allocation3 + $0xd0] sm:$0xff] %vm3025_vm4, %v6761_v1 }
  0x58   : > { %953 = vmatmul.mubr.f32.gmra.mrb[18].mxu0 %v621_v38  ;;  %3124 = vst.msk [vmem:[#allocation3 + $0x48] sm:$0x3f] %vm3115_vm5, %v6761_v1  ;;  %3116 = vst.msk [vmem:[#allocation3 + $0x8] sm:$0x3f] %vm3115_vm5, %v6761_v1 }
  0x59   : > { %957 = vmatprep.mubr.f32.mxu0 %v630_v39  ;;  %3118 = vst.msk [vmem:[#allocation3 + $0x18] sm:$0x3f] %vm3115_vm5, %v6761_v1  ;;  %3120 = vst.msk [vmem:[#allocation3 + $0x28] sm:$0x3f] %vm3115_vm5, %v6761_v1 }
  0x5a   : > { %1058 = vmatmul.mubr.f32.gmra.mrb[18].mxu1 %v623_v40  ;;  %3122 = vst.msk [vmem:[#allocation3 + $0x38] sm:$0x3f] %vm3115_vm5, %v6761_v1  ;;  %3126 = vst.msk [vmem:[#allocation3 + $0x58] sm:$0x3f] %vm3115_vm5, %v6761_v1 }
  0x5b   : > { %1062 = vmatprep.mubr.f32.mxu1 %v632_v41  ;;  %3128 = vst.msk [vmem:[#allocation3 + $0x68] sm:$0x3f] %vm3115_vm5, %v6761_v1  ;;  %3130 = vst.msk [vmem:[#allocation3 + $0x78] sm:$0x3f] %vm3115_vm5, %v6761_v1 }
  0x5c   : > { %958 = vmatmul.mubr.f32.gmra.mrb[20].mxu0 %v629_v42  ;;  %3132 = vst.msk [vmem:[#allocation3 + $0x88] sm:$0x3f] %vm3115_vm5, %v6761_v1  ;;  %3134 = vst.msk [vmem:[#allocation3 + $0x98] sm:$0x3f] %vm3115_vm5, %v6761_v1 }
  0x5d   : > { %962 = vmatprep.mubr.f32.mxu0 %v638_v43  ;;  %3136 = vst.msk [vmem:[#allocation3 + $0xa8] sm:$0x3f] %vm3115_vm5, %v6761_v1  ;;  %3138 = vst.msk [vmem:[#allocation3 + $0xb8] sm:$0x3f] %vm3115_vm5, %v6761_v1 }
  0x5e   : > { %1063 = vmatmul.mubr.f32.gmra.mrb[20].mxu1 %v631_v44  ;;  %3140 = vst.msk [vmem:[#allocation3 + $0xc8] sm:$0x3f] %vm3115_vm5, %v6761_v1  ;;  %3142 = vst.msk [vmem:[#allocation3 + $0xd8] sm:$0x3f] %vm3115_vm5, %v6761_v1 }
  0x5f   : > { %1067 = vmatprep.mubr.f32.mxu1 %v640_v45 }
  0x60   : > { %963 = vmatmul.mubr.f32.gmra.mrb[22].mxu0 %v637_v46 }
  0x61   : > { %967 = vmatprep.mubr.f32.mxu0 %v646_v47 }
  0x62   : > { %1068 = vmatmul.mubr.f32.gmra.mrb[22].mxu1 %v639_v48 }
  0x63   : > { %1072 = vmatprep.mubr.f32.mxu1 %v648_v49 }
  0x64   : > { %968 = vmatmul.mubr.f32.gmra.mrb[24].mxu0 %v645_v50 }
  0x65   : > { %972 = vmatprep.mubr.f32.mxu0 %v654_v51 }
  0x66   : > { %1073 = vmatmul.mubr.f32.gmra.mrb[24].mxu1 %v647_v52 }
  0x67   : > { %1077 = vmatprep.mubr.f32.mxu1 %v656_v53 }
  0x68   : > { %973 = vmatmul.mubr.f32.gmra.mrb[26].mxu0 %v653_v54 }
  0x69   : > { %977 = vmatprep.mubr.f32.mxu0 %v662_v55 }
  0x6a   : > { %1078 = vmatmul.mubr.f32.gmra.mrb[26].mxu1 %v655_v56 }
  0x6b   : > { %1082 = vmatprep.mubr.f32.mxu1 %v664_v57 }
  0x6c   : > { %978 = vmatmul.mubr.f32.gmra.mrb[28].mxu0 %v661_v58 }
  0x6d   : > { %982 = vmatprep.mubr.f32.mxu0 %v670_v59 }
  0x6e   : > { %1083 = vmatmul.mubr.f32.gmra.mrb[28].mxu1 %v663_v60 }
  0x6f   : > { %1087 = vmatprep.mubr.f32.mxu1 %v672_v61 }
  0x70   : > { %983 = vmatmul.mubr.f32.gmra.mrb[30].mxu0 %v669_v62 }
  0x71   : > { %6010 = vmatprep.mubr.msk.f32.mxu0 %vm1093_vm1, %v1133_v2 }
  0x72   : > { %1088 = vmatmul.mubr.f32.gmra.mrb[30].mxu1 %v671_v63 }
 0x107   : > { %v5588_v4 = vpop.f32.mrb[0].mxu0 }
 0x108   : > { %v5644_v5 = vpop.f32.mrb[0].mxu1  ;;  %v5589_v6 = vpop.f32.mrb[1].mxu0 }
 0x109   : > { %v5590_v7 = vadd.f32 %v5589_v6, %v5588_v4  ;;  %v5645_v8 = vpop.f32.mrb[1].mxu1 }
 0x10a   : > { %v5646_v9 = vadd.f32 %v5645_v8, %v5644_v5 }
 0x10b   : > { %v5591_v10 = vpop.f32.mrb[2].mxu0 }
 0x10c   : > { %v845_v11 = vadd.f32 %v5646_v9, %v5590_v7  ;;  %v5647_v12 = vpop.f32.mrb[2].mxu1  ;;  %v5592_v13 = vpop.f32.mrb[3].mxu0 }
 0x10d   : > { %v5593_v14 = vadd.f32 %v5592_v13, %v5591_v10  ;;  %v5648_v15 = vpop.f32.mrb[3].mxu1 }
 0x10e   : > { %v5649_v16 = vadd.f32 %v5648_v15, %v5647_v12 }
 0x10f   : > { %v5594_v17 = vpop.f32.mrb[4].mxu0 }
 0x110   : > { %v850_v18 = vadd.f32 %v5649_v16, %v5593_v14  ;;  %v5650_v19 = vpop.f32.mrb[4].mxu1  ;;  %v5595_v20 = vpop.f32.mrb[5].mxu0 }
 0x111   : > { %v5596_v21 = vadd.f32 %v5595_v20, %v5594_v17  ;;  %v5651_v22 = vpop.f32.mrb[5].mxu1 }
 0x112   : > { %v5652_v23 = vadd.f32 %v5651_v22, %v5650_v19 }
 0x113   : > { %v5597_v24 = vpop.f32.mrb[6].mxu0 }
 0x114   : > { %v855_v25 = vadd.f32 %v5652_v23, %v5596_v21  ;;  %v5653_v26 = vpop.f32.mrb[6].mxu1  ;;  %v5598_v27 = vpop.f32.mrb[7].mxu0 }
 0x115   : > { %v5599_v28 = vadd.f32 %v5598_v27, %v5597_v24  ;;  %v5654_v29 = vpop.f32.mrb[7].mxu1 }
 0x116   : > { %v5655_v30 = vadd.f32 %v5654_v29, %v5653_v26 }
 0x117   : > { %v5600_v31 = vpop.f32.mrb[8].mxu0 }
 0x118   : > { %v860_v32 = vadd.f32 %v5655_v30, %v5599_v28  ;;  %v5656_v33 = vpop.f32.mrb[8].mxu1  ;;  %v5601_v34 = vpop.f32.mrb[9].mxu0 }
 0x119   : > { %v5602_v35 = vadd.f32 %v5601_v34, %v5600_v31  ;;  %v5657_v36 = vpop.f32.mrb[9].mxu1 }
 0x11a   : > { %v5658_v37 = vadd.f32 %v5657_v36, %v5656_v33 }
 0x11b   : > { %v5603_v38 = vpop.f32.mrb[10].mxu0 }
 0x11c   : > { %v7226_v39 = vadd.f32 %v5658_v37, %v5602_v35  ;;  %v5659_v40 = vpop.f32.mrb[10].mxu1  ;;  %v5604_v41 = vpop.f32.mrb[11].mxu0 }
 0x11d   : > { %v5605_v42 = vadd.f32 %v5604_v41, %v5603_v38  ;;  %v5660_v43 = vpop.f32.mrb[11].mxu1 }
 0x11e   : > { %v5661_v44 = vadd.f32 %v5660_v43, %v5659_v40 }
 0x11f   : > { %v5606_v45 = vpop.f32.mrb[12].mxu0 }
 0x120   : > { %v7228_v46 = vadd.f32 %v5661_v44, %v5605_v42  ;;  %v5662_v47 = vpop.f32.mrb[12].mxu1  ;;  %v5607_v48 = vpop.f32.mrb[13].mxu0 }
 0x121   : > { %v5608_v49 = vadd.f32 %v5607_v48, %v5606_v45  ;;  %v5663_v50 = vpop.f32.mrb[13].mxu1 }
 0x122   : > { %v5664_v51 = vadd.f32 %v5663_v50, %v5662_v47 }
 0x123   : > { %v5609_v52 = vpop.f32.mrb[14].mxu0 }
 0x124   : > { %v7230_v53 = vadd.f32 %v5664_v51, %v5608_v49  ;;  %v5665_v54 = vpop.f32.mrb[14].mxu1  ;;  %v5610_v55 = vpop.f32.mrb[15].mxu0 }
 0x125   : > { %v5611_v56 = vadd.f32 %v5610_v55, %v5609_v52  ;;  %v5666_v57 = vpop.f32.mrb[15].mxu1 }
 0x126   : > { %v5667_v58 = vadd.f32 %v5666_v57, %v5665_v54 }
 0x127   : > { %v5700_v59 = vpop.f32.mrb[16].mxu0 }
 0x128   : > { %v7232_v60 = vadd.f32 %v5667_v58, %v5611_v56  ;;  %v5701_v61 = vpop.f32.mrb[17].mxu0 }
 0x129   : > { %v5702_v62 = vadd.f32 %v5701_v61, %v5700_v59  ;;  %v5756_v63 = vpop.f32.mrb[16].mxu1 }
 0x12a   : > { %v5757_v0 = vpop.f32.mrb[17].mxu1 }
 0x12b   : > { %v950_v2 = vadd.f32 %v5702_v62, %v845_v11  ;;  %v5758_v4 = vadd.f32 %v5757_v0, %v5756_v63  ;;  %v5703_v5 = vpop.f32.mrb[18].mxu0 }
 0x12c   : > { %v5704_v6 = vpop.f32.mrb[19].mxu0 }
 0x12d   : > { %v1055_v7 = vadd.f32 %v5758_v4, %v950_v2  ;;  %v5705_v8 = vadd.f32 %v5704_v6, %v5703_v5  ;;  %v5759_v9 = vpop.f32.mrb[18].mxu1 }
 0x12e   : > { %v5760_v10 = vpop.f32.mrb[19].mxu1 }
 0x12f   : > { %1116 = vst.msk [vmem:[#allocation2 + $0x11] sm:$0xff] %vm1093_vm1, %v1055_v7  ;;  %v955_v12 = vadd.f32 %v5705_v8, %v850_v18  ;;  %v5761_v13 = vadd.f32 %v5760_v10, %v5759_v9  ;;  %v5706_v14 = vpop.f32.mrb[20].mxu0  ;;  %v7241_v18 = vld [vmem:[%s8381_s3 + $0x8] sm:$0x7]  ;;  %v1124_v7 = vld [vmem:[#allocation2] sm:$0xff] }
 0x130   : > { %v5707_v15 = vpop.f32.mrb[21].mxu0  ;;  %v2483_v9 = vld [vmem:[%s8383_s5 + $0x8] sm:$0xff] }
 0x131   : > { %v1060_v16 = vadd.f32 %v5761_v13, %v955_v12  ;;  %v5708_v17 = vadd.f32 %v5707_v15, %v5706_v14  ;;  %v5762_v19 = vpop.f32.mrb[20].mxu1  ;;  %v5374_v13 = vld [vmem:[%s8381_s3 + $0xc] sm:$0x7] }
 0x132   : > { %v5763_v20 = vpop.f32.mrb[21].mxu1 }
 0x133   : > { %1117 = vst.msk [vmem:[#allocation2 + $0x21] sm:$0xff] %vm1093_vm1, %v1060_v16  ;;  %v960_v11 = vadd.f32 %v5708_v17, %v855_v25  ;;  %v5764_v21 = vadd.f32 %v5763_v20, %v5762_v19  ;;  %v5709_v22 = vpop.f32.mrb[22].mxu0  ;;  %v1408_v20 = vld [vmem:[#allocation2 + $0x2] sm:$0xff] }
 0x134   : > { %v5710_v23 = vpop.f32.mrb[23].mxu0 }
 0x135   : > { %v1065_v24 = vadd.f32 %v5764_v21, %v960_v11  ;;  %v5711_v26 = vadd.f32 %v5710_v23, %v5709_v22  ;;  %v5765_v27 = vpop.f32.mrb[22].mxu1  ;;  %v5384_v22 = vld [vmem:[%s8381_s3 + $0x10] sm:$0x7] }
 0x136   : > { %v5766_v28 = vpop.f32.mrb[23].mxu1  ;;  %v7236_v29 = vld [vmem:[#allocation2 + $0x11] sm:$0xff] }
 0x137   : > { %1118 = vst.msk [vmem:[#allocation2 + $0x31] sm:$0xff] %vm1093_vm1, %v1065_v24  ;;  %v965_v30 = vadd.f32 %v5711_v26, %v860_v32  ;;  %v5767_v31 = vadd.f32 %v5766_v28, %v5765_v27  ;;  %v5712_v33 = vpop.f32.mrb[24].mxu0  ;;  %6011 = vmatmul.mubr.msk.f32.vlgmr.msra.gmra.mrb[32].mxu0 %vm1093_vm1, %v7236_v29  ;;  %v1125_v12 = vld [vmem:[#allocation2 + $0x10] sm:$0xff] }
 0x138   : > { %v5713_v25 = vpop.f32.mrb[25].mxu0  ;;  %6023 = vmatpush3.msk.msra.mxu0 %vm1167_vm0, %v7222_v3  ;;  %v1409_v21 = vld [vmem:[#allocation2 + $0x12] sm:$0xff] }
 0x139   : > { %v1070_v34 = vadd.f32 %v5767_v31, %v965_v30  ;;  %v5714_v35 = vadd.f32 %v5713_v25, %v5712_v33  ;;  %v5768_v36 = vpop.f32.mrb[24].mxu1  ;;  %6036 = vmatprep.subr.msk.mxu0 %vm1167_vm0, %v7241_v18  ;;  %v5394_v30 = vld [vmem:[%s8381_s3 + $0x14] sm:$0x7]  ;;  %v5404_v33 = vld [vmem:[%s8381_s3 + $0x18] sm:$0x7] }
 0x13a   : > { %v5769_v37 = vpop.f32.mrb[25].mxu1  ;;  %v7250_v38 = vld [vmem:[#allocation2 + $0x21] sm:$0xff]  ;;  %v5414_v25 = vld [vmem:[%s8381_s3 + $0x1c] sm:$0x7] }
 0x13b   : > { %1119 = vst.msk [vmem:[#allocation2 + $0x41] sm:$0xff] %vm1093_vm1, %v1070_v34  ;;  %v970_v32 = vadd.f32 %v5714_v35, %v7226_v39  ;;  %v5770_v40 = vadd.f32 %v5769_v37, %v5768_v36  ;;  %v5715_v41 = vpop.f32.mrb[26].mxu0  ;;  %6013 = vmatprep.mubr.msk.f32.mxu0 %vm1093_vm1, %v7250_v38  ;;  %v7294_v14 = vld [vmem:[#allocation2 + $0x20] sm:$0xff]  ;;  %v2016_v36 = vld [vmem:[#allocation2 + $0x90] sm:$0xff] }
 0x13c   : > { %v5716_v42 = vpop.f32.mrb[27].mxu0  ;;  %v7326_v23 = vld [vmem:[#allocation2 + $0x22] sm:$0xff]  ;;  %v2166_v37 = vld [vmem:[#allocation2 + $0x91] sm:$0xff] }
 0x13d   : > { %v1075_v3 = vadd.f32 %v5770_v40, %v970_v32  ;;  %v5717_v43 = vadd.f32 %v5716_v42, %v5715_v41  ;;  %v5771_v44 = vpop.f32.mrb[26].mxu1  ;;  %v5424_v35 = vld [vmem:[%s8381_s3 + $0x20] sm:$0x7] }
 0x13e   : > { %v5772_v45 = vpop.f32.mrb[27].mxu1  ;;  %v7256_v47 = vld [vmem:[#allocation2 + $0x31] sm:$0xff]  ;;  %v5434_v32 = vld [vmem:[%s8382_s4] ss:$0 sm:$0xff] }
 0x13f   : > { %1120 = vst.msk [vmem:[#allocation2 + $0x51] sm:$0xff] %vm1093_vm1, %v1075_v3  ;;  %v975_v48 = vadd.f32 %v5717_v43, %v7228_v46  ;;  %v5773_v49 = vadd.f32 %v5772_v45, %v5771_v44  ;;  %v5718_v50 = vpop.f32.mrb[28].mxu0  ;;  %6014 = vmatmul.mubr.msk.f32.gmra.mrb[34].mxu0 %vm1093_vm1, %v7256_v47  ;;  %v7301_v15 = vld [vmem:[#allocation2 + $0x30] sm:$0xff] }
 0x140   : > { %v5719_v39 = vpop.f32.mrb[29].mxu0  ;;  %v7332_v24 = vld [vmem:[#allocation2 + $0x32] sm:$0xff] }
 0x141   : > { %v1080_v51 = vadd.f32 %v5773_v49, %v975_v48  ;;  %v5720_v52 = vadd.f32 %v5719_v39, %v5718_v50  ;;  %v5774_v54 = vpop.f32.mrb[28].mxu1 }
 0x142   : > { %v5775_v55 = vpop.f32.mrb[29].mxu1  ;;  %v7262_v56 = vld [vmem:[#allocation2 + $0x41] sm:$0xff] }
 0x143   : > { %1121 = vst.msk [vmem:[#allocation2 + $0x61] sm:$0xff] %vm1093_vm1, %v1080_v51  ;;  %v980_v57 = vadd.f32 %v5720_v52, %v7230_v53  ;;  %v5776_v58 = vadd.f32 %v5775_v55, %v5774_v54  ;;  %v5721_v59 = vpop.f32.mrb[30].mxu0  ;;  %6016 = vmatprep.mubr.msk.f32.mxu0 %vm1093_vm1, %v7262_v56  ;;  %v7305_v16 = vld [vmem:[#allocation2 + $0x40] sm:$0xff] }
 0x144   : > { %v5722_v46 = vpop.f32.mrb[31].mxu0  ;;  %v7336_v26 = vld [vmem:[#allocation2 + $0x42] sm:$0xff] }
 0x145   : > { %v1085_v61 = vadd.f32 %v5776_v58, %v980_v57  ;;  %v5723_v62 = vadd.f32 %v5722_v46, %v5721_v59  ;;  %v5777_v63 = vpop.f32.mrb[30].mxu1 }
 0x146   : > { %v5778_v0 = vpop.f32.mrb[31].mxu1  ;;  %v7268_v2 = vld [vmem:[#allocation2 + $0x51] sm:$0xff] }
 0x147   : > { %1122 = vst.msk [vmem:[#allocation2 + $0x71] sm:$0xff] %vm1093_vm1, %v1085_v61  ;;  %v985_v4 = vadd.f32 %v5723_v62, %v7232_v60  ;;  %v5779_v5 = vadd.f32 %v5778_v0, %v5777_v63  ;;  %6017 = vmatmul.mubr.msk.f32.gmra.mrb[36].mxu0 %vm1093_vm1, %v7268_v2  ;;  %v2482_v60 = vld [vmem:[%s8383_s5] sm:$0xff]  ;;  %v7309_v17 = vld [vmem:[#allocation2 + $0x50] sm:$0xff] }
 0x148   : > { %v6404_v10 = vpack.c.bf16 %v2483_v9, %v2482_v60  ;;  %v7340_v27 = vld [vmem:[#allocation2 + $0x52] sm:$0xff]  ;;  %v5435_v0 = vld [vmem:[%s8384_s6] ss:$0 sm:$0xff] }
 0x149   : > { %v1090_v53 = vadd.f32 %v5779_v5, %v985_v4 }
 0x14a   : > { %v7274_v6 = vld [vmem:[#allocation2 + $0x61] sm:$0xff]  ;;  %6405 = vmatprep.subr.bf16.mxu1 %v6404_v10 }
 0x14b   : > { %1123 = vst.msk [vmem:[#allocation2 + $0x81] sm:$0xff] %vm1093_vm1, %v1090_v53  ;;  %6019 = vmatprep.mubr.msk.f32.mxu0 %vm1093_vm1, %v7274_v6  ;;  %6407 = vmatpush3.bf16.msra.mxu1 %v6404_v10  ;;  %v7313_v19 = vld [vmem:[#allocation2 + $0x60] sm:$0xff] }
 0x14c   : > { %v7344_v28 = vld [vmem:[#allocation2 + $0x62] sm:$0xff] }
 0x14e   : > { %v7279_v8 = vld [vmem:[#allocation2 + $0x71] sm:$0xff] }
 0x14f   : > { %6020 = vmatmul.mubr.msk.f32.gmra.mrb[38].mxu0 %vm1093_vm1, %v7279_v8  ;;  %v7317_v11 = vld [vmem:[#allocation2 + $0x70] sm:$0xff] }
 0x150   : > { %6024 = vmatprep.mubr.msk.f32.mxu0 %vm1093_vm1, %v1124_v7 }
 0x152   : > { %v1565_v31 = vld [vmem:[#allocation2 + $0x80] sm:$0xff] }
 0x153   : > { %6025 = vmatmul.mubr.msk.f32.vlgmr.msra.gmra.mrb[32].mxu0 %vm1093_vm1, %v1125_v12  ;;  %v1865_v34 = vld [vmem:[#allocation2 + $0x82] sm:$0xff] }
 0x154   : > { %6027 = vmatprep.mubr.msk.f32.mxu0 %vm1093_vm1, %v7294_v14  ;;  %6037 = vmatpush3.msk.msra.mxu0 %vm1167_vm0, %v7241_v18  ;;  %v7348_v18 = vld [vmem:[#allocation2 + $0x72] sm:$0xff] }
 0x155   : > { %6050 = vmatprep.subr.msk.mxu0 %vm1167_vm0, %v5374_v13 }
 0x157   : > { %6028 = vmatmul.mubr.msk.f32.gmra.mrb[34].mxu0 %vm1093_vm1, %v7301_v15 }
 0x158   : > { %6030 = vmatprep.mubr.msk.f32.mxu0 %vm1093_vm1, %v7305_v16 }
 0x15b   : > { %6031 = vmatmul.mubr.msk.f32.gmra.mrb[36].mxu0 %vm1093_vm1, %v7309_v17 }
 0x15c   : > { %6033 = vmatprep.mubr.msk.f32.mxu0 %vm1093_vm1, %v7313_v19 }
 0x15f   : > { %6034 = vmatmul.mubr.msk.f32.gmra.mrb[38].mxu0 %vm1093_vm1, %v7317_v11 }
 0x160   : > { %6038 = vmatprep.mubr.msk.f32.mxu0 %vm1093_vm1, %v1408_v20 }
 0x163   : > { %6039 = vmatmul.mubr.msk.f32.vlgmr.msra.gmra.mrb[32].mxu0 %vm1093_vm1, %v1409_v21 }
 0x164   : > { %6041 = vmatprep.mubr.msk.f32.mxu0 %vm1093_vm1, %v7326_v23  ;;  %6051 = vmatpush3.msk.msra.mxu0 %vm1167_vm0, %v5374_v13 }
 0x165   : > { %6064 = vmatprep.subr.msk.mxu0 %vm1167_vm0, %v5384_v22 }
 0x167   : > { %6042 = vmatmul.mubr.msk.f32.gmra.mrb[34].mxu0 %vm1093_vm1, %v7332_v24 }
 0x168   : > { %6044 = vmatprep.mubr.msk.f32.mxu0 %vm1093_vm1, %v7336_v26 }
 0x16b   : > { %6045 = vmatmul.mubr.msk.f32.gmra.mrb[36].mxu0 %vm1093_vm1, %v7340_v27 }
 0x16c   : > { %6047 = vmatprep.mubr.msk.f32.mxu0 %vm1093_vm1, %v7344_v28 }
 0x16f   : > { %6048 = vmatmul.mubr.msk.f32.gmra.mrb[38].mxu0 %vm1093_vm1, %v7348_v18 }
 0x170   : > { %6052 = vmatprep.mubr.msk.f32.mxu0 %vm1093_vm1, %v1125_v12 }
 0x173   : > { %6053 = vmatmul.mubr.msk.f32.vlgmr.msra.gmra.mrb[32].mxu0 %vm1093_vm1, %v7294_v14 }
 0x174   : > { %6055 = vmatprep.mubr.msk.f32.mxu0 %vm1093_vm1, %v7301_v15  ;;  %6065 = vmatpush3.msk.msra.mxu0 %vm1167_vm0, %v5384_v22 }
 0x175   : > { %6078 = vmatprep.subr.msk.mxu0 %vm1167_vm0, %v5394_v30 }
 0x177   : > { %6056 = vmatmul.mubr.msk.f32.gmra.mrb[34].mxu0 %vm1093_vm1, %v7305_v16 }
 0x178   : > { %6058 = vmatprep.mubr.msk.f32.mxu0 %vm1093_vm1, %v7309_v17 }
 0x17b   : > { %6059 = vmatmul.mubr.msk.f32.gmra.mrb[36].mxu0 %vm1093_vm1, %v7313_v19 }
 0x17c   : > { %6061 = vmatprep.mubr.msk.f32.mxu0 %vm1093_vm1, %v7317_v11 }
 0x17f   : > { %6062 = vmatmul.mubr.msk.f32.gmra.mrb[38].mxu0 %vm1093_vm1, %v1565_v31 }
 0x180   : > { %6066 = vmatprep.mubr.msk.f32.mxu0 %vm1093_vm1, %v7236_v29  ;;  %v1715_v29 = vld [vmem:[#allocation2 + $0x81] sm:$0xff] }
 0x183   : > { %6067 = vmatmul.mubr.msk.f32.vlgmr.msra.gmra.mrb[32].mxu0 %vm1093_vm1, %v7250_v38 }
 0x184   : > { %6069 = vmatprep.mubr.msk.f32.mxu0 %vm1093_vm1, %v7256_v47  ;;  %6079 = vmatpush3.msk.msra.mxu0 %vm1167_vm0, %v5394_v30 }
 0x185   : > { %6092 = vmatprep.subr.msk.mxu0 %vm1167_vm0, %v5404_v33 }
 0x187   : > { %6070 = vmatmul.mubr.msk.f32.gmra.mrb[34].mxu0 %vm1093_vm1, %v7262_v56 }
 0x188   : > { %6072 = vmatprep.mubr.msk.f32.mxu0 %vm1093_vm1, %v7268_v2 }
 0x18b   : > { %6073 = vmatmul.mubr.msk.f32.gmra.mrb[36].mxu0 %vm1093_vm1, %v7274_v6 }
 0x18c   : > { %6075 = vmatprep.mubr.msk.f32.mxu0 %vm1093_vm1, %v7279_v8 }
 0x18f   : > { %6076 = vmatmul.mubr.msk.f32.gmra.mrb[38].mxu0 %vm1093_vm1, %v1715_v29 }
 0x190   : > { %6080 = vmatprep.mubr.msk.f32.mxu0 %vm1093_vm1, %v1409_v21 }
 0x193   : > { %6081 = vmatmul.mubr.msk.f32.vlgmr.msra.gmra.mrb[32].mxu0 %vm1093_vm1, %v7326_v23 }
 0x194   : > { %6083 = vmatprep.mubr.msk.f32.mxu0 %vm1093_vm1, %v7332_v24  ;;  %6093 = vmatpush3.msk.msra.mxu0 %vm1167_vm0, %v5404_v33  ;;  %v2670_v33 = vld [vmem:[%s8380_s2 + $0x88] sm:$0xff] }
 0x195   : > { %6106 = vmatprep.subr.msk.mxu0 %vm1167_vm0, %v5414_v25 }
 0x197   : > { %6084 = vmatmul.mubr.msk.f32.gmra.mrb[34].mxu0 %vm1093_vm1, %v7336_v26 }
 0x198   : > { %6086 = vmatprep.mubr.msk.f32.mxu0 %vm1093_vm1, %v7340_v27 }
 0x19b   : > { %6087 = vmatmul.mubr.msk.f32.gmra.mrb[36].mxu0 %vm1093_vm1, %v7344_v28 }
 0x19c   : > { %6089 = vmatprep.mubr.msk.f32.mxu0 %vm1093_vm1, %v7348_v18 }
 0x19f   : > { %6090 = vmatmul.mubr.msk.f32.gmra.mrb[38].mxu0 %vm1093_vm1, %v1865_v34 }
 0x1a0   : > { %6094 = vmatprep.mubr.msk.f32.mxu0 %vm1093_vm1, %v7294_v14 }
 0x1a3   : > { %6095 = vmatmul.mubr.msk.f32.vlgmr.msra.gmra.mrb[32].mxu0 %vm1093_vm1, %v7301_v15 }
 0x1a4   : > { %6097 = vmatprep.mubr.msk.f32.mxu0 %vm1093_vm1, %v7305_v16  ;;  %6107 = vmatpush3.msk.msra.mxu0 %vm1167_vm0, %v5414_v25 }
 0x1a5   : > { %6120 = vmatprep.subr.msk.mxu0 %vm1167_vm0, %v5424_v35 }
 0x1a7   : > { %6098 = vmatmul.mubr.msk.f32.gmra.mrb[34].mxu0 %vm1093_vm1, %v7309_v17 }
 0x1a8   : > { %6100 = vmatprep.mubr.msk.f32.mxu0 %vm1093_vm1, %v7313_v19 }
 0x1ab   : > { %6101 = vmatmul.mubr.msk.f32.gmra.mrb[36].mxu0 %vm1093_vm1, %v7317_v11 }
 0x1ac   : > { %6103 = vmatprep.mubr.msk.f32.mxu0 %vm1093_vm1, %v1565_v31  ;;  %v2661_v31 = vld [vmem:[%s8380_s2 + $0x40] sm:$0xff] }
 0x1af   : > { %6104 = vmatmul.mubr.msk.f32.gmra.mrb[38].mxu0 %vm1093_vm1, %v2016_v36  ;;  %v2677_v36 = vld [vmem:[%s8380_s2 + $0xc0] sm:$0xff] }
 0x1b0   : > { %6108 = vmatprep.mubr.msk.f32.mxu0 %vm1093_vm1, %v7250_v38  ;;  %v2316_v38 = vld [vmem:[#allocation2 + $0x92] sm:$0xff] }
 0x1b3   : > { %6109 = vmatmul.mubr.msk.f32.vlgmr.msra.gmra.mrb[32].mxu0 %vm1093_vm1, %v7256_v47 }
 0x1b4   : > { %6111 = vmatprep.mubr.msk.f32.mxu0 %vm1093_vm1, %v7262_v56  ;;  %6121 = vmatpush3.msk.msra.mxu0 %vm1167_vm0, %v5424_v35  ;;  %v2669_v35 = vld [vmem:[%s8380_s2 + $0x80] sm:$0xff] }
 0x1b7   : > { %6112 = vmatmul.mubr.msk.f32.gmra.mrb[34].mxu0 %vm1093_vm1, %v7268_v2 }
 0x1b8   : > { %6114 = vmatprep.mubr.msk.f32.mxu0 %vm1093_vm1, %v7274_v6 }
 0x1bb   : > { %6115 = vmatmul.mubr.msk.f32.gmra.mrb[36].mxu0 %vm1093_vm1, %v7279_v8 }
 0x1bc   : > { %6117 = vmatprep.mubr.msk.f32.mxu0 %vm1093_vm1, %v1715_v29  ;;  %v2678_v29 = vld [vmem:[%s8380_s2 + $0xc8] sm:$0xff] }
 0x1bf   : > { %6118 = vmatmul.mubr.msk.f32.gmra.mrb[38].mxu0 %vm1093_vm1, %v2166_v37  ;;  %v2686_v37 = vld [vmem:[%s8380_s2 + $0x108] sm:$0xff] }
 0x1c0   : > { %6122 = vmatprep.mubr.msk.f32.mxu0 %vm1093_vm1, %v7326_v23 }
 0x1c3   : > { %6123 = vmatmul.mubr.msk.f32.vlgmr.msra.gmra.mrb[32].mxu0 %vm1093_vm1, %v7332_v24 }
 0x1c4   : > { %6125 = vmatprep.mubr.msk.f32.mxu0 %vm1093_vm1, %v7336_v26 }
 0x1c7   : > { %6126 = vmatmul.mubr.msk.f32.gmra.mrb[34].mxu0 %vm1093_vm1, %v7340_v27  ;;  %v2654_v27 = vld [vmem:[%s8380_s2 + $0x8] sm:$0xff] }
 0x1c8   : > { %6128 = vmatprep.mubr.msk.f32.mxu0 %vm1093_vm1, %v7344_v28  ;;  %v2662_v28 = vld [vmem:[%s8380_s2 + $0x48] sm:$0xff] }
 0x1c9   : > { %v6408_v30 = vpack.c.bf16 %v2662_v28, %v2654_v27 }
 0x1cb   : > { %6129 = vmatmul.mubr.msk.f32.gmra.mrb[36].mxu0 %vm1093_vm1, %v7348_v18  ;;  %v2653_v18 = vld [vmem:[%s8380_s2] sm:$0xff]  ;;  %6409 = vmatprep.subr.bf16.mxu1 %v6408_v30 }
 0x1cc   : > { %6131 = vmatprep.mubr.msk.f32.mxu0 %vm1093_vm1, %v1865_v34  ;;  %v6410_v25 = vpack.c.bf16 %v2661_v31, %v2653_v18  ;;  %v6412_v34 = vpack.c.bf16 %v2678_v29, %v2670_v33  ;;  %v2655_v31 = vld [vmem:[%s8380_s2 + $0x10] sm:$0xff]  ;;  %v2672_v29 = vld [vmem:[%s8380_s2 + $0x98] sm:$0xff] }
 0x1cd   : > { %v2663_v33 = vld [vmem:[%s8380_s2 + $0x50] sm:$0xff] }
 0x1cf   : > { %6132 = vmatmul.mubr.msk.f32.gmra.mrb[38].mxu0 %vm1093_vm1, %v2316_v38  ;;  %v2694_v38 = vld [vmem:[%s8380_s2 + $0x148] sm:$0xff] }
 0x1d0   : > { %4626 = vmatprep.mubr.f32.mxu0 %v6761_v1 }
 0x296   : > { %v6124_v40 = vpop.f32.mrb[32].mxu0 }
 0x297   : > { %v2467_v41 = vadd.f32 %v6124_v40, %v5434_v32  ;;  %v2412_v42 = vpop.f32.mrb[33].mxu0  ;;  %v6416_v40 = vpack.c.bf16 %v2694_v38, %v2686_v37  ;;  %v2679_v37 = vld [vmem:[%s8380_s2 + $0xd0] sm:$0xff] }
 0x298   : > { %v2466_v3 = vadd.f32 %v5434_v32, %v2412_v42  ;;  %v2693_v42 = vld [vmem:[%s8380_s2 + $0x140] sm:$0xff] }
 0x299   : > { %v2475_v45 = vmax.f32 %v2467_v41, 0.0  ;;  %v2685_v41 = vld [vmem:[%s8380_s2 + $0x100] sm:$0xff] }
 0x29a   : > { %v2474_v43 = vmax.f32 %v2466_v3, 0.0  ;;  %v6127_v44 = vpop.f32.mrb[34].mxu0  ;;  %v2702_v3 = vld [vmem:[%s8380_s2 + $0x188] sm:$0xff] }
 0x29b   : > { %v2469_v47 = vadd.f32 %v6127_v44, %v5434_v32  ;;  %v2422_v48 = vpop.f32.mrb[35].mxu0  ;;  %v6418_v44 = vpack.c.bf16 %v2693_v42, %v2685_v41 }
 0x29c   : > { %v2468_v49 = vadd.f32 %v5434_v32, %v2422_v48  ;;  %6138 = vmatprep.mubr.msk.f32.mxu1 %vm2491_vm3, %v2474_v43  ;;  %v2710_v43 = vld [vmem:[%s8380_s2 + $0x1c8] sm:$0xff]  ;;  %v2709_v48 = vld [vmem:[%s8380_s2 + $0x1c0] sm:$0xff] }
 0x29d   : > { %6139 = vmatmul.mubr.msk.f32.vlgmr.msra.gmra.mrb[32].mxu1 %vm2491_vm3, %v2475_v45  ;;  %v2477_v51 = vmax.f32 %v2469_v47, 0.0  ;;  %v6420_v45 = vpack.c.bf16 %v2710_v43, %v2702_v3  ;;  %v2701_v47 = vld [vmem:[%s8380_s2 + $0x180] sm:$0xff]  ;;  %v2687_v3 = vld [vmem:[%s8380_s2 + $0x110] sm:$0xff] }
 0x29e   : > { %v2476_v50 = vmax.f32 %v2468_v49, 0.0  ;;  %v6130_v39 = vpop.f32.mrb[36].mxu0  ;;  %6411 = vmatpush1.bf16.msra.mxu1 %v6410_v25  ;;  %v2656_v49 = vld [vmem:[%s8380_s2 + $0x18] sm:$0xff]  ;;  %v2695_v43 = vld [vmem:[%s8380_s2 + $0x150] sm:$0xff] }
 0x29f   : > { %v2471_v52 = vadd.f32 %v6130_v39, %v5434_v32  ;;  %v2432_v54 = vpop.f32.mrb[37].mxu0  ;;  %6413 = vmatprep.subr.bf16.mxu1 %v6412_v34  ;;  %v6422_v39 = vpack.c.bf16 %v2709_v48, %v2701_v47  ;;  %v2680_v25 = vld [vmem:[%s8380_s2 + $0xd8] sm:$0xff]  ;;  %v6426_v34 = vpack.c.bf16 %v2663_v33, %v2655_v31  ;;  %v6434_v47 = vpack.c.bf16 %v2695_v43, %v2687_v3  ;;  %v2675_v31 = vld [vmem:[%s8380_s2 + $0xb0] sm:$0xff] }
 0x2a0   : > { %v2470_v55 = vadd.f32 %v5434_v32, %v2432_v54  ;;  %6141 = vmatprep.mubr.msk.f32.mxu1 %vm2491_vm3, %v2476_v50  ;;  %v2664_v50 = vld [vmem:[%s8380_s2 + $0x58] sm:$0xff]  ;;  %v2683_v33 = vld [vmem:[%s8380_s2 + $0xf0] sm:$0xff] }
 0x2a1   : > { %6142 = vmatmul.mubr.msk.f32.gmra.mrb[34].mxu1 %vm2491_vm3, %v2477_v51  ;;  %v2479_v58 = vmax.f32 %v2471_v52, 0.0  ;;  %v6424_v51 = vpack.c.bf16 %v2664_v50, %v2656_v49  ;;  %v2703_v49 = vld [vmem:[%s8380_s2 + $0x190] sm:$0xff] }
 0x2a2   : > { %v2478_v56 = vmax.f32 %v2470_v55, 0.0  ;;  %v6133_v57 = vpop.f32.mrb[38].mxu0  ;;  %v2711_v50 = vld [vmem:[%s8380_s2 + $0x1d0] sm:$0xff] }
 0x2a3   : > { %v2473_v59 = vadd.f32 %v6133_v57, %v5434_v32  ;;  %v2442_v46 = vpop.f32.mrb[39].mxu0  ;;  %v2707_v3 = vld [vmem:[%s8380_s2 + $0x1b0] sm:$0xff] }
 0x2a4   : > { %v2472_v61 = vadd.f32 %v5434_v32, %v2442_v46  ;;  %6144 = vmatprep.mubr.msk.f32.mxu1 %vm2491_vm3, %v2478_v56  ;;  %v6414_v32 = vpack.c.bf16 %v2677_v36, %v2669_v35  ;;  %v6428_v35 = vpack.c.bf16 %v2680_v25, %v2672_v29  ;;  %v2671_v36 = vld [vmem:[%s8380_s2 + $0x90] sm:$0xff]  ;;  %v2692_v29 = vld [vmem:[%s8380_s2 + $0x138] sm:$0xff] }
 0x2a5   : > { %6145 = vmatmul.mubr.msk.f32.gmra.mrb[36].mxu1 %vm2491_vm3, %v2479_v58  ;;  %v2481_v63 = vmax.f32 %v2473_v59, 0.0  ;;  %v6430_v41 = vpack.c.bf16 %v2679_v37, %v2671_v36  ;;  %v2700_v25 = vld [vmem:[%s8380_s2 + $0x178] sm:$0xff]  ;;  %v2691_v36 = vld [vmem:[%s8380_s2 + $0x130] sm:$0xff] }
 0x2a6   : > { %v2480_v62 = vmax.f32 %v2472_v61, 0.0  ;;  %6415 = vmatpush1.bf16.msra.mxu1 %v6414_v32  ;;  %v2688_v32 = vld [vmem:[%s8380_s2 + $0x118] sm:$0xff]  ;;  %v2699_v37 = vld [vmem:[%s8380_s2 + $0x170] sm:$0xff] }
 0x2a7   : > { %6417 = vmatprep.subr.bf16.mxu1 %v6416_v40  ;;  %v2696_v40 = vld [vmem:[%s8380_s2 + $0x158] sm:$0xff]  ;;  %v2715_v43 = vld [vmem:[%s8380_s2 + $0x1f0] sm:$0xff] }
 0x2a8   : > { %6147 = vmatprep.mubr.msk.f32.mxu1 %vm2491_vm3, %v2480_v62  ;;  %v6432_v42 = vpack.c.bf16 %v2696_v40, %v2688_v32  ;;  %v2708_v32 = vld [vmem:[%s8380_s2 + $0x1b8] sm:$0xff] }
 0x2a9   : > { %6148 = vmatmul.mubr.msk.f32.gmra.mrb[38].mxu1 %vm2491_vm3, %v2481_v63  ;;  %v2716_v40 = vld [vmem:[%s8380_s2 + $0x1f8] sm:$0xff] }
 0x2aa   : > { %2785 = vmatprep.mubr.f32.mxu1 %v6761_v1  ;;  %6419 = vmatpush1.bf16.msra.mxu1 %v6418_v44  ;;  %v2704_v44 = vld [vmem:[%s8380_s2 + $0x198] sm:$0xff] }
 0x2ab   : > { %6421 = vmatprep.subr.bf16.mxu1 %v6420_v45  ;;  %v2712_v45 = vld [vmem:[%s8380_s2 + $0x1d8] sm:$0xff] }
 0x2ac   : > { %v6436_v48 = vpack.c.bf16 %v2712_v45, %v2704_v44  ;;  %v6470_v44 = vpack.c.bf16 %v2715_v43, %v2707_v3  ;;  %v5448_v45 = vld [vmem:[%s8385_s7 + $0x4] sm:$0xf] }
 0x2ad   : > { %v3436_v43 = vld [vmem:[#allocation3 + $0x6] sm:$0xff] }
 0x2ae   : > { %6423 = vmatpush1.bf16.msra.mxu1 %v6422_v39  ;;  %v2658_v39 = vld [vmem:[%s8380_s2 + $0x28] sm:$0xff] }
 0x2af   : > { %6425 = vmatprep.subr.bf16.mxu1 %v6424_v51  ;;  %v2666_v51 = vld [vmem:[%s8380_s2 + $0x68] sm:$0xff] }
 0x370   : > { %v6140_v2 = vpop.f32.mrb[32].mxu1 }
 0x371   : > { %v2582_v4 = vpop.f32.mrb[33].mxu1  ;;  %v7504_v53 = vadd.f32 %v6140_v2, %v5435_v0 }
 0x372   : > { %v7502_v5 = vadd.f32 %v5435_v0, %v2582_v4 }
 0x373   : > { %v3029_v13 = vsel %vm3025_vm4, %v7504_v53, -inf }
 0x374   : > { %v6143_v6 = vpop.f32.mrb[34].mxu1  ;;  %v3026_v7 = vsel %vm3025_vm4, %v7502_v5, -inf }
 0x375   : > { %v7508_v8 = vadd.f32 %v6143_v6, %v5435_v0  ;;  %3027 = vmax.xlane.f32.xlu0 %v3026_v7  ;;  %v2592_v60 = vpop.f32.mrb[35].mxu1 }
 0x376   : > { %v7510_v9 = vadd.f32 %v5435_v0, %v2592_v60 }
 0x377   : > { %v3035_v10 = vsel %vm3025_vm4, %v7508_v8, -inf }
 0x378   : > { %3036 = vmax.xlane.f32.xlu1 %v3035_v10  ;;  %v6146_v12 = vpop.f32.mrb[36].mxu1  ;;  %v3032_v17 = vsel %vm3025_vm4, %v7510_v9, -inf }
 0x379   : > { %3030 = vmax.xlane.f32.xlu0 %v3029_v13  ;;  %v2602_v14 = vpop.f32.mrb[37].mxu1  ;;  %v7518_v16 = vadd.f32 %v6146_v12, %v5435_v0 }
 0x37a   : > { %v7516_v15 = vadd.f32 %v5435_v0, %v2602_v14 }
 0x37b   : > { %v3041_v23 = vsel %vm3025_vm4, %v7518_v16, -inf }
 0x37c   : > { %3033 = vmax.xlane.f32.xlu1 %v3032_v17  ;;  %v6149_v19 = vpop.f32.mrb[38].mxu1  ;;  %v3038_v20 = vsel %vm3025_vm4, %v7516_v15, -inf }
 0x37d   : > { %3039 = vmax.xlane.f32.xlu0 %v3038_v20  ;;  %v2612_v11 = vpop.f32.mrb[39].mxu1  ;;  %v7526_v22 = vadd.f32 %v6149_v19, %v5435_v0 }
 0x37e   : > { %v7524_v21 = vadd.f32 %v5435_v0, %v2612_v11 }
 0x37f   : > { %v3047_v26 = vsel %vm3025_vm4, %v7526_v22, -inf }
 0x380   : > { %3042 = vmax.xlane.f32.xlu1 %v3041_v23  ;;  %v3044_v24 = vsel %vm3025_vm4, %v7524_v21, -inf }
 0x381   : > { %3045 = vmax.xlane.f32.xlu0 %v3044_v24 }
 0x384   : > { %3048 = vmax.xlane.f32.xlu1 %v3047_v26 }
 0x3b7   : > { %2621 = vxpose.xlu1.b32.start [1/8] (short) (narrow) %v7502_v5, 8 }
 0x3bb   : > { %2622 = vxpose.xlu1.b32.cont [2/8] (short) (narrow) %v7504_v53, 8 }
 0x3bf   : > { %2623 = vxpose.xlu1.b32.cont [3/8] (short) (narrow) %v7510_v9, 8 }
 0x3c3   : > { %2624 = vxpose.xlu1.b32.cont [4/8] (short) (narrow) %v7508_v8, 8 }
 0x3c7   : > { %2625 = vxpose.xlu1.b32.cont [5/8] (short) (narrow) %v7516_v15, 8 }
 0x3cb   : > { %2626 = vxpose.xlu1.b32.cont [6/8] (short) (narrow) %v7518_v16, 8 }
 0x3cf   : > { %2627 = vxpose.xlu1.b32.cont [7/8] (short) (narrow) %v7524_v21, 8 }
 0x3d3   : > { %2628 = vxpose.xlu1.b32.end [8/8] (short) (narrow) %v7526_v22, 8 }
 0x402   : > { %v3028_v52 = vpop.xlane.xlu0 %3027 }
 0x403   : > { %v3050_v54 = vsub.f32 %v7502_v5, %v3028_v52  ;;  %v6438_v52 = vpack.c.bf16 %v2711_v50, %v2703_v49  ;;  %v3162_v49 = vld [vmem:[#allocation3 + $0x13] sm:$0xff]  ;;  %v3163_v50 = vld [vmem:[#allocation3 + $0x23] sm:$0xff] }
 0x405   : > { %v3037_v55 = vpop.xlane.xlu1 %3036  ;;  %v3058_v58 = vmul.f32 1.442695, %v3050_v54  ;;  %v6440_v54 = vpack.c.bf16 %v2666_v51, %v2658_v39  ;;  %v7814_v39 = vld [vmem:[%s8385_s7 + $0x8] sm:$0xf] }
 0x406   : > { %v3031_v56 = vpop.xlane.xlu0 %3030  ;;  %v3053_v59 = vsub.f32 %v7508_v8, %v3037_v55  ;;  %v2657_v55 = vld [vmem:[%s8380_s2 + $0x20] sm:$0xff] }
 0x407   : > { %v3051_v57 = vsub.f32 %v7504_v53, %v3031_v56  ;;  %v2665_v56 = vld [vmem:[%s8380_s2 + $0x60] sm:$0xff] }
 0x408   : > { %v3064_v62 = vmul.f32 1.442695, %v3053_v59  ;;  %v6442_v59 = vpack.c.bf16 %v2665_v56, %v2657_v55 }
 0x409   : > { %v3060_v46 = vmul.f32 1.442695, %v3051_v57  ;;  %v3034_v61 = vpop.xlane.xlu1 %3033  ;;  %v2674_v57 = vld [vmem:[%s8380_s2 + $0xa8] sm:$0xff] }
 0x40a   : > { %v3052_v63 = vsub.f32 %v7510_v9, %v3034_v61  ;;  %v3040_v0 = vpop.xlane.xlu0 %3039  ;;  %v2673_v61 = vld [vmem:[%s8380_s2 + $0xa0] sm:$0xff] }
 0x40b   : > { %6721 = vpow2.f32 %v3060_v46  ;;  %v3054_v4 = vsub.f32 %v7516_v15, %v3040_v0  ;;  %v2698_v0 = vld [vmem:[%s8380_s2 + $0x168] sm:$0xff] }
 0x40c   : > { %6723 = vpow2.f32 %v3058_v58  ;;  %v3062_v2 = vmul.f32 1.442695, %v3052_v63  ;;  %v2682_v58 = vld [vmem:[%s8380_s2 + $0xe8] sm:$0xff] }
 0x40d   : > { %6725 = vpow2.f32 %v3064_v62  ;;  %v3043_v5 = vpop.xlane.xlu1 %3042  ;;  %v3066_v53 = vmul.f32 1.442695, %v3054_v4  ;;  %v6444_v46 = vpack.c.bf16 %v2682_v58, %v2674_v57  ;;  %v2681_v62 = vld [vmem:[%s8380_s2 + $0xe0] sm:$0xff]  ;;  %v2690_v63 = vld [vmem:[%s8380_s2 + $0x128] sm:$0xff] }
 0x40e   : > { %6727 = vpow2.f32 %v3062_v2  ;;  %v3055_v7 = vsub.f32 %v7518_v16, %v3043_v5  ;;  %v3046_v8 = vpop.xlane.xlu0 %3045  ;;  %v6446_v2 = vpack.c.bf16 %v2681_v62, %v2673_v61  ;;  %v6448_v4 = vpack.c.bf16 %v2698_v0, %v2690_v63  ;;  %v2689_v5 = vld [vmem:[%s8380_s2 + $0x120] sm:$0xff] }
 0x40f   : > { %6729 = vpow2.f32 %v3066_v53  ;;  %v3056_v12 = vsub.f32 %v7524_v21, %v3046_v8  ;;  %v2697_v53 = vld [vmem:[%s8380_s2 + $0x160] sm:$0xff]  ;;  %v2714_v8 = vld [vmem:[%s8380_s2 + $0x1e8] sm:$0xff] }
 0x410   : > { %v3068_v9 = vmul.f32 1.442695, %v3055_v7  ;;  %v2706_v7 = vld [vmem:[%s8380_s2 + $0x1a8] sm:$0xff] }
 0x411   : > { %v3049_v13 = vpop.xlane.xlu1 %3048  ;;  %v3070_v16 = vmul.f32 1.442695, %v3056_v12  ;;  %v2705_v12 = vld [vmem:[%s8380_s2 + $0x1a0] sm:$0xff] }
 0x412   : > { %6731 = vpow2.f32 %v3068_v9  ;;  %v3057_v17 = vsub.f32 %v7526_v22, %v3049_v13  ;;  %v6452_v9 = vpack.c.bf16 %v2714_v8, %v2706_v7  ;;  %v2713_v13 = vld [vmem:[%s8380_s2 + $0x1e0] sm:$0xff] }
 0x413   : > { %6733 = vpow2.f32 %v3070_v16  ;;  %v2668_v16 = vld [vmem:[%s8380_s2 + $0x78] sm:$0xff] }
 0x414   : > { %v3072_v11 = vmul.f32 1.442695, %v3057_v17  ;;  %v6454_v17 = vpack.c.bf16 %v2713_v13, %v2705_v12  ;;  %v3153_v13 = vld [vmem:[#allocation3 + $0x10] sm:$0xff] }
 0x415   : > { %v7615_v6 = vpop.eup %6721 }
 0x416   : > { %v3077_v60 = vsel %vm3025_vm4, %v7615_v6, 0.0  ;;  %v7620_v10 = vpop.eup %6723  ;;  %6735 = vpow2.f32 %v3072_v11  ;;  %v2659_v11 = vld [vmem:[%s8380_s2 + $0x30] sm:$0xff] }
 0x417   : > { %3078 = vadd.xlane.f32.xlu0 %v3077_v60  ;;  %v3074_v14 = vsel %vm3025_vm4, %v7620_v10, 0.0  ;;  %v7625_v15 = vpop.eup %6725  ;;  %v6450_v60 = vpack.c.bf16 %v2697_v53, %v2689_v5 }
 0x418   : > { %v3083_v19 = vsel %vm3025_vm4, %v7625_v15, 0.0  ;;  %v7630_v20 = vpop.eup %6727 }
 0x419   : > { %v3080_v21 = vsel %vm3025_vm4, %v7630_v20, 0.0  ;;  %v7634_v23 = vpop.eup %6729 }
 0x41a   : > { %v3086_v24 = vsel %vm3025_vm4, %v7634_v23, 0.0 }
 0x41b   : > { %3075 = vadd.xlane.f32.xlu0 %v3074_v14  ;;  %v2660_v14 = vld [vmem:[%s8380_s2 + $0x38] sm:$0xff] }
 0x41c   : > { %v7638_v26 = vpop.eup %6731 }
 0x41d   : > { %v3089_v22 = vsel %vm3025_vm4, %v7638_v26, 0.0  ;;  %v7642_v27 = vpop.eup %6733 }
 0x41e   : > { %v3092_v28 = vsel %vm3025_vm4, %v7642_v27, 0.0 }
 0x41f   : > { %3084 = vadd.xlane.f32.xlu0 %v3083_v19  ;;  %v6456_v19 = vpack.c.bf16 %v2668_v16, %v2660_v14  ;;  %v4511_v14 = vld [vmem:[%s8387_s9 + $0x8] sm:$0xff]  ;;  %v4513_v16 = vld [vmem:[%s8387_s9 + $0x18] sm:$0xff] }
 0x420   : > { %v7646_v18 = vpop.eup %6735 }
 0x421   : > { %v3095_v30 = vsel %vm3025_vm4, %v7646_v18, 0.0 }
 0x423   : > { %3081 = vadd.xlane.f32.xlu0 %v3080_v21  ;;  %v2667_v21 = vld [vmem:[%s8380_s2 + $0x70] sm:$0xff] }
 0x427   : > { %3087 = vadd.xlane.f32.xlu0 %v3086_v24  ;;  %v2676_v24 = vld [vmem:[%s8380_s2 + $0xb8] sm:$0xff] }
 0x42b   : > { %3090 = vadd.xlane.f32.xlu0 %v3089_v22  ;;  %v2684_v22 = vld [vmem:[%s8380_s2 + $0xf8] sm:$0xff] }
 0x42f   : > { %3093 = vadd.xlane.f32.xlu0 %v3092_v28  ;;  %v6458_v28 = vpack.c.bf16 %v2667_v21, %v2659_v11  ;;  %v4512_v11 = vld [vmem:[%s8387_s9 + $0x10] sm:$0xff]  ;;  %v4515_v21 = vld [vmem:[%s8387_s9 + $0x28] sm:$0xff] }
 0x433   : > { %3096 = vadd.xlane.f32.xlu0 %v3095_v30  ;;  %v6460_v30 = vpack.c.bf16 %v2684_v22, %v2676_v24  ;;  %v4517_v24 = vld [vmem:[%s8387_s9 + $0x38] sm:$0xff] }
 0x437   : > { %v7668_v38 = vpop.trf.xlu1 }
 0x438   : > { %5444 = vmatmul.mubr.msk.f32.vlgmr.msra.gmra.mrb[40].mxu1 %vm2717_vm6, %v7668_v38 }
 0x439   : > { %6427 = vmatpush1.bf16.msra.mxu1 %v6426_v34  ;;  %2856 = vmatprep.mubr.f32.mxu1 %v6761_v1  ;;  %v6462_v34 = vpack.c.bf16 %v2683_v33, %v2675_v31  ;;  %v4514_v31 = vld [vmem:[%s8387_s9 + $0x20] sm:$0xff]  ;;  %v4516_v33 = vld [vmem:[%s8387_s9 + $0x30] sm:$0xff] }
 0x43a   : > { %6429 = vmatprep.subr.bf16.mxu1 %v6428_v35  ;;  %v6464_v35 = vpack.c.bf16 %v2700_v25, %v2692_v29  ;;  %v4519_v29 = vld [vmem:[%s8387_s9 + $0x48] sm:$0xff] }
 0x43b   : > { %v5477_v25 = vld [vmem:[%s8385_s7 + $0xc] sm:$0xf] }
 0x43d   : > { %6431 = vmatpush1.bf16.msra.mxu1 %v6430_v41  ;;  %v6466_v41 = vpack.c.bf16 %v2699_v37, %v2691_v36  ;;  %v4518_v36 = vld [vmem:[%s8387_s9 + $0x40] sm:$0xff]  ;;  %v4520_v37 = vld [vmem:[%s8387_s9 + $0x50] sm:$0xff] }
 0x43e   : > { %6433 = vmatprep.subr.bf16.mxu1 %v6432_v42  ;;  %v6468_v42 = vpack.c.bf16 %v2716_v40, %v2708_v32 }
 0x441   : > { %6435 = vmatpush1.bf16.msra.mxu1 %v6434_v47  ;;  %v3161_v47 = vld [vmem:[#allocation3 + $0x3] sm:$0xff] }
 0x442   : > { %6437 = vmatprep.subr.bf16.mxu1 %v6436_v48  ;;  %v3160_v48 = vld [vmem:[%s8385_s7] sm:$0xf] }
 0x445   : > { %6439 = vmatpush1.bf16.msra.mxu1 %v6438_v52 }
 0x446   : > { %6441 = vmatprep.subr.bf16.mxu1 %v6440_v54 }
 0x448   : > { %5445 = vmatmul.mubr.msk.f32.vlgmr.msra.gmra.mrb[42].mxu1 %vm2717_vm6, %v7668_v38 }
 0x449   : > { %6443 = vmatpush1.bf16.msra.mxu1 %v6442_v59  ;;  %2927 = vmatprep.mubr.f32.mxu1 %v6761_v1 }
 0x44a   : > { %6445 = vmatprep.subr.bf16.mxu1 %v6444_v46 }
 0x44d   : > { %6447 = vmatpush1.bf16.msra.mxu1 %v6446_v2 }
 0x44e   : > { %6449 = vmatprep.subr.bf16.mxu1 %v6448_v4 }
 0x451   : > { %6451 = vmatpush1.bf16.msra.mxu1 %v6450_v60 }
 0x452   : > { %6453 = vmatprep.subr.bf16.mxu1 %v6452_v9  ;;  %v3152_v9 = vld [vmem:[#allocation3] sm:$0xff] }
 0x455   : > { %6455 = vmatpush1.bf16.msra.mxu1 %v6454_v17 }
 0x456   : > { %6457 = vmatprep.subr.bf16.mxu1 %v6456_v19  ;;  %v6472_v19 = vpack.c.bf16 %v4513_v16, %v4511_v14  ;;  %v4193_v14 = vld [vmem:[#allocation3 + $0xc3] sm:$0xff] }
 0x458   : > { %5446 = vmatmul.mubr.msk.f32.vlgmr.msra.gmra.mrb[44].mxu1 %vm2717_vm6, %v7668_v38  ;;  %6473 = vmatprep.subr.bf16.mxu0 %v6472_v19  ;;  %v4343_v19 = vld [vmem:[#allocation3 + $0xc6] sm:$0xff] }
 0x459   : > { %6459 = vmatpush1.bf16.msra.mxu1 %v6458_v28  ;;  %2998 = vmatprep.mubr.f32.mxu1 %v6761_v1 }
 0x45a   : > { %6461 = vmatprep.subr.bf16.mxu1 %v6460_v30  ;;  %v6476_v30 = vpack.c.bf16 %v4517_v24, %v4515_v21  ;;  %v4523_v21 = vld [vmem:[%s8387_s9 + $0x68] sm:$0xff]  ;;  %v4525_v24 = vld [vmem:[%s8387_s9 + $0x78] sm:$0xff] }
 0x45d   : > { %6463 = vmatpush1.bf16.msra.mxu1 %v6462_v34  ;;  %v4521_v34 = vld [vmem:[%s8387_s9 + $0x58] sm:$0xff] }
 0x45e   : > { %6465 = vmatprep.subr.bf16.mxu1 %v6464_v35  ;;  %v6480_v35 = vpack.c.bf16 %v4521_v34, %v4519_v29  ;;  %v4708_v29 = vld [vmem:[%s8389_s11 + $0x88] sm:$0xff] }
 0x461   : > { %6467 = vmatpush1.bf16.msra.mxu1 %v6466_v41  ;;  %v6482_v41 = vpack.c.bf16 %v4520_v37, %v4518_v36  ;;  %v4692_v36 = vld [vmem:[%s8389_s11 + $0x8] sm:$0xff] }
 0x462   : > { %6469 = vmatprep.subr.bf16.mxu1 %v6468_v42 }
 0x465   : > { %6471 = vmatpush1.bf16.msra.mxu1 %v6470_v44 }
 0x466   : > { %6150 = vmatprep.subr.msk.mxu1 %vm3195_vm7, %v5448_v45 }
 0x468   : > { %5447 = vmatmul.mubr.msk.f32.vlgmr.msra.gmra.mrb[46].mxu1 %vm2717_vm6, %v7668_v38 }
 0x469   : > { %6151 = vmatpush3.msk.msra.mxu1 %vm3195_vm7, %v5448_v45  ;;  %6152 = vmatprep.mubr.msk.f32.mxu1 %vm3025_vm4, %v3161_v47  ;;  %v3437_v45 = vld [vmem:[#allocation3 + $0x16] sm:$0xff]  ;;  %v3438_v47 = vld [vmem:[#allocation3 + $0x26] sm:$0xff] }
 0x46a   : > { %6164 = vmatprep.subr.msk.mxu1 %vm3195_vm7, %v3160_v48 }
 0x46c   : > { %6153 = vmatmul.mubr.msk.f32.vlgmr.msra.gmra.mrb[48].mxu1 %vm3025_vm4, %v3162_v49 }
 0x46d   : > { %6155 = vmatprep.mubr.msk.f32.mxu1 %vm3025_vm4, %v3163_v50  ;;  %6165 = vmatpush3.msk.msra.mxu1 %vm3195_vm7, %v3160_v48  ;;  %v5487_v48 = vld [vmem:[%s8385_s7 + $0x10] sm:$0xf] }
 0x46e   : > { %6178 = vmatprep.subr.msk.mxu1 %vm3195_vm7, %v7814_v39 }
 0x4a4   : > { %v3079_v38 = vpop.xlane.xlu0 %3078 }
 0x4a5   : > { %6737 = vrcp.f32 %v3079_v38 }
 0x4a8   : > { %v3076_v51 = vpop.xlane.xlu0 %3075 }
 0x4a9   : > { %6739 = vrcp.f32 %v3076_v51 }
 0x4ac   : > { %v3085_v52 = vpop.xlane.xlu0 %3084 }
 0x4ad   : > { %6741 = vrcp.f32 %v3085_v52  ;;  %v5497_v52 = vld [vmem:[%s8385_s7 + $0x14] sm:$0xf] }
 0x4af   : > { %v6738_v54 = vpop.eup %6737 }
 0x4b0   : > { %v3101_v55 = vmul.f32 %v6738_v54, %v7615_v6  ;;  %v3082_v56 = vpop.xlane.xlu0 %3081 }
 0x4b1   : > { %6743 = vrcp.f32 %v3082_v56 }
 0x4b2   : > { %3145 = vst.msk [vmem:[#allocation3 + $0x43] sm:$0xff] %vm3025_vm4, %v3101_v55 }
 0x4b3   : > { %v6740_v57 = vpop.eup %6739 }
 0x4b4   : > { %v3099_v58 = vmul.f32 %v6740_v57, %v7620_v10  ;;  %v3088_v59 = vpop.xlane.xlu0 %3087  ;;  %v5507_v57 = vld [vmem:[%s8385_s7 + $0x18] sm:$0xf] }
 0x4b5   : > { %6745 = vrcp.f32 %v3088_v59 }
 0x4b6   : > { %3144 = vst.msk [vmem:[#allocation3 + $0x33] sm:$0xff] %vm3025_vm4, %v3099_v58 }
 0x4b7   : > { %v6742_v46 = vpop.eup %6741 }
 0x4b8   : > { %v3105_v61 = vmul.f32 %v6742_v46, %v7625_v15  ;;  %v3091_v62 = vpop.xlane.xlu0 %3090 }
 0x4b9   : > { %6747 = vrcp.f32 %v3091_v62  ;;  %v7833_v10 = vld [vmem:[#allocation3 + $0x43] sm:$0xff] }
 0x4ba   : > { %3147 = vst.msk [vmem:[#allocation3 + $0x63] sm:$0xff] %vm3025_vm4, %v3105_v61  ;;  %v3156_v40 = vld [vmem:[#allocation3 + $0x40] sm:$0xff] }
 0x4bb   : > { %v6744_v63 = vpop.eup %6743  ;;  %v3440_v50 = vld [vmem:[#allocation3 + $0x46] sm:$0xff] }
 0x4bc   : > { %v3103_v6 = vmul.f32 %v6744_v63, %v7630_v20  ;;  %v3094_v0 = vpop.xlane.xlu0 %3093  ;;  %v5517_v63 = vld [vmem:[%s8385_s7 + $0x1c] sm:$0xf] }
 0x4bd   : > { %6749 = vrcp.f32 %v3094_v0  ;;  %v7828_v2 = vld [vmem:[#allocation3 + $0x33] sm:$0xff] }
 0x4be   : > { %3146 = vst.msk [vmem:[#allocation3 + $0x53] sm:$0xff] %vm3025_vm4, %v3103_v6  ;;  %6156 = vmatmul.mubr.msk.f32.gmra.mrb[50].mxu1 %vm3025_vm4, %v7828_v2  ;;  %v3155_v32 = vld [vmem:[#allocation3 + $0x30] sm:$0xff] }
 0x4bf   : > { %v6746_v4 = vpop.eup %6745  ;;  %6158 = vmatprep.mubr.msk.f32.mxu1 %vm3025_vm4, %v7833_v10  ;;  %v3439_v49 = vld [vmem:[#allocation3 + $0x36] sm:$0xff] }
 0x4c0   : > { %v3107_v15 = vmul.f32 %v6746_v4, %v7634_v23  ;;  %v3097_v5 = vpop.xlane.xlu0 %3096 }
 0x4c1   : > { %6751 = vrcp.f32 %v3097_v5  ;;  %v7845_v8 = vld [vmem:[#allocation3 + $0x63] sm:$0xff] }
 0x4c2   : > { %3148 = vst.msk [vmem:[#allocation3 + $0x73] sm:$0xff] %vm3025_vm4, %v3107_v15  ;;  %v7905_v3 = vld [vmem:[#allocation3 + $0x60] sm:$0xff] }
 0x4c3   : > { %v6748_v20 = vpop.eup %6747  ;;  %v7924_v38 = vld [vmem:[#allocation3 + $0x66] sm:$0xff]  ;;  %v5527_v5 = vld [vmem:[%s8385_s7 + $0x20] sm:$0xf] }
 0x4c4   : > { %v3109_v53 = vmul.f32 %v6748_v20, %v7638_v26  ;;  %v3154_v26 = vld [vmem:[#allocation3 + $0x20] sm:$0xff] }
 0x4c5   : > { %v7840_v7 = vld [vmem:[#allocation3 + $0x53] sm:$0xff] }
 0x4c6   : > { %3149 = vst.msk [vmem:[#allocation3 + $0x83] sm:$0xff] %vm3025_vm4, %v3109_v53  ;;  %6159 = vmatmul.mubr.msk.f32.gmra.mrb[52].mxu1 %vm3025_vm4, %v7840_v7  ;;  %v3157_v42 = vld [vmem:[#allocation3 + $0x50] sm:$0xff] }
 0x4c7   : > { %v6750_v60 = vpop.eup %6749  ;;  %6161 = vmatprep.mubr.msk.f32.mxu1 %vm3025_vm4, %v7845_v8  ;;  %v4042_v53 = vld [vmem:[#allocation3 + $0xb0] sm:$0xff] }
 0x4c8   : > { %v3111_v23 = vmul.f32 %v6750_v60, %v7642_v27  ;;  %v4510_v27 = vld [vmem:[%s8387_s9] sm:$0xff]  ;;  %v4044_v60 = vld [vmem:[#allocation3 + $0xd0] sm:$0xff] }
 0x4c9   : > { %v7850_v12 = vld [vmem:[#allocation3 + $0x73] sm:$0xff]  ;;  %v6474_v28 = vpack.c.bf16 %v4512_v11, %v4510_v27 }
 0x4ca   : > { %3150 = vst.msk [vmem:[#allocation3 + $0x93] sm:$0xff] %vm3025_vm4, %v3111_v23  ;;  %6162 = vmatmul.mubr.msk.f32.gmra.mrb[54].mxu1 %vm3025_vm4, %v7850_v12  ;;  %v7909_v44 = vld [vmem:[#allocation3 + $0x70] sm:$0xff] }
 0x4cb   : > { %v6752_v17 = vpop.eup %6751  ;;  %6166 = vmatprep.mubr.msk.f32.mxu1 %vm3025_vm4, %v3152_v9  ;;  %6475 = vmatpush1.bf16.msra.mxu0 %v6474_v28  ;;  %v7928_v51 = vld [vmem:[#allocation3 + $0x76] sm:$0xff]  ;;  %v4522_v28 = vld [vmem:[%s8387_s9 + $0x60] sm:$0xff] }
 0x4cc   : > { %v3113_v22 = vmul.f32 %v6752_v17, %v7646_v18  ;;  %v6478_v18 = vpack.c.bf16 %v4516_v33, %v4514_v31  ;;  %6477 = vmatprep.subr.bf16.mxu0 %v6476_v30  ;;  %v4342_v17 = vld [vmem:[#allocation3 + $0xb6] sm:$0xff]  ;;  %v4707_v33 = vld [vmem:[%s8389_s11 + $0x80] sm:$0xff] }
 0x4cd   : > { %v3591_v54 = vld [vmem:[#allocation3 + $0x80] sm:$0xff]  ;;  %v4344_v11 = vld [vmem:[#allocation3 + $0xd6] sm:$0xff] }
 0x4ce   : > { %3151 = vst.msk [vmem:[#allocation3 + $0xa3] sm:$0xff] %vm3025_vm4, %v3113_v22  ;;  %6167 = vmatmul.mubr.msk.f32.vlgmr.msra.gmra.mrb[48].mxu1 %vm3025_vm4, %v3153_v13  ;;  %v3741_v58 = vld [vmem:[#allocation3 + $0x83] sm:$0xff]  ;;  %v6484_v22 = vpack.c.bf16 %v4525_v24, %v4523_v21  ;;  %v4524_v30 = vld [vmem:[%s8387_s9 + $0x70] sm:$0xff] }
 0x4cf   : > { %6179 = vmatpush3.msk.msra.mxu1 %vm3195_vm7, %v7814_v39  ;;  %6169 = vmatprep.mubr.msk.f32.mxu1 %vm3025_vm4, %v3154_v26  ;;  %v3441_v39 = vld [vmem:[#allocation3 + $0x56] sm:$0xff]  ;;  %v3891_v0 = vld [vmem:[#allocation3 + $0x86] sm:$0xff]  ;;  %v6486_v31 = vpack.c.bf16 %v4524_v30, %v4522_v28 }
 0x4d0   : > { %6192 = vmatprep.subr.msk.mxu1 %vm3195_vm7, %v5477_v25  ;;  %6479 = vmatpush1.bf16.msra.mxu0 %v6478_v18  ;;  %v4192_v26 = vld [vmem:[#allocation3 + $0xb3] sm:$0xff]  ;;  %v8050_v18 = vld [vmem:[%s8386_s8] ss:$0 sm:$0xff] }
 0x4d1   : > { %6481 = vmatprep.subr.bf16.mxu0 %v6480_v35  ;;  %v3592_v55 = vld [vmem:[#allocation3 + $0x90] sm:$0xff]  ;;  %v4691_v35 = vld [vmem:[%s8389_s11] sm:$0xff] }
 0x4d2   : > { %6170 = vmatmul.mubr.msk.f32.gmra.mrb[50].mxu1 %vm3025_vm4, %v3155_v32  ;;  %v3742_v59 = vld [vmem:[#allocation3 + $0x93] sm:$0xff] }
 0x4d3   : > { %6172 = vmatprep.mubr.msk.f32.mxu1 %vm3025_vm4, %v3156_v40 }
 0x4d4   : > { %6483 = vmatpush1.bf16.msra.mxu0 %v6482_v41 }
 0x4d5   : > { %v3593_v56 = vld [vmem:[#allocation3 + $0xa0] sm:$0xff]  ;;  %6485 = vmatprep.subr.bf16.mxu0 %v6484_v22 }
 0x4d6   : > { %6173 = vmatmul.mubr.msk.f32.gmra.mrb[52].mxu1 %vm3025_vm4, %v3157_v42  ;;  %v3743_v46 = vld [vmem:[#allocation3 + $0xa3] sm:$0xff] }
 0x4d7   : > { %6175 = vmatprep.mubr.msk.f32.mxu1 %vm3025_vm4, %v7905_v3 }
 0x4d8   : > { %6487 = vmatpush1.bf16.msra.mxu0 %v6486_v31 }
 0x4da   : > { %6176 = vmatmul.mubr.msk.f32.gmra.mrb[54].mxu1 %vm3025_vm4, %v7909_v44 }
 0x4db   : > { %6180 = vmatprep.mubr.msk.f32.mxu1 %vm3025_vm4, %v3436_v43 }
 0x4de   : > { %6181 = vmatmul.mubr.msk.f32.vlgmr.msra.gmra.mrb[48].mxu1 %vm3025_vm4, %v3437_v45 }
 0x4df   : > { %6193 = vmatpush3.msk.msra.mxu1 %vm3195_vm7, %v5477_v25  ;;  %6183 = vmatprep.mubr.msk.f32.mxu1 %vm3025_vm4, %v3438_v47  ;;  %v6488_v25 = vpack.c.bf16 %v4708_v29, %v4707_v33  ;;  %v4693_v47 = vld [vmem:[%s8389_s11 + $0x10] sm:$0xff]  ;;  %v4703_v29 = vld [vmem:[%s8389_s11 + $0x60] sm:$0xff] }
 0x4e0   : > { %6206 = vmatprep.subr.msk.mxu1 %vm3195_vm7, %v5487_v48 }
 0x4e1   : > { %6489 = vmatprep.subr.bf16.mxu0 %v6488_v25  ;;  %v4704_v25 = vld [vmem:[%s8389_s11 + $0x68] sm:$0xff] }
 0x4e2   : > { %6184 = vmatmul.mubr.msk.f32.gmra.mrb[50].mxu1 %vm3025_vm4, %v3439_v49 }
 0x4e3   : > { %6186 = vmatprep.mubr.msk.f32.mxu1 %vm3025_vm4, %v3440_v50 }
 0x4e6   : > { %6187 = vmatmul.mubr.msk.f32.gmra.mrb[52].mxu1 %vm3025_vm4, %v3441_v39 }
 0x4e7   : > { %6189 = vmatprep.mubr.msk.f32.mxu1 %vm3025_vm4, %v7924_v38 }
 0x4ea   : > { %6190 = vmatmul.mubr.msk.f32.gmra.mrb[54].mxu1 %vm3025_vm4, %v7928_v51 }
 0x4eb   : > { %6194 = vmatprep.mubr.msk.f32.mxu1 %vm3025_vm4, %v3155_v32  ;;  %v4709_v32 = vld [vmem:[%s8389_s11 + $0x90] sm:$0xff] }
 0x4ee   : > { %6195 = vmatmul.mubr.msk.f32.vlgmr.msra.gmra.mrb[48].mxu1 %vm3025_vm4, %v3156_v40  ;;  %v4710_v40 = vld [vmem:[%s8389_s11 + $0x98] sm:$0xff] }
 0x4ef   : > { %6197 = vmatprep.mubr.msk.f32.mxu1 %vm3025_vm4, %v3157_v42  ;;  %6207 = vmatpush3.msk.msra.mxu1 %vm3195_vm7, %v5487_v48  ;;  %v6490_v42 = vpack.c.bf16 %v4692_v36, %v4691_v35  ;;  %v6492_v45 = vpack.c.bf16 %v4710_v40, %v4709_v32  ;;  %v4694_v48 = vld [vmem:[%s8389_s11 + $0x18] sm:$0xff] }
 0x4f0   : > { %6220 = vmatprep.subr.msk.mxu1 %vm3195_vm7, %v5497_v52  ;;  %v4722_v35 = vld [vmem:[%s8389_s11 + $0xf8] sm:$0xff] }
 0x4f1   : > { %v4706_v32 = vld [vmem:[%s8389_s11 + $0x78] sm:$0xff] }
 0x4f2   : > { %6198 = vmatmul.mubr.msk.f32.gmra.mrb[50].mxu1 %vm3025_vm4, %v7905_v3 }
 0x4f3   : > { %6200 = vmatprep.mubr.msk.f32.mxu1 %vm3025_vm4, %v7909_v44 }
 0x4f6   : > { %6201 = vmatmul.mubr.msk.f32.gmra.mrb[52].mxu1 %vm3025_vm4, %v3591_v54 }
 0x4f7   : > { %6203 = vmatprep.mubr.msk.f32.mxu1 %vm3025_vm4, %v3592_v55 }
 0x4fa   : > { %6204 = vmatmul.mubr.msk.f32.gmra.mrb[54].mxu1 %vm3025_vm4, %v3593_v56 }
 0x4fb   : > { %6208 = vmatprep.mubr.msk.f32.mxu1 %vm3025_vm4, %v7828_v2  ;;  %v3892_v2 = vld [vmem:[#allocation3 + $0x96] sm:$0xff] }
 0x4fe   : > { %6209 = vmatmul.mubr.msk.f32.vlgmr.msra.gmra.mrb[48].mxu1 %vm3025_vm4, %v7833_v10  ;;  %v3893_v10 = vld [vmem:[#allocation3 + $0xa6] sm:$0xff] }
 0x4ff   : > { %6211 = vmatprep.mubr.msk.f32.mxu1 %vm3025_vm4, %v7840_v7  ;;  %6221 = vmatpush3.msk.msra.mxu1 %vm3195_vm7, %v5497_v52  ;;  %v4043_v7 = vld [vmem:[#allocation3 + $0xc0] sm:$0xff] }
 0x500   : > { %6234 = vmatprep.subr.msk.mxu1 %vm3195_vm7, %v5507_v57 }
 0x502   : > { %6212 = vmatmul.mubr.msk.f32.gmra.mrb[50].mxu1 %vm3025_vm4, %v7845_v8 }
 0x503   : > { %6214 = vmatprep.mubr.msk.f32.mxu1 %vm3025_vm4, %v7850_v12 }
 0x506   : > { %6215 = vmatmul.mubr.msk.f32.gmra.mrb[52].mxu1 %vm3025_vm4, %v3741_v58 }
 0x507   : > { %6217 = vmatprep.mubr.msk.f32.mxu1 %vm3025_vm4, %v3742_v59 }
 0x50a   : > { %6218 = vmatmul.mubr.msk.f32.gmra.mrb[54].mxu1 %vm3025_vm4, %v3743_v46 }
 0x50b   : > { %6222 = vmatprep.mubr.msk.f32.mxu1 %vm3025_vm4, %v3439_v49  ;;  %v2787_v61 = vpop.f32.mrb[40].mxu1 }
 0x50c   : > { %v2789_v62 = vpop.f32.mrb[41].mxu1 }
 0x50d   : > { %v3013_v6 = vcombine.low %v2787_v61, %v2789_v62 }
 0x50e   : > { %6223 = vmatmul.mubr.msk.f32.vlgmr.msra.gmra.mrb[48].mxu1 %vm3025_vm4, %v3440_v50  ;;  %v4711_v50 = vld [vmem:[%s8389_s11 + $0xa0] sm:$0xff] }
 0x50f   : > { %6225 = vmatprep.mubr.msk.f32.mxu1 %vm3025_vm4, %v3441_v39  ;;  %6235 = vmatpush3.msk.msra.mxu1 %vm3195_vm7, %v5507_v57  ;;  %3021 = vst [vmem:[%s7972_s24] sm:$0xff] %v3013_v6  ;;  %v4712_v39 = vld [vmem:[%s8389_s11 + $0xa8] sm:$0xff] }
 0x510   : > { %6248 = vmatprep.subr.msk.mxu1 %vm3195_vm7, %v5517_v63  ;;  %v4696_v57 = vld [vmem:[%s8389_s11 + $0x28] sm:$0xff] }
 0x512   : > { %6226 = vmatmul.mubr.msk.f32.gmra.mrb[50].mxu1 %vm3025_vm4, %v7924_v38 }
 0x513   : > { %6228 = vmatprep.mubr.msk.f32.mxu1 %vm3025_vm4, %v7928_v51 }
 0x516   : > { %6229 = vmatmul.mubr.msk.f32.gmra.mrb[52].mxu1 %vm3025_vm4, %v3891_v0 }
 0x517   : > { %6231 = vmatprep.mubr.msk.f32.mxu1 %vm3025_vm4, %v3892_v2 }
 0x51a   : > { %6232 = vmatmul.mubr.msk.f32.gmra.mrb[54].mxu1 %vm3025_vm4, %v3893_v10 }
 0x51b   : > { %6236 = vmatprep.mubr.msk.f32.mxu1 %vm3025_vm4, %v7905_v3  ;;  %v2858_v4 = vpop.f32.mrb[42].mxu1 }
 0x51c   : > { %v2860_v15 = vpop.f32.mrb[43].mxu1 }
 0x51d   : > { %v3014_v20 = vcombine.low %v2858_v4, %v2860_v15  ;;  %v4715_v15 = vld [vmem:[%s8389_s11 + $0xc0] sm:$0xff] }
 0x51e   : > { %6237 = vmatmul.mubr.msk.f32.vlgmr.msra.gmra.mrb[48].mxu1 %vm3025_vm4, %v7909_v44 }
 0x51f   : > { %6239 = vmatprep.mubr.msk.f32.mxu1 %vm3025_vm4, %v3591_v54  ;;  %6249 = vmatpush3.msk.msra.mxu1 %vm3195_vm7, %v5517_v63  ;;  %3022 = vst [vmem:[%s7972_s24 + $0x8] sm:$0xff] %v3014_v20 }
 0x520   : > { %6262 = vmatprep.subr.msk.mxu1 %vm3195_vm7, %v5527_v5 }
 0x522   : > { %6240 = vmatmul.mubr.msk.f32.gmra.mrb[50].mxu1 %vm3025_vm4, %v3592_v55  ;;  %v6496_v55 = vpack.c.bf16 %v4712_v39, %v4711_v50 }
 0x523   : > { %6242 = vmatprep.mubr.msk.f32.mxu1 %vm3025_vm4, %v3593_v56  ;;  %v4695_v56 = vld [vmem:[%s8389_s11 + $0x20] sm:$0xff] }
 0x524   : > { %v6498_v61 = vpack.c.bf16 %v4696_v57, %v4695_v56 }
 0x526   : > { %6243 = vmatmul.mubr.msk.f32.gmra.mrb[52].mxu1 %vm3025_vm4, %v4042_v53 }
 0x527   : > { %6245 = vmatprep.mubr.msk.f32.mxu1 %vm3025_vm4, %v4043_v7 }
 0x52a   : > { %6246 = vmatmul.mubr.msk.f32.gmra.mrb[54].mxu1 %vm3025_vm4, %v4044_v60 }
 0x52b   : > { %6250 = vmatprep.mubr.msk.f32.mxu1 %vm3025_vm4, %v7845_v8  ;;  %v2929_v23 = vpop.f32.mrb[44].mxu1  ;;  %v4194_v8 = vld [vmem:[#allocation3 + $0xd3] sm:$0xff] }
 0x52c   : > { %v2931_v9 = vpop.f32.mrb[45].mxu1 }
 0x52d   : > { %v3015_v13 = vcombine.low %v2929_v23, %v2931_v9  ;;  %v4699_v23 = vld [vmem:[%s8389_s11 + $0x40] sm:$0xff]  ;;  %v4700_v9 = vld [vmem:[%s8389_s11 + $0x48] sm:$0xff] }
 0x52e   : > { %6251 = vmatmul.mubr.msk.f32.vlgmr.msra.gmra.mrb[48].mxu1 %vm3025_vm4, %v7850_v12 }
 0x52f   : > { %6253 = vmatprep.mubr.msk.f32.mxu1 %vm3025_vm4, %v3741_v58  ;;  %6263 = vmatpush3.msk.msra.mxu1 %vm3195_vm7, %v5527_v5  ;;  %3023 = vst [vmem:[%s7972_s24 + $0x10] sm:$0xff] %v3015_v13  ;;  %v4716_v5 = vld [vmem:[%s8389_s11 + $0xc8] sm:$0xff]  ;;  %v4717_v13 = vld [vmem:[%s8389_s11 + $0xd0] sm:$0xff] }
 0x530   : > { %v6504_v60 = vpack.c.bf16 %v4716_v5, %v4715_v15 }
 0x532   : > { %6254 = vmatmul.mubr.msk.f32.gmra.mrb[50].mxu1 %vm3025_vm4, %v3742_v59  ;;  %v4713_v59 = vld [vmem:[%s8389_s11 + $0xb0] sm:$0xff] }
 0x533   : > { %6256 = vmatprep.mubr.msk.f32.mxu1 %vm3025_vm4, %v3743_v46  ;;  %v4714_v46 = vld [vmem:[%s8389_s11 + $0xb8] sm:$0xff] }
 0x536   : > { %6257 = vmatmul.mubr.msk.f32.gmra.mrb[52].mxu1 %vm3025_vm4, %v4192_v26  ;;  %v4718_v26 = vld [vmem:[%s8389_s11 + $0xd8] sm:$0xff] }
 0x537   : > { %6259 = vmatprep.mubr.msk.f32.mxu1 %vm3025_vm4, %v4193_v14  ;;  %v6506_v14 = vpack.c.bf16 %v4700_v9, %v4699_v23 }
 0x53a   : > { %6260 = vmatmul.mubr.msk.f32.gmra.mrb[54].mxu1 %vm3025_vm4, %v4194_v8 }
 0x53b   : > { %6264 = vmatprep.mubr.msk.f32.mxu1 %vm3025_vm4, %v7924_v38  ;;  %v3000_v12 = vpop.f32.mrb[46].mxu1  ;;  %v6494_v38 = vpack.c.bf16 %v4694_v48, %v4693_v47 }
 0x53c   : > { %v3002_v16 = vpop.f32.mrb[47].mxu1 }
 0x53d   : > { %v3016_v27 = vcombine.low %v3000_v12, %v3002_v16  ;;  %v6508_v16 = vpack.c.bf16 %v4718_v26, %v4717_v13 }
 0x53e   : > { %6265 = vmatmul.mubr.msk.f32.vlgmr.msra.gmra.mrb[48].mxu1 %vm3025_vm4, %v7928_v51 }
 0x53f   : > { %6267 = vmatprep.mubr.msk.f32.mxu1 %vm3025_vm4, %v3891_v0  ;;  %3024 = vst [vmem:[%s7972_s24 + $0x18] sm:$0xff] %v3016_v27  ;;  %v6500_v0 = vpack.c.bf16 %v4714_v46, %v4713_v59  ;;  %v4701_v27 = vld [vmem:[%s8389_s11 + $0x50] sm:$0xff] }
 0x542   : > { %6268 = vmatmul.mubr.msk.f32.gmra.mrb[50].mxu1 %vm3025_vm4, %v3892_v2  ;;  %v4697_v2 = vld [vmem:[%s8389_s11 + $0x30] sm:$0xff] }
 0x543   : > { %6270 = vmatprep.mubr.msk.f32.mxu1 %vm3025_vm4, %v3893_v10  ;;  %v4698_v10 = vld [vmem:[%s8389_s11 + $0x38] sm:$0xff] }
 0x544   : > { %v6502_v20 = vpack.c.bf16 %v4698_v10, %v4697_v2 }
 0x546   : > { %6271 = vmatmul.mubr.msk.f32.gmra.mrb[52].mxu1 %vm3025_vm4, %v4342_v17  ;;  %v4702_v17 = vld [vmem:[%s8389_s11 + $0x58] sm:$0xff] }
 0x547   : > { %6273 = vmatprep.mubr.msk.f32.mxu1 %vm3025_vm4, %v4343_v19  ;;  %v4719_v19 = vld [vmem:[%s8389_s11 + $0xe0] sm:$0xff]  ;;  %v6510_v21 = vpack.c.bf16 %v4702_v17, %v4701_v27 }
 0x54a   : > { %6274 = vmatmul.mubr.msk.f32.gmra.mrb[54].mxu1 %vm3025_vm4, %v4344_v11  ;;  %v4720_v11 = vld [vmem:[%s8389_s11 + $0xe8] sm:$0xff] }
 0x54b   : > { %5077 = vmatprep.mubr.f32.mxu1 %v6761_v1  ;;  %v6512_v28 = vpack.c.bf16 %v4720_v11, %v4719_v19 }
 0x611   : > { %v6266_v34 = vpop.f32.mrb[48].mxu1 }
 0x612   : > { %v4440_v37 = vpop.f32.mrb[49].mxu1  ;;  %v4495_v3 = vadd.f32 %v6266_v34, %v8050_v18  ;;  %v6514_v34 = vpack.c.bf16 %v4704_v25, %v4703_v29  ;;  %v4876_v25 = vld [vmem:[%s8380_s2 + $0x8] sm:$0xff] }
 0x613   : > { %v4494_v41 = vadd.f32 %v8050_v18, %v4440_v37  ;;  %v4705_v37 = vld [vmem:[%s8389_s11 + $0x70] sm:$0xff] }
 0x614   : > { %v4503_v51 = vmax.f32 %v4495_v3, 0.0  ;;  %v6518_v40 = vpack.c.bf16 %v4706_v32, %v4705_v37  ;;  %v4892_v37 = vld [vmem:[%s8380_s2 + $0x88] sm:$0xff] }
 0x615   : > { %v4502_v43 = vmax.f32 %v4494_v41, 0.0  ;;  %v6269_v44 = vpop.f32.mrb[50].mxu1  ;;  %v4528_v41 = vlaneseq  ;;  %v4900_v32 = vld [vmem:[%s8380_s2 + $0xc8] sm:$0xff] }
 0x616   : > { %v4450_v49 = vpop.f32.mrb[51].mxu1  ;;  %v4497_v62 = vadd.f32 %v6269_v44, %v8050_v18 }
 0x617   : > { %5538 = vmatmul.mubr.msk.f32.vlgmr.msra.gmra.mrb[40].mxu0 %vm2717_vm6, %v4502_v43  ;;  %v4496_v52 = vadd.f32 %v8050_v18, %v4450_v49  ;;  %v4526_v43 = vld [vmem:[%s8388_s10] sm:$0x3] }
 0x618   : > { %4632 = vmatprep.mubr.f32.mxu0 %v6761_v1  ;;  %6491 = vmatpush3.bf16.msra.mxu0 %v6490_v42  ;;  %v4505_v53 = vmax.f32 %v4497_v62, 0.0  ;;  %v4529_v42 = vshrl.u32 %v4528_v41, 7  ;;  %v6524_v41 = vpack.c.bf16 %v4900_v32, %v4892_v37 }
 0x619   : > { %v6272_v54 = vpop.f32.mrb[52].mxu1  ;;  %6493 = vmatprep.subr.bf16.mxu0 %v6492_v45  ;;  %v4504_v63 = vmax.f32 %v4496_v52, 0.0 }
 0x61a   : > { %v4460_v58 = vpop.f32.mrb[53].mxu1  ;;  %v4499_v8 = vadd.f32 %v6272_v54, %v8050_v18  ;;  %v4530_v3 = vsub.s32 0, %v4529_v42  ;;  %v4534_v44 = vsub.s32 1, %v4529_v42  ;;  %v4891_v42 = vld [vmem:[%s8380_s2 + $0x80] sm:$0xff] }
 0x61b   : > { %5539 = vmatmul.mubr.msk.f32.gmra.mrb[42].mxu0 %vm2717_vm6, %v4503_v51  ;;  %v4498_v7 = vadd.f32 %v8050_v18, %v4460_v58 }
 0x61c   : > { %4638 = vmatprep.mubr.f32.mxu0 %v6761_v1  ;;  %6495 = vmatpush3.bf16.msra.mxu0 %v6494_v38  ;;  %v4507_v24 = vmax.f32 %v4499_v8, 0.0  ;;  %v4531_v45 = vrot.slane %v4526_v43, %v4530_v3  ;;  %v4535_v47 = vrot.slane %v4526_v43, %v4534_v44  ;;  %v4899_v3 = vld [vmem:[%s8380_s2 + $0xc0] sm:$0xff]  ;;  %v4878_v43 = vld [vmem:[%s8380_s2 + $0x18] sm:$0xff] }
 0x61d   : > { %v6275_v6 = vpop.f32.mrb[54].mxu1  ;;  %6497 = vmatprep.subr.bf16.mxu0 %v6496_v55  ;;  %v4506_v12 = vmax.f32 %v4498_v7, 0.0  ;;  %v4886_v44 = vld [vmem:[%s8380_s2 + $0x58] sm:$0xff] }
 0x61e   : > { %v4470_v4 = vpop.f32.mrb[55].mxu1  ;;  %v4501_v30 = vadd.f32 %v6275_v6, %v8050_v18 }
 0x61f   : > { %5540 = vmatmul.mubr.msk.f32.gmra.mrb[44].mxu0 %vm2717_vm6, %v4504_v63  ;;  %v4500_v22 = vadd.f32 %v8050_v18, %v4470_v4  ;;  %v4721_v18 = vld [vmem:[%s8389_s11 + $0xf0] sm:$0xff] }
 0x620   : > { %4644 = vmatprep.mubr.f32.mxu0 %v6761_v1  ;;  %6499 = vmatpush3.bf16.msra.mxu0 %v6498_v61  ;;  %v4509_v33 = vmax.f32 %v4501_v30, 0.0  ;;  %v6516_v36 = vpack.c.bf16 %v4722_v35, %v4721_v18  ;;  %v4875_v18 = vld [vmem:[%s8380_s2] sm:$0xff] }
 0x621   : > { %6501 = vmatprep.subr.bf16.mxu0 %v6500_v0  ;;  %v4508_v31 = vmax.f32 %v4500_v22, 0.0 }
 0x623   : > { %5541 = vmatmul.mubr.msk.f32.gmra.mrb[46].mxu0 %vm2717_vm6, %v4505_v53 }
 0x624   : > { %4650 = vmatprep.mubr.f32.mxu0 %v6761_v1  ;;  %6503 = vmatpush3.bf16.msra.mxu0 %v6502_v20 }
 0x625   : > { %6505 = vmatprep.subr.bf16.mxu0 %v6504_v60 }
 0x627   : > { %5542 = vmatmul.mubr.msk.f32.gmra.mrb[48].mxu0 %vm2717_vm6, %v4506_v12 }
 0x628   : > { %4656 = vmatprep.mubr.f32.mxu0 %v6761_v1  ;;  %6507 = vmatpush3.bf16.msra.mxu0 %v6506_v14 }
 0x629   : > { %6509 = vmatprep.subr.bf16.mxu0 %v6508_v16 }
 0x62b   : > { %5543 = vmatmul.mubr.msk.f32.gmra.mrb[50].mxu0 %vm2717_vm6, %v4507_v24 }
 0x62c   : > { %4662 = vmatprep.mubr.f32.mxu0 %v6761_v1  ;;  %6511 = vmatpush3.bf16.msra.mxu0 %v6510_v21 }
 0x62d   : > { %6513 = vmatprep.subr.bf16.mxu0 %v6512_v28 }
 0x62f   : > { %5544 = vmatmul.mubr.msk.f32.gmra.mrb[52].mxu0 %vm2717_vm6, %v4508_v31 }
 0x630   : > { %4668 = vmatprep.mubr.f32.mxu0 %v6761_v1  ;;  %6515 = vmatpush3.bf16.msra.mxu0 %v6514_v34  ;;  %v4884_v34 = vld [vmem:[%s8380_s2 + $0x48] sm:$0xff] }
 0x631   : > { %6517 = vmatprep.subr.bf16.mxu0 %v6516_v36  ;;  %v6520_v35 = vpack.c.bf16 %v4884_v34, %v4876_v25  ;;  %v4883_v36 = vld [vmem:[%s8380_s2 + $0x40] sm:$0xff] }
 0x633   : > { %5545 = vmatmul.mubr.msk.f32.gmra.mrb[54].mxu0 %vm2717_vm6, %v4509_v33 }
 0x634   : > { %6519 = vmatpush3.bf16.msra.mxu0 %v6518_v40  ;;  %v6522_v40 = vpack.c.bf16 %v4883_v36, %v4875_v18 }
 0x635   : > { %6521 = vmatprep.subr.bf16.mxu0 %v6520_v35 }
 0x6ea   : > { %v4628_v48 = vpop.f32.mrb[40].mxu0 }
 0x6eb   : > { %v4629_v49 = vadd.f32 %v4628_v48, %v4531_v45  ;;  %v4630_v50 = vpop.f32.mrb[41].mxu0  ;;  %v6526_v48 = vpack.c.bf16 %v4899_v3, %v4891_v42 }
 0x6ec   : > { %v4631_v39 = vadd.f32 %v4630_v50, %v4535_v47  ;;  %v4877_v50 = vld [vmem:[%s8380_s2 + $0x10] sm:$0xff] }
 0x6ed   : > { %v4675_v52 = vmax.f32 %v4629_v49, 0.0  ;;  %v6536_v49 = vpack.c.bf16 %v4886_v44, %v4878_v43 }
 0x6ee   : > { %v4676_v38 = vmax.f32 %v4631_v39, 0.0  ;;  %v4634_v51 = vpop.f32.mrb[42].mxu0  ;;  %v4885_v39 = vld [vmem:[%s8380_s2 + $0x50] sm:$0xff] }
 0x6ef   : > { %v4635_v54 = vadd.f32 %v4634_v51, %v4531_v45  ;;  %v4636_v55 = vpop.f32.mrb[43].mxu0  ;;  %6537 = vmatprep.subr.bf16.mxu1 %v6536_v49 }
 0x6f0   : > { %v4637_v56 = vadd.f32 %v4636_v55, %v4535_v47  ;;  %4794 = vmatprep.mubr.f32.mxu0 %v4676_v38  ;;  %v4907_v38 = vld [vmem:[%s8380_s2 + $0x100] sm:$0xff]  ;;  %v4894_v55 = vld [vmem:[%s8380_s2 + $0x98] sm:$0xff] }
 0x6f1   : > { %4795 = vmatmul.mubr.f32.vlgmr.msra.gmra.mrb[56].mxu0 %v4675_v52  ;;  %v4677_v59 = vmax.f32 %v4635_v54, 0.0  ;;  %v6538_v52 = vpack.c.bf16 %v4885_v39, %v4877_v50  ;;  %v4915_v54 = vld [vmem:[%s8380_s2 + $0x140] sm:$0xff] }
 0x6f2   : > { %v4678_v57 = vmax.f32 %v4637_v56, 0.0  ;;  %v4640_v58 = vpop.f32.mrb[44].mxu0  ;;  %6523 = vmatpush1.bf16.msra.mxu0 %v6522_v40  ;;  %v4902_v56 = vld [vmem:[%s8380_s2 + $0xd8] sm:$0xff] }
 0x6f3   : > { %v4641_v46 = vadd.f32 %v4640_v58, %v4531_v45  ;;  %v4642_v61 = vpop.f32.mrb[45].mxu0  ;;  %6525 = vmatprep.subr.bf16.mxu0 %v6524_v41  ;;  %v4893_v58 = vld [vmem:[%s8380_s2 + $0x90] sm:$0xff]  ;;  %6539 = vmatpush1.bf16.msra.mxu1 %v6538_v52 }
 0x6f4   : > { %v4643_v62 = vadd.f32 %v4642_v61, %v4535_v47  ;;  %4799 = vmatprep.mubr.f32.mxu0 %v4678_v57  ;;  %v6540_v57 = vpack.c.bf16 %v4902_v56, %v4894_v55 }
 0x6f5   : > { %4800 = vmatmul.mubr.f32.gmra.mrb[58].mxu0 %v4677_v59  ;;  %v4679_v0 = vmax.f32 %v4641_v46, 0.0  ;;  %v4901_v59 = vld [vmem:[%s8380_s2 + $0xd0] sm:$0xff]  ;;  %v4910_v46 = vld [vmem:[%s8380_s2 + $0x118] sm:$0xff] }
 0x6f6   : > { %v4680_v63 = vmax.f32 %v4643_v62, 0.0  ;;  %v4646_v6 = vpop.f32.mrb[46].mxu0  ;;  %v6542_v61 = vpack.c.bf16 %v4901_v59, %v4893_v58  ;;  %v4918_v62 = vld [vmem:[%s8380_s2 + $0x158] sm:$0xff]  ;;  %6527 = vmatpush1.bf16.msra.mxu0 %v6526_v48  ;;  %6541 = vmatprep.subr.bf16.mxu1 %v6540_v57 }
 0x6f7   : > { %v4647_v2 = vadd.f32 %v4646_v6, %v4531_v45  ;;  %v4648_v10 = vpop.f32.mrb[47].mxu0  ;;  %v4932_v6 = vld [vmem:[%s8380_s2 + $0x1c8] sm:$0xff] }
 0x6f8   : > { %v4649_v4 = vadd.f32 %v4648_v10, %v4535_v47  ;;  %4804 = vmatprep.mubr.f32.mxu0 %v4680_v63  ;;  %v4924_v63 = vld [vmem:[%s8380_s2 + $0x188] sm:$0xff]  ;;  %v4909_v10 = vld [vmem:[%s8380_s2 + $0x110] sm:$0xff]  ;;  %6543 = vmatpush1.bf16.msra.mxu1 %v6542_v61 }
 0x6f9   : > { %4805 = vmatmul.mubr.f32.gmra.mrb[60].mxu0 %v4679_v0  ;;  %v4681_v20 = vmax.f32 %v4647_v2, 0.0  ;;  %v6530_v0 = vpack.c.bf16 %v4915_v54, %v4907_v38  ;;  %v6544_v2 = vpack.c.bf16 %v4918_v62, %v4910_v46 }
 0x6fa   : > { %v4682_v15 = vmax.f32 %v4649_v4, 0.0  ;;  %v4652_v5 = vpop.f32.mrb[48].mxu0  ;;  %v4917_v4 = vld [vmem:[%s8380_s2 + $0x150] sm:$0xff] }
 0x6fb   : > { %v4653_v53 = vadd.f32 %v4652_v5, %v4531_v45  ;;  %v4654_v7 = vpop.f32.mrb[49].mxu0  ;;  %v6532_v5 = vpack.c.bf16 %v4932_v6, %v4924_v63  ;;  %6545 = vmatprep.subr.bf16.mxu1 %v6544_v2  ;;  %v4879_v6 = vld [vmem:[%s8380_s2 + $0x20] sm:$0xff]  ;;  %v4881_v2 = vld [vmem:[%s8380_s2 + $0x30] sm:$0xff] }
 0x6fc   : > { %v4655_v60 = vadd.f32 %v4654_v7, %v4535_v47  ;;  %4809 = vmatprep.mubr.f32.mxu0 %v4682_v15  ;;  %v4923_v15 = vld [vmem:[%s8380_s2 + $0x180] sm:$0xff]  ;;  %v4934_v7 = vld [vmem:[%s8380_s2 + $0x1d8] sm:$0xff] }
 0x6fd   : > { %4810 = vmatmul.mubr.f32.gmra.mrb[62].mxu0 %v4681_v20  ;;  %v4683_v13 = vmax.f32 %v4653_v53, 0.0  ;;  %v4931_v20 = vld [vmem:[%s8380_s2 + $0x1c0] sm:$0xff]  ;;  %v4926_v53 = vld [vmem:[%s8380_s2 + $0x198] sm:$0xff] }
 0x6fe   : > { %v4684_v23 = vmax.f32 %v4655_v60, 0.0  ;;  %v4658_v9 = vpop.f32.mrb[50].mxu0  ;;  %v4880_v60 = vld [vmem:[%s8380_s2 + $0x28] sm:$0xff] }
 0x6ff   : > { %v4659_v26 = vadd.f32 %v4658_v9, %v4531_v45  ;;  %v4660_v14 = vpop.f32.mrb[51].mxu0  ;;  %v4888_v9 = vld [vmem:[%s8380_s2 + $0x68] sm:$0xff] }
 0x700   : > { %v4661_v8 = vadd.f32 %v4660_v14, %v4535_v47  ;;  %4814 = vmatprep.mubr.f32.mxu0 %v4684_v23  ;;  %v6546_v23 = vpack.c.bf16 %v4917_v4, %v4909_v10  ;;  %v4925_v14 = vld [vmem:[%s8380_s2 + $0x190] sm:$0xff]  ;;  %v4896_v4 = vld [vmem:[%s8380_s2 + $0xa8] sm:$0xff] }
 0x701   : > { %4815 = vmatmul.mubr.f32.gmra.mrb[64].mxu0 %v4683_v13  ;;  %v4685_v27 = vmax.f32 %v4659_v26, 0.0  ;;  %v6534_v13 = vpack.c.bf16 %v4931_v20, %v4923_v15  ;;  %v6548_v26 = vpack.c.bf16 %v4934_v7, %v4926_v53  ;;  %v4889_v10 = vld [vmem:[%s8380_s2 + $0x70] sm:$0xff]  ;;  %v4904_v15 = vld [vmem:[%s8380_s2 + $0xe8] sm:$0xff]  ;;  %v4906_v20 = vld [vmem:[%s8380_s2 + $0xf8] sm:$0xff] }
 0x702   : > { %v4686_v12 = vmax.f32 %v4661_v8, 0.0  ;;  %v4664_v16 = vpop.f32.mrb[52].mxu0  ;;  %v4933_v8 = vld [vmem:[%s8380_s2 + $0x1d0] sm:$0xff]  ;;  %6547 = vmatpush1.bf16.msra.mxu1 %v6546_v23  ;;  %v6570_v7 = vpack.c.bf16 %v4889_v10, %v4881_v2  ;;  %v4903_v23 = vld [vmem:[%s8380_s2 + $0xe0] sm:$0xff] }
 0x703   : > { %v4665_v17 = vadd.f32 %v4664_v16, %v4531_v45  ;;  %v4666_v19 = vpop.f32.mrb[53].mxu0  ;;  %v4882_v16 = vld [vmem:[%s8380_s2 + $0x38] sm:$0xff]  ;;  %6549 = vmatprep.subr.bf16.mxu1 %v6548_v26  ;;  %v4897_v26 = vld [vmem:[%s8380_s2 + $0xb0] sm:$0xff] }
 0x704   : > { %v4667_v11 = vadd.f32 %v4666_v19, %v4535_v47  ;;  %4819 = vmatprep.mubr.f32.mxu0 %v4686_v12  ;;  %v6552_v12 = vpack.c.bf16 %v4888_v9, %v4880_v60  ;;  %v4895_v60 = vld [vmem:[%s8380_s2 + $0xa0] sm:$0xff]  ;;  %v6556_v9 = vpack.c.bf16 %v4904_v15, %v4896_v4 }
 0x705   : > { %4820 = vmatmul.mubr.f32.gmra.mrb[66].mxu0 %v4685_v27  ;;  %v4687_v22 = vmax.f32 %v4665_v17, 0.0  ;;  %v4890_v27 = vld [vmem:[%s8380_s2 + $0x78] sm:$0xff]  ;;  %v6550_v17 = vpack.c.bf16 %v4933_v8, %v4925_v14  ;;  %v4905_v14 = vld [vmem:[%s8380_s2 + $0xf0] sm:$0xff]  ;;  %v4912_v8 = vld [vmem:[%s8380_s2 + $0x128] sm:$0xff] }
 0x706   : > { %v4688_v21 = vmax.f32 %v4667_v11, 0.0  ;;  %v4670_v24 = vpop.f32.mrb[54].mxu0  ;;  %v6568_v19 = vpack.c.bf16 %v4890_v27, %v4882_v16  ;;  %v4920_v16 = vld [vmem:[%s8380_s2 + $0x168] sm:$0xff]  ;;  %v4914_v27 = vld [vmem:[%s8380_s2 + $0x138] sm:$0xff] }
 0x707   : > { %v4671_v28 = vadd.f32 %v4670_v24, %v4531_v45  ;;  %v4672_v30 = vpop.f32.mrb[55].mxu0  ;;  %v4908_v45 = vld [vmem:[%s8380_s2 + $0x108] sm:$0xff]  ;;  %6551 = vmatpush1.bf16.msra.mxu1 %v6550_v17  ;;  %v5546_v24 = vld [vmem:[%s8390_s12] ss:$0 sm:$0xff]  ;;  %v4922_v17 = vld [vmem:[%s8380_s2 + $0x178] sm:$0xff] }
 0x708   : > { %v4673_v31 = vadd.f32 %v4672_v30, %v4535_v47  ;;  %4824 = vmatprep.mubr.f32.mxu0 %v4688_v21  ;;  %v4916_v47 = vld [vmem:[%s8380_s2 + $0x148] sm:$0xff]  ;;  %6569 = vmatprep.subr.bf16.mxu1 %v6568_v19  ;;  %v6558_v19 = vpack.c.bf16 %v4903_v23, %v4895_v60 }
 0x709   : > { %4825 = vmatmul.mubr.f32.gmra.mrb[68].mxu0 %v4687_v22  ;;  %v4689_v29 = vmax.f32 %v4671_v28, 0.0  ;;  %v6528_v51 = vpack.c.bf16 %v4916_v47, %v4908_v45 }
 0x70a   : > { %v4690_v33 = vmax.f32 %v4673_v31, 0.0 }
 0x70b   : > { %6529 = vmatprep.subr.bf16.mxu0 %v6528_v51 }
 0x70c   : > { %4829 = vmatprep.mubr.f32.mxu0 %v4690_v33  ;;  %6531 = vmatpush1.bf16.msra.mxu0 %v6530_v0  ;;  %v4887_v0 = vld [vmem:[%s8380_s2 + $0x60] sm:$0xff] }
 0x70d   : > { %4830 = vmatmul.mubr.f32.gmra.mrb[70].mxu0 %v4689_v29  ;;  %6533 = vmatprep.subr.bf16.mxu0 %v6532_v5  ;;  %v4898_v5 = vld [vmem:[%s8380_s2 + $0xb8] sm:$0xff]  ;;  %v6554_v53 = vpack.c.bf16 %v4887_v0, %v4879_v6 }
 0x70e   : > { %5006 = vmatprep.mubr.f32.mxu0 %v6761_v1 }
 0x710   : > { %6535 = vmatpush1.bf16.msra.mxu0 %v6534_v13  ;;  %v6572_v13 = vpack.c.bf16 %v4906_v20, %v4898_v5 }
 0x711   : > { %6553 = vmatprep.subr.bf16.mxu0 %v6552_v12 }
 0x7c4   : > { %v5984_v11 = vpop.f32.mrb[56].mxu0 }
 0x7c5   : > { %v5985_v21 = vpop.f32.mrb[57].mxu0 }
 0x7c6   : > { %v5986_v22 = vadd.f32 %v5985_v21, %v5984_v11  ;;  %v6574_v11 = vpack.c.bf16 %v4905_v14, %v4897_v26  ;;  %v4911_v21 = vld [vmem:[%s8380_s2 + $0x120] sm:$0xff] }
 0x7c8   : > { %v5987_v28 = vpop.f32.mrb[58].mxu0  ;;  %v4797_v30 = vadd.f32 %v5986_v22, %v5546_v24  ;;  %v6560_v22 = vpack.c.bf16 %v4920_v16, %v4912_v8 }
 0x7c9   : > { %v5988_v31 = vpop.f32.mrb[59].mxu0 }
 0x7ca   : > { %v5989_v33 = vadd.f32 %v5988_v31, %v5987_v28  ;;  %v4835_v29 = vmax.f32 %v4797_v30, 0.0  ;;  %v6576_v28 = vpack.c.bf16 %v4922_v17, %v4914_v27  ;;  %v4913_v30 = vld [vmem:[%s8380_s2 + $0x130] sm:$0xff] }
 0x7cb   : > { %v4921_v31 = vld [vmem:[%s8380_s2 + $0x170] sm:$0xff] }
 0x7cc   : > { %v4802_v25 = vadd.f32 %v5989_v33, %v5546_v24  ;;  %v5990_v34 = vpop.f32.mrb[60].mxu0  ;;  %4843 = vxpose.xlu0.b32.start [1/8] (short) (narrow) %v4835_v29, 8  ;;  %v4928_v33 = vld [vmem:[%s8380_s2 + $0x1a8] sm:$0xff] }
 0x7cd   : > { %v5991_v18 = vpop.f32.mrb[61].mxu0  ;;  %v4936_v29 = vld [vmem:[%s8380_s2 + $0x1e8] sm:$0xff] }
 0x7ce   : > { %v4836_v35 = vmax.f32 %v4802_v25, 0.0  ;;  %v5992_v36 = vadd.f32 %v5991_v18, %v5990_v34  ;;  %v4930_v25 = vld [vmem:[%s8380_s2 + $0x1b8] sm:$0xff] }
 0x7cf   : > { %v4938_v34 = vld [vmem:[%s8380_s2 + $0x1f8] sm:$0xff] }
 0x7d0   : > { %v4807_v37 = vadd.f32 %v5992_v36, %v5546_v24  ;;  %v5993_v32 = vpop.f32.mrb[62].mxu0  ;;  %4844 = vxpose.xlu0.b32.cont [2/8] (short) (narrow) %v4836_v35, 8  ;;  %v6578_v35 = vpack.c.bf16 %v4921_v31, %v4913_v30  ;;  %v4927_v36 = vld [vmem:[%s8380_s2 + $0x1a0] sm:$0xff] }
 0x7d1   : > { %v5994_v40 = vpop.f32.mrb[63].mxu0 }
 0x7d2   : > { %v4837_v41 = vmax.f32 %v4807_v37, 0.0  ;;  %v5995_v42 = vadd.f32 %v5994_v40, %v5993_v32  ;;  %v6564_v37 = vpack.c.bf16 %v4936_v29, %v4928_v33  ;;  %v6580_v32 = vpack.c.bf16 %v4938_v34, %v4930_v25  ;;  %v4935_v40 = vld [vmem:[%s8380_s2 + $0x1e0] sm:$0xff] }
 0x7d4   : > { %v4812_v3 = vadd.f32 %v5995_v42, %v5546_v24  ;;  %v5996_v43 = vpop.f32.mrb[64].mxu0  ;;  %4845 = vxpose.xlu0.b32.cont [3/8] (short) (narrow) %v4837_v41, 8  ;;  %v4937_v41 = vld [vmem:[%s8380_s2 + $0x1f0] sm:$0xff]  ;;  %v6566_v42 = vpack.c.bf16 %v4935_v40, %v4927_v36 }
 0x7d5   : > { %v5997_v44 = vpop.f32.mrb[65].mxu0 }
 0x7d6   : > { %v4838_v45 = vmax.f32 %v4812_v3, 0.0  ;;  %v5998_v47 = vadd.f32 %v5997_v44, %v5996_v43 }
 0x7d8   : > { %v4817_v48 = vadd.f32 %v5998_v47, %v5546_v24  ;;  %v5999_v49 = vpop.f32.mrb[66].mxu0  ;;  %4846 = vxpose.xlu0.b32.cont [4/8] (short) (narrow) %v4838_v45, 8 }
 0x7d9   : > { %v6000_v50 = vpop.f32.mrb[67].mxu0 }
 0x7da   : > { %v4839_v39 = vmax.f32 %v4817_v48, 0.0  ;;  %v6001_v38 = vadd.f32 %v6000_v50, %v5999_v49 }
 0x7dc   : > { %v4822_v51 = vadd.f32 %v6001_v38, %v5546_v24  ;;  %4847 = vxpose.xlu0.b32.cont [5/8] (short) (narrow) %v4839_v39, 8  ;;  %v6002_v52 = vpop.f32.mrb[68].mxu0 }
 0x7dd   : > { %v6003_v54 = vpop.f32.mrb[69].mxu0 }
 0x7de   : > { %v4840_v55 = vmax.f32 %v4822_v51, 0.0  ;;  %v6004_v56 = vadd.f32 %v6003_v54, %v6002_v52 }
 0x7e0   : > { %v4827_v57 = vadd.f32 %v6004_v56, %v5546_v24  ;;  %4848 = vxpose.xlu0.b32.cont [6/8] (short) (narrow) %v4840_v55, 8  ;;  %v6005_v58 = vpop.f32.mrb[70].mxu0 }
 0x7e1   : > { %v6006_v59 = vpop.f32.mrb[71].mxu0 }
 0x7e2   : > { %v4841_v46 = vmax.f32 %v4827_v57, 0.0  ;;  %v6007_v61 = vadd.f32 %v6006_v59, %v6005_v58 }
 0x7e4   : > { %v4832_v62 = vadd.f32 %v6007_v61, %v5546_v24  ;;  %4849 = vxpose.xlu0.b32.cont [7/8] (short) (narrow) %v4841_v46, 8  ;;  %v4919_v24 = vld [vmem:[%s8380_s2 + $0x160] sm:$0xff] }
 0x7e5   : > { %v6562_v18 = vpack.c.bf16 %v4919_v24, %v4911_v21 }
 0x7e6   : > { %v4842_v63 = vmax.f32 %v4832_v62, 0.0 }
 0x7e8   : > { %4850 = vxpose.xlu0.b32.end [8/8] (short) (narrow) %v4842_v63, 8 }
 0x84c   : > { %v4859_v12 = vpop.trf.xlu0 }
 0x84d   : > { %5547 = vmatmul.mubr.msk.f32.vlgmr.msra.gmra.mrb[72].mxu0 %vm2717_vm6, %v4859_v12  ;;  %5548 = vmatmul.mubr.msk.f32.vlgmr.msra.gmra.mrb[56].mxu1 %vm2717_vm6, %v4859_v12 }
 0x84e   : > { %6555 = vmatpush1.bf16.msra.mxu0 %v6554_v53  ;;  %6571 = vmatpush1.bf16.msra.mxu1 %v6570_v7 }
 0x84f   : > { %6557 = vmatprep.subr.bf16.mxu0 %v6556_v9  ;;  %6573 = vmatprep.subr.bf16.mxu1 %v6572_v13 }
 0x850   : > { %5148 = vmatprep.mubr.f32.mxu0 %v6761_v1  ;;  %5219 = vmatprep.mubr.f32.mxu1 %v6761_v1  ;;  %v4929_v1 = vld [vmem:[%s8380_s2 + $0x1b0] sm:$0xff] }
 0x851   : > { %v6582_v3 = vpack.c.bf16 %v4937_v41, %v4929_v1 }
 0x852   : > { %6559 = vmatpush1.bf16.msra.mxu0 %v6558_v19  ;;  %6575 = vmatpush1.bf16.msra.mxu1 %v6574_v11 }
 0x853   : > { %6561 = vmatprep.subr.bf16.mxu0 %v6560_v22  ;;  %6577 = vmatprep.subr.bf16.mxu1 %v6576_v28 }
 0x856   : > { %6563 = vmatpush1.bf16.msra.mxu0 %v6562_v18  ;;  %6579 = vmatpush1.bf16.msra.mxu1 %v6578_v35 }
 0x857   : > { %6565 = vmatprep.subr.bf16.mxu0 %v6564_v37  ;;  %6581 = vmatprep.subr.bf16.mxu1 %v6580_v32 }
 0x85a   : > { %6567 = vmatpush1.bf16.msra.mxu0 %v6566_v42  ;;  %6583 = vmatpush1.bf16.msra.mxu1 %v6582_v3 }
 0x85d   : > { %5549 = vmatmul.mubr.msk.f32.vlgmr.msra.gmra.mrb[74].mxu0 %vm2717_vm6, %v4859_v12  ;;  %5550 = vmatmul.mubr.msk.f32.vlgmr.msra.gmra.mrb[58].mxu1 %vm2717_vm6, %v4859_v12 }
 0x920   : > { %v5008_v43 = vpop.f32.mrb[72].mxu0  ;;  %v5079_v44 = vpop.f32.mrb[56].mxu1 }
 0x921   : > { %v5010_v45 = vpop.f32.mrb[73].mxu0  ;;  %v5081_v47 = vpop.f32.mrb[57].mxu1 }
 0x922   : > { %v5234_v48 = vcombine.low %v5008_v43, %v5010_v45  ;;  %v5235_v49 = vcombine.low %v5079_v44, %v5081_v47 }
 0x924   : > { %5242 = vst [vmem:[%s480_s15] sm:$0xff] %v5234_v48  ;;  %5243 = vst [vmem:[%s480_s15 + $0x8] sm:$0xff] %v5235_v49 }
 0x930   : > { %v5150_v50 = vpop.f32.mrb[74].mxu0  ;;  %v5221_v39 = vpop.f32.mrb[58].mxu1 }
 0x931   : > { %v5152_v38 = vpop.f32.mrb[75].mxu0  ;;  %v5223_v51 = vpop.f32.mrb[59].mxu1 }
 0x932   : > { %v5236_v52 = vcombine.low %v5150_v50, %v5152_v38  ;;  %v5237_v54 = vcombine.low %v5221_v39, %v5223_v51 }
 0x934   : > { %5244 = vst [vmem:[%s480_s15 + $0x10] sm:$0xff] %v5236_v52  ;;  %5245 = vst [vmem:[%s480_s15 + $0x18] sm:$0xff] %v5237_v54 }
 0x935 PF: > { %s25_s29 = sadd.s32 1, %s6759_s29  }
 0x936   : > { %p22_p4 = scmp.ge.s32.totalorder %s25_s29, 4  }
 0x938   :  { %24 = sbr.rel (!%p22_p4) target bundleno = 1 (0x1), region = 134 }

</bundles_post_ra>
